<compile_context>
chip_gen: v7x
topology: tpu7x:2x2x1
jax: 0.10.0
libtpu: 0.0.40
codegen_flags: <defaults>
</compile_context>

<pallas_src>
import functools
import math

import jax
import jax.numpy as jnp
from jax.experimental import pallas as pl
from jax.experimental.pallas import tpu as pltpu


def bert_attention_kernel(x_ref, mask_ref, wqkv_ref, bqkv_ref, wo_ref, bo_ref,
                          gamma_ref, beta_ref, out_ref, qkv_scr, ctx_scr,
                          *, num_heads, head_dim, compute_dtype):
    H = num_heads * head_dim

    x_c = x_ref[0].astype(compute_dtype)          # (S, H) bf16 MXU input

    # Fused QKV projection: one well-shaped MXU pass (N = 3H), f32 accumulate.
    # The 1/sqrt(head_dim) softmax scale is already folded into the Q columns.
    # Cast to compute dtype ONCE and park in VMEM scratch (bounds live range,
    # halves the buffer vs keeping the f32 value live across the head loop).
    qkv = jnp.dot(x_c, wqkv_ref[...], preferred_element_type=jnp.float32)
    qkv_scr[...] = (qkv + bqkv_ref[0]).astype(compute_dtype)     # (S, 3H) bf16

    mask_row = mask_ref[0, 0, :]                  # (S,) additive mask, f32

    # Per-head attention from static lane slices of the qkv scratch; only one
    # (S, S) score tile is live per iteration.  Softmax normalization is
    # deferred to the (S, dh) context (S/dh x less VPU work on that multiply).
    for h in range(num_heads):
        lo = h * head_dim
        q_h = qkv_scr[:, lo:lo + head_dim]                       # (S, dh) bf16
        k_h = qkv_scr[:, H + lo:H + lo + head_dim]               # (S, dh) bf16
        v_h = qkv_scr[:, 2 * H + lo:2 * H + lo + head_dim]       # (S, dh) bf16

        s = jax.lax.dot_general(q_h, k_h, (((1,), (1,)), ((), ())),
                                preferred_element_type=jnp.float32)   # (S, S)
        s = s + mask_row[None, :]
        s = s - jnp.max(s, axis=-1, keepdims=True)
        p = jnp.exp(s)
        inv_denom = pl.reciprocal(jnp.sum(p, axis=-1, keepdims=True),
                                  approx=True)                        # (S, 1)
        # attention dropout: identity (eval mode)
        ctx_h = jnp.dot(p.astype(compute_dtype), v_h,
                        preferred_element_type=jnp.float32)           # (S, dh)
        ctx_scr[:, lo:lo + head_dim] = (ctx_h * inv_denom).astype(compute_dtype)

    # BertSelfOutput: dense + dropout(identity) + residual + LayerNorm (f32).
    proj = jnp.dot(ctx_scr[...], wo_ref[...],
                   preferred_element_type=jnp.float32) + bo_ref[0]
    y = proj + x_ref[0].astype(jnp.float32)       # residual read at point of use

    inv_h = jnp.float32(1.0 / H)
    mean = jnp.sum(y, axis=-1, keepdims=True) * inv_h
    yc = y - mean
    var = jnp.sum(yc * yc, axis=-1, keepdims=True) * inv_h        # two-pass
    y_norm = yc * jax.lax.rsqrt(var + jnp.float32(1e-12))
    out = y_norm * gamma_ref[0] + beta_ref[0]

    out_ref[0] = out.astype(out_ref.dtype)


def _vmem_estimate_bytes(B, S, H, x_itemsize, out_itemsize):
    """Rough per-grid-step VMEM working set (double-buffered blocks + weights
    + scratch + transient f32 tiles)."""
    bf, f32 = 2, 4
    blocks = 2 * S * H * (x_itemsize + out_itemsize)          # x + out, 2 bufs each
    mask_b = 2 * S * f32
    weights = 2 * (H * 3 * H * bf + 3 * H * f32               # wqkv, bqkv
                   + H * H * bf + H * f32                     # wo, bo
                   + 2 * H * f32)                             # gamma, beta
    scratch = S * 3 * H * bf + S * H * bf                     # qkv + ctx scratch
    transient = S * 3 * H * f32 + 3 * S * S * f32 + 2 * S * H * f32
    return blocks + mask_b + weights + scratch + transient


def bert_attention(x, attention_mask, params, *, num_heads,
                   compute_dtype=jnp.bfloat16):
    """x: (B,S,H); attention_mask: BERT additive mask (B,1,1,S).
    params: PyTorch-style (wq,bq,wk,bk,wv,bv,wo,bo,gamma,beta), with the (H,H)
    weights PRE-TRANSPOSED so that y = x @ W + b matches nn.Linear."""
    B, S, H = x.shape
    head_dim = H // num_heads
    wq, bq, wk, bk, wv, bv, wo, bo, gamma, beta = params

    scale = 1.0 / math.sqrt(head_dim)
    # Fold the softmax scale into the Q projection and pack Q/K/V into one
    # (H, 3H) weight -> a single MXU pass instead of three.
    wqkv = jnp.concatenate([wq * scale, wk, wv], axis=1).astype(compute_dtype)
    bqkv = jnp.concatenate([bq * scale, bk, bv], axis=1).astype(jnp.float32)
    wo_c = wo.astype(compute_dtype)
    bo_f = bo.astype(jnp.float32)
    gamma_f = gamma.astype(jnp.float32)
    beta_f = beta.astype(jnp.float32)
    # Lane-dense additive mask block: (B, 1, S) instead of 4-D (B,1,1,S).
    mask = attention_mask.reshape(B, 1, S).astype(jnp.float32)

    kernel = functools.partial(bert_attention_kernel, num_heads=num_heads,
                               head_dim=head_dim, compute_dtype=compute_dtype)

    def const_spec(arr):
        # Grid-invariant block (same block index every grid step) -> DMA'd once.
        return pl.BlockSpec(arr.shape, lambda b: (0,) * arr.ndim)

    # Right-sized VMEM limit (2x estimate for slack, 16 MiB floor, 64 MiB cap).
    est = _vmem_estimate_bytes(B, S, H, x.dtype.itemsize, x.dtype.itemsize)
    vmem_limit = int(min(max(2 * est, 16 * 2**20), 64 * 2**20))

    # Advisory cost estimate for XLA's scheduler around the custom call.
    flops = B * (2 * S * H * 3 * H          # fused QKV projection
                 + 4 * S * S * H            # QK^T + PV over all heads
                 + 2 * S * H * H)           # output projection
    transcendentals = B * num_heads * S * S  # exp
    bytes_accessed = (x.size * x.dtype.itemsize        # read x
                      + B * S * H * x.dtype.itemsize   # write out
                      + mask.size * 4
                      + wqkv.size * 2 + wo_c.size * 2
                      + (bqkv.size + bo_f.size + gamma_f.size + beta_f.size) * 4)
    cost = pl.CostEstimate(flops=int(flops),
                           transcendentals=int(transcendentals),
                           bytes_accessed=int(bytes_accessed))

    return pl.pallas_call(
        kernel,
        out_shape=jax.ShapeDtypeStruct((B, S, H), x.dtype),
        grid_spec=pltpu.PrefetchScalarGridSpec(
            num_scalar_prefetch=0,
            grid=(B,),
            in_specs=[
                pl.BlockSpec((1, S, H), lambda b: (b, 0, 0)),     # x
                pl.BlockSpec((1, 1, S), lambda b: (b, 0, 0)),     # mask
                const_spec(wqkv), const_spec(bqkv),               # W_qkv, b_qkv
                const_spec(wo_c), const_spec(bo_f),               # Wo, bo
                const_spec(gamma_f), const_spec(beta_f),          # LN gamma/beta
            ],
            out_specs=pl.BlockSpec((1, S, H), lambda b: (b, 0, 0)),
            scratch_shapes=[
                pltpu.VMEM((S, 3 * H), compute_dtype),            # fused qkv
                pltpu.VMEM((S, H), compute_dtype),                # context
            ],
        ),
        compiler_params=pltpu.CompilerParams(
            dimension_semantics=("parallel",),
            vmem_limit_bytes=vmem_limit),
        cost_estimate=cost,
    )(x, mask, wqkv, bqkv, wo_c, bo_f, gamma_f, beta_f)


def reference(x, attention_mask, params, *, num_heads,
              compute_dtype=jnp.bfloat16):
    """Pure-JAX mirror of the PyTorch forward (eval mode) using the same
    mixed-precision policy as the kernel: compute_dtype matmul inputs,
    f32 accumulation, f32 softmax / LayerNorm."""
    wq, bq, wk, bk, wv, bv, wo, bo, gamma, beta = params
    B, S, H = x.shape
    dh = H // num_heads
    cd = compute_dtype
    xc = x.astype(cd)

    def dense(t_cd, w, b):
        return (jnp.einsum('bsh,hk->bsk', t_cd, w.astype(cd),
                           preferred_element_type=jnp.float32)
                + b.astype(jnp.float32)[0])

    def split(t):
        return t.reshape(B, S, num_heads, dh).transpose(0, 2, 1, 3)

    q = split(dense(xc, wq, bq))
    k = split(dense(xc, wk, bk))
    v = split(dense(xc, wv, bv))

    scores = jnp.einsum('bhqd,bhkd->bhqk', q.astype(cd), k.astype(cd),
                        preferred_element_type=jnp.float32) / math.sqrt(dh)
    scores = scores + attention_mask.astype(jnp.float32)   # (B,1,1,S) broadcasts
    probs = jax.nn.softmax(scores, axis=-1)
    ctx = jnp.einsum('bhqk,bhkd->bhqd', probs.astype(cd), v.astype(cd),
                     preferred_element_type=jnp.float32)
    ctx = ctx.transpose(0, 2, 1, 3).reshape(B, S, H)

    y = dense(ctx.astype(cd), wo, bo) + x.astype(jnp.float32)
    mean = jnp.mean(y, axis=-1, keepdims=True)
    var = jnp.mean((y - mean) ** 2, axis=-1, keepdims=True)
    return ((y - mean) * jax.lax.rsqrt(var + 1e-12)) * gamma[0] + beta[0]


if __name__ == "__main__":
    # Small shapes consistent with the module (hidden % heads == 0, dh = 64).
    B, S, H, NH = 2, 128, 256, 4

    key = jax.random.PRNGKey(0)
    keys = jax.random.split(key, 12)
    sc = 0.02

    x = jax.random.normal(keys[0], (B, S, H), dtype=jnp.float32)
    # BERT extended additive mask: last 32 tokens of batch element 1 are padding.
    pad = jnp.zeros((B, S), jnp.float32).at[1, -32:].set(-10000.0)
    mask = pad[:, None, None, :]                               # (B, 1, 1, S)

    params = (
        sc * jax.random.normal(keys[1], (H, H), jnp.float32),  # Wq (pre-transposed)
        sc * jax.random.normal(keys[2], (1, H), jnp.float32),  # bq
        sc * jax.random.normal(keys[3], (H, H), jnp.float32),  # Wk
        sc * jax.random.normal(keys[4], (1, H), jnp.float32),  # bk
        sc * jax.random.normal(keys[5], (H, H), jnp.float32),  # Wv
        sc * jax.random.normal(keys[6], (1, H), jnp.float32),  # bv
        sc * jax.random.normal(keys[7], (H, H), jnp.float32),  # Wo
        sc * jax.random.normal(keys[8], (1, H), jnp.float32),  # bo
        1.0 + 0.1 * jax.random.normal(keys[9], (1, H), jnp.float32),   # LN gamma
        0.1 * jax.random.normal(keys[10], (1, H), jnp.float32),        # LN beta
    )

    out = bert_attention(x, mask, params, num_heads=NH)
    out = jax.block_until_ready(out)

    ref = reference(x, mask, params, num_heads=NH)
    assert out.shape == (B, S, H)
    max_err = jnp.max(jnp.abs(out - ref))
    # Tolerance reflects bf16 MXU inputs + approximate softmax reciprocal.
    assert jnp.allclose(out, ref, atol=5e-3, rtol=5e-3), f"mismatch: {max_err}"

    print("KERNEL_OK")
</pallas_src>

<mosaic_0001>
module attributes {stable_mosaic.version = 11 : i64} {
  func.func @bert_attention_kernel(%arg0: i32, %arg1: memref<1x128x256xf32, #tpu.memory_space<vmem>>, %arg2: memref<1x1x128xf32, #tpu.memory_space<vmem>>, %arg3: memref<256x768xbf16, #tpu.memory_space<vmem>>, %arg4: memref<1x768xf32, #tpu.memory_space<vmem>>, %arg5: memref<256x256xbf16, #tpu.memory_space<vmem>>, %arg6: memref<1x256xf32, #tpu.memory_space<vmem>>, %arg7: memref<1x256xf32, #tpu.memory_space<vmem>>, %arg8: memref<1x256xf32, #tpu.memory_space<vmem>>, %arg9: memref<1x128x256xf32, #tpu.memory_space<vmem>>, %arg10: memref<128x768xbf16, #tpu.memory_space<vmem>>, %arg11: memref<128x256xbf16, #tpu.memory_space<vmem>>) attributes {dimension_semantics = [#tpu.dimension_semantics<parallel>], iteration_bounds = array<i64: 2>, scalar_prefetch = 0 : i64, scratch_operands = 2 : i64, tpu.core_type = #tpu.core_type<tc>, window_params = [{transform_indices = @transform_0, window_bounds = array<i64: 1, 128, 256>}, {transform_indices = @transform_1, window_bounds = array<i64: 1, 1, 128>}, {pipeline_mode = #tpu.pipeline_mode<synchronous>, transform_indices = @transform_2, window_bounds = array<i64: 256, 768>}, {pipeline_mode = #tpu.pipeline_mode<synchronous>, transform_indices = @transform_3, window_bounds = array<i64: 1, 768>}, {pipeline_mode = #tpu.pipeline_mode<synchronous>, transform_indices = @transform_4, window_bounds = array<i64: 256, 256>}, {pipeline_mode = #tpu.pipeline_mode<synchronous>, transform_indices = @transform_5, window_bounds = array<i64: 1, 256>}, {pipeline_mode = #tpu.pipeline_mode<synchronous>, transform_indices = @transform_6, window_bounds = array<i64: 1, 256>}, {pipeline_mode = #tpu.pipeline_mode<synchronous>, transform_indices = @transform_7, window_bounds = array<i64: 1, 256>}, {transform_indices = @transform_8, window_bounds = array<i64: 1, 128, 256>}]} {
    %c0 = arith.constant 0 : index
    %c0_0 = arith.constant 0 : index
    %c0_1 = arith.constant 0 : index
    %0 = vector.load %arg1[%c0, %c0_0, %c0_1] : memref<1x128x256xf32, #tpu.memory_space<vmem>>, vector<1x128x256xf32>
    %1 = vector.shape_cast %0 : vector<1x128x256xf32> to vector<128x256xf32>
    %2 = arith.truncf %1 : vector<128x256xf32> to vector<128x256xbf16>
    %c0_2 = arith.constant 0 : index
    %c0_3 = arith.constant 0 : index
    %3 = vector.load %arg3[%c0_2, %c0_3] : memref<256x768xbf16, #tpu.memory_space<vmem>>, vector<256x768xbf16>
    %cst = arith.constant dense<0.000000e+00> : vector<128x768xf32>
    %4 = tpu.matmul %2, %3, %cst {dimension_numbers = #tpu.dot_dimension_numbers<[1], [0], [0], [1], [0, 0, 1, 1], [], []>} : vector<128x256xbf16>, vector<256x768xbf16>, vector<128x768xf32> -> vector<128x768xf32>
    %c0_4 = arith.constant 0 : index
    %c0_5 = arith.constant 0 : index
    %5 = vector.load %arg4[%c0_4, %c0_5] : memref<1x768xf32, #tpu.memory_space<vmem>>, vector<1x768xf32>
    %6 = vector.shape_cast %5 : vector<1x768xf32> to vector<768xf32>
    %7 = vector.shape_cast %6 : vector<768xf32> to vector<1x768xf32>
    %8 = vector.broadcast %7 : vector<1x768xf32> to vector<128x768xf32>
    %9 = arith.addf %4, %8 : vector<128x768xf32>
    %10 = arith.truncf %9 : vector<128x768xf32> to vector<128x768xbf16>
    %c0_6 = arith.constant 0 : index
    %c0_7 = arith.constant 0 : index
    %11 = vector.load %arg10[%c0_6, %c0_7] : memref<128x768xbf16, #tpu.memory_space<vmem>>, vector<128x768xbf16>
    tpu.vector_store %arg10[%c0_6, %c0_7], %10 {strides = array<i32>} : memref<128x768xbf16, #tpu.memory_space<vmem>>, vector<128x768xbf16>,
    %c0_8 = arith.constant 0 : index
    %c0_9 = arith.constant 0 : index
    %c0_10 = arith.constant 0 : index
    %12 = vector.load %arg2[%c0_8, %c0_9, %c0_10] : memref<1x1x128xf32, #tpu.memory_space<vmem>>, vector<1x1x128xf32>
    %13 = vector.shape_cast %12 : vector<1x1x128xf32> to vector<128xf32>
    %c0_11 = arith.constant 0 : index
    %c0_12 = arith.constant 0 : index
    %14 = vector.load %arg10[%c0_11, %c0_12] : memref<128x768xbf16, #tpu.memory_space<vmem>>, vector<128x64xbf16>
    %c0_13 = arith.constant 0 : index
    %c256 = arith.constant 256 : index
    %15 = vector.load %arg10[%c0_13, %c256] : memref<128x768xbf16, #tpu.memory_space<vmem>>, vector<128x64xbf16>
    %c0_14 = arith.constant 0 : index
    %c512 = arith.constant 512 : index
    %16 = vector.load %arg10[%c0_14, %c512] : memref<128x768xbf16, #tpu.memory_space<vmem>>, vector<128x64xbf16>
    %cst_15 = arith.constant dense<0.000000e+00> : vector<128x128xf32>
    %17 = tpu.matmul %14, %15, %cst_15 {dimension_numbers = #tpu.dot_dimension_numbers<[1], [1], [0], [0], [0, 0, 1, 0], [], []>} : vector<128x64xbf16>, vector<128x64xbf16>, vector<128x128xf32> -> vector<128x128xf32>
    %18 = vector.shape_cast %13 : vector<128xf32> to vector<1x128xf32>
    %19 = vector.broadcast %18 : vector<1x128xf32> to vector<128x128xf32>
    %20 = arith.addf %17, %19 : vector<128x128xf32>
    %cst_16 = arith.constant dense<0xFF800000> : vector<128xf32>
    %21 = vector.multi_reduction <maximumf>, %20, %cst_16 [1] : vector<128x128xf32> to vector<128xf32>
    %22 = vector.shape_cast %21 : vector<128xf32> to vector<128x1xf32>
    %23 = vector.broadcast %22 : vector<128x1xf32> to vector<128x128xf32>
    %24 = arith.subf %20, %23 : vector<128x128xf32>
    %25 = math.exp %24 : vector<128x128xf32>
    %cst_17 = arith.constant dense<0.000000e+00> : vector<128xf32>
    %26 = vector.multi_reduction <add>, %25, %cst_17 [1] : vector<128x128xf32> to vector<128xf32>
    %27 = vector.shape_cast %26 : vector<128xf32> to vector<128x1xf32>
    %28 = tpu.reciprocal %27 {approx = true} : vector<128x1xf32> -> vector<128x1xf32>
    %29 = arith.truncf %25 : vector<128x128xf32> to vector<128x128xbf16>
    %cst_18 = arith.constant dense<0.000000e+00> : vector<128x64xf32>
    %30 = tpu.matmul %29, %16, %cst_18 {dimension_numbers = #tpu.dot_dimension_numbers<[1], [0], [0], [1], [0, 0, 1, 1], [], []>} : vector<128x128xbf16>, vector<128x64xbf16>, vector<128x64xf32> -> vector<128x64xf32>
    %31 = vector.broadcast %28 : vector<128x1xf32> to vector<128x64xf32>
    %32 = arith.mulf %30, %31 : vector<128x64xf32>
    %33 = arith.truncf %32 : vector<128x64xf32> to vector<128x64xbf16>
    %c0_19 = arith.constant 0 : index
    %c0_20 = arith.constant 0 : index
    %34 = vector.load %arg11[%c0_19, %c0_20] : memref<128x256xbf16, #tpu.memory_space<vmem>>, vector<128x64xbf16>
    tpu.vector_store %arg11[%c0_19, %c0_20], %33 {strides = array<i32>} : memref<128x256xbf16, #tpu.memory_space<vmem>>, vector<128x64xbf16>,
    %c0_21 = arith.constant 0 : index
    %c64 = arith.constant 64 : index
    %35 = vector.load %arg10[%c0_21, %c64] : memref<128x768xbf16, #tpu.memory_space<vmem>>, vector<128x64xbf16>
    %c0_22 = arith.constant 0 : index
    %c320 = arith.constant 320 : index
    %36 = vector.load %arg10[%c0_22, %c320] : memref<128x768xbf16, #tpu.memory_space<vmem>>, vector<128x64xbf16>
    %c0_23 = arith.constant 0 : index
    %c576 = arith.constant 576 : index
    %37 = vector.load %arg10[%c0_23, %c576] : memref<128x768xbf16, #tpu.memory_space<vmem>>, vector<128x64xbf16>
    %cst_24 = arith.constant dense<0.000000e+00> : vector<128x128xf32>
    %38 = tpu.matmul %35, %36, %cst_24 {dimension_numbers = #tpu.dot_dimension_numbers<[1], [1], [0], [0], [0, 0, 1, 0], [], []>} : vector<128x64xbf16>, vector<128x64xbf16>, vector<128x128xf32> -> vector<128x128xf32>
    %39 = vector.shape_cast %13 : vector<128xf32> to vector<1x128xf32>
    %40 = vector.broadcast %39 : vector<1x128xf32> to vector<128x128xf32>
    %41 = arith.addf %38, %40 : vector<128x128xf32>
    %cst_25 = arith.constant dense<0xFF800000> : vector<128xf32>
    %42 = vector.multi_reduction <maximumf>, %41, %cst_25 [1] : vector<128x128xf32> to vector<128xf32>
    %43 = vector.shape_cast %42 : vector<128xf32> to vector<128x1xf32>
    %44 = vector.broadcast %43 : vector<128x1xf32> to vector<128x128xf32>
    %45 = arith.subf %41, %44 : vector<128x128xf32>
    %46 = math.exp %45 : vector<128x128xf32>
    %cst_26 = arith.constant dense<0.000000e+00> : vector<128xf32>
    %47 = vector.multi_reduction <add>, %46, %cst_26 [1] : vector<128x128xf32> to vector<128xf32>
    %48 = vector.shape_cast %47 : vector<128xf32> to vector<128x1xf32>
    %49 = tpu.reciprocal %48 {approx = true} : vector<128x1xf32> -> vector<128x1xf32>
    %50 = arith.truncf %46 : vector<128x128xf32> to vector<128x128xbf16>
    %cst_27 = arith.constant dense<0.000000e+00> : vector<128x64xf32>
    %51 = tpu.matmul %50, %37, %cst_27 {dimension_numbers = #tpu.dot_dimension_numbers<[1], [0], [0], [1], [0, 0, 1, 1], [], []>} : vector<128x128xbf16>, vector<128x64xbf16>, vector<128x64xf32> -> vector<128x64xf32>
    %52 = vector.broadcast %49 : vector<128x1xf32> to vector<128x64xf32>
    %53 = arith.mulf %51, %52 : vector<128x64xf32>
    %54 = arith.truncf %53 : vector<128x64xf32> to vector<128x64xbf16>
    %c0_28 = arith.constant 0 : index
    %c64_29 = arith.constant 64 : index
    %55 = vector.load %arg11[%c0_28, %c64_29] : memref<128x256xbf16, #tpu.memory_space<vmem>>, vector<128x64xbf16>
    tpu.vector_store %arg11[%c0_28, %c64_29], %54 {strides = array<i32>} : memref<128x256xbf16, #tpu.memory_space<vmem>>, vector<128x64xbf16>,
    %c0_30 = arith.constant 0 : index
    %c128 = arith.constant 128 : index
    %56 = vector.load %arg10[%c0_30, %c128] : memref<128x768xbf16, #tpu.memory_space<vmem>>, vector<128x64xbf16>
    %c0_31 = arith.constant 0 : index
    %c384 = arith.constant 384 : index
    %57 = vector.load %arg10[%c0_31, %c384] : memref<128x768xbf16, #tpu.memory_space<vmem>>, vector<128x64xbf16>
    %c0_32 = arith.constant 0 : index
    %c640 = arith.constant 640 : index
    %58 = vector.load %arg10[%c0_32, %c640] : memref<128x768xbf16, #tpu.memory_space<vmem>>, vector<128x64xbf16>
    %cst_33 = arith.constant dense<0.000000e+00> : vector<128x128xf32>
    %59 = tpu.matmul %56, %57, %cst_33 {dimension_numbers = #tpu.dot_dimension_numbers<[1], [1], [0], [0], [0, 0, 1, 0], [], []>} : vector<128x64xbf16>, vector<128x64xbf16>, vector<128x128xf32> -> vector<128x128xf32>
    %60 = vector.shape_cast %13 : vector<128xf32> to vector<1x128xf32>
    %61 = vector.broadcast %60 : vector<1x128xf32> to vector<128x128xf32>
    %62 = arith.addf %59, %61 : vector<128x128xf32>
    %cst_34 = arith.constant dense<0xFF800000> : vector<128xf32>
    %63 = vector.multi_reduction <maximumf>, %62, %cst_34 [1] : vector<128x128xf32> to vector<128xf32>
    %64 = vector.shape_cast %63 : vector<128xf32> to vector<128x1xf32>
    %65 = vector.broadcast %64 : vector<128x1xf32> to vector<128x128xf32>
    %66 = arith.subf %62, %65 : vector<128x128xf32>
    %67 = math.exp %66 : vector<128x128xf32>
    %cst_35 = arith.constant dense<0.000000e+00> : vector<128xf32>
    %68 = vector.multi_reduction <add>, %67, %cst_35 [1] : vector<128x128xf32> to vector<128xf32>
    %69 = vector.shape_cast %68 : vector<128xf32> to vector<128x1xf32>
    %70 = tpu.reciprocal %69 {approx = true} : vector<128x1xf32> -> vector<128x1xf32>
    %71 = arith.truncf %67 : vector<128x128xf32> to vector<128x128xbf16>
    %cst_36 = arith.constant dense<0.000000e+00> : vector<128x64xf32>
    %72 = tpu.matmul %71, %58, %cst_36 {dimension_numbers = #tpu.dot_dimension_numbers<[1], [0], [0], [1], [0, 0, 1, 1], [], []>} : vector<128x128xbf16>, vector<128x64xbf16>, vector<128x64xf32> -> vector<128x64xf32>
    %73 = vector.broadcast %70 : vector<128x1xf32> to vector<128x64xf32>
    %74 = arith.mulf %72, %73 : vector<128x64xf32>
    %75 = arith.truncf %74 : vector<128x64xf32> to vector<128x64xbf16>
    %c0_37 = arith.constant 0 : index
    %c128_38 = arith.constant 128 : index
    %76 = vector.load %arg11[%c0_37, %c128_38] : memref<128x256xbf16, #tpu.memory_space<vmem>>, vector<128x64xbf16>
    tpu.vector_store %arg11[%c0_37, %c128_38], %75 {strides = array<i32>} : memref<128x256xbf16, #tpu.memory_space<vmem>>, vector<128x64xbf16>,
    %c0_39 = arith.constant 0 : index
    %c192 = arith.constant 192 : index
    %77 = vector.load %arg10[%c0_39, %c192] : memref<128x768xbf16, #tpu.memory_space<vmem>>, vector<128x64xbf16>
    %c0_40 = arith.constant 0 : index
    %c448 = arith.constant 448 : index
    %78 = vector.load %arg10[%c0_40, %c448] : memref<128x768xbf16, #tpu.memory_space<vmem>>, vector<128x64xbf16>
    %c0_41 = arith.constant 0 : index
    %c704 = arith.constant 704 : index
    %79 = vector.load %arg10[%c0_41, %c704] : memref<128x768xbf16, #tpu.memory_space<vmem>>, vector<128x64xbf16>
    %cst_42 = arith.constant dense<0.000000e+00> : vector<128x128xf32>
    %80 = tpu.matmul %77, %78, %cst_42 {dimension_numbers = #tpu.dot_dimension_numbers<[1], [1], [0], [0], [0, 0, 1, 0], [], []>} : vector<128x64xbf16>, vector<128x64xbf16>, vector<128x128xf32> -> vector<128x128xf32>
    %81 = vector.shape_cast %13 : vector<128xf32> to vector<1x128xf32>
    %82 = vector.broadcast %81 : vector<1x128xf32> to vector<128x128xf32>
    %83 = arith.addf %80, %82 : vector<128x128xf32>
    %cst_43 = arith.constant dense<0xFF800000> : vector<128xf32>
    %84 = vector.multi_reduction <maximumf>, %83, %cst_43 [1] : vector<128x128xf32> to vector<128xf32>
    %85 = vector.shape_cast %84 : vector<128xf32> to vector<128x1xf32>
    %86 = vector.broadcast %85 : vector<128x1xf32> to vector<128x128xf32>
    %87 = arith.subf %83, %86 : vector<128x128xf32>
    %88 = math.exp %87 : vector<128x128xf32>
    %cst_44 = arith.constant dense<0.000000e+00> : vector<128xf32>
    %89 = vector.multi_reduction <add>, %88, %cst_44 [1] : vector<128x128xf32> to vector<128xf32>
    %90 = vector.shape_cast %89 : vector<128xf32> to vector<128x1xf32>
    %91 = tpu.reciprocal %90 {approx = true} : vector<128x1xf32> -> vector<128x1xf32>
    %92 = arith.truncf %88 : vector<128x128xf32> to vector<128x128xbf16>
    %cst_45 = arith.constant dense<0.000000e+00> : vector<128x64xf32>
    %93 = tpu.matmul %92, %79, %cst_45 {dimension_numbers = #tpu.dot_dimension_numbers<[1], [0], [0], [1], [0, 0, 1, 1], [], []>} : vector<128x128xbf16>, vector<128x64xbf16>, vector<128x64xf32> -> vector<128x64xf32>
    %94 = vector.broadcast %91 : vector<128x1xf32> to vector<128x64xf32>
    %95 = arith.mulf %93, %94 : vector<128x64xf32>
    %96 = arith.truncf %95 : vector<128x64xf32> to vector<128x64xbf16>
    %c0_46 = arith.constant 0 : index
    %c192_47 = arith.constant 192 : index
    %97 = vector.load %arg11[%c0_46, %c192_47] : memref<128x256xbf16, #tpu.memory_space<vmem>>, vector<128x64xbf16>
    tpu.vector_store %arg11[%c0_46, %c192_47], %96 {strides = array<i32>} : memref<128x256xbf16, #tpu.memory_space<vmem>>, vector<128x64xbf16>,
    %c0_48 = arith.constant 0 : index
    %c0_49 = arith.constant 0 : index
    %98 = vector.load %arg11[%c0_48, %c0_49] : memref<128x256xbf16, #tpu.memory_space<vmem>>, vector<128x256xbf16>
    %c0_50 = arith.constant 0 : index
    %c0_51 = arith.constant 0 : index
    %99 = vector.load %arg5[%c0_50, %c0_51] : memref<256x256xbf16, #tpu.memory_space<vmem>>, vector<256x256xbf16>
    %cst_52 = arith.constant dense<0.000000e+00> : vector<128x256xf32>
    %100 = tpu.matmul %98, %99, %cst_52 {dimension_numbers = #tpu.dot_dimension_numbers<[1], [0], [0], [1], [0, 0, 1, 1], [], []>} : vector<128x256xbf16>, vector<256x256xbf16>, vector<128x256xf32> -> vector<128x256xf32>
    %c0_53 = arith.constant 0 : index
    %c0_54 = arith.constant 0 : index
    %101 = vector.load %arg6[%c0_53, %c0_54] : memref<1x256xf32, #tpu.memory_space<vmem>>, vector<1x256xf32>
    %102 = vector.shape_cast %101 : vector<1x256xf32> to vector<256xf32>
    %103 = vector.shape_cast %102 : vector<256xf32> to vector<1x256xf32>
    %104 = vector.broadcast %103 : vector<1x256xf32> to vector<128x256xf32>
    %105 = arith.addf %100, %104 : vector<128x256xf32>
    %c0_55 = arith.constant 0 : index
    %c0_56 = arith.constant 0 : index
    %c0_57 = arith.constant 0 : index
    %106 = vector.load %arg1[%c0_55, %c0_56, %c0_57] : memref<1x128x256xf32, #tpu.memory_space<vmem>>, vector<1x128x256xf32>
    %107 = vector.shape_cast %106 : vector<1x128x256xf32> to vector<128x256xf32>
    %108 = arith.addf %105, %107 : vector<128x256xf32>
    %cst_58 = arith.constant dense<0.000000e+00> : vector<128xf32>
    %109 = vector.multi_reduction <add>, %108, %cst_58 [1] : vector<128x256xf32> to vector<128xf32>
    %110 = vector.shape_cast %109 : vector<128xf32> to vector<128x1xf32>
    %cst_59 = arith.constant 3.906250e-03 : f32
    %111 = vector.broadcast %cst_59 : f32 to vector<128x1xf32>
    %112 = arith.mulf %110, %111 : vector<128x1xf32>
    %113 = vector.broadcast %112 : vector<128x1xf32> to vector<128x256xf32>
    %114 = arith.subf %108, %113 : vector<128x256xf32>
    %115 = arith.mulf %114, %114 : vector<128x256xf32>
    %cst_60 = arith.constant dense<0.000000e+00> : vector<128xf32>
    %116 = vector.multi_reduction <add>, %115, %cst_60 [1] : vector<128x256xf32> to vector<128xf32>
    %117 = vector.shape_cast %116 : vector<128xf32> to vector<128x1xf32>
    %cst_61 = arith.constant 3.906250e-03 : f32
    %118 = vector.broadcast %cst_61 : f32 to vector<128x1xf32>
    %119 = arith.mulf %117, %118 : vector<128x1xf32>
    %cst_62 = arith.constant 9.99999996E-13 : f32
    %120 = vector.broadcast %cst_62 : f32 to vector<128x1xf32>
    %121 = arith.addf %119, %120 : vector<128x1xf32>
    %122 = math.rsqrt %121 : vector<128x1xf32>
    %123 = vector.broadcast %122 : vector<128x1xf32> to vector<128x256xf32>
    %124 = arith.mulf %114, %123 : vector<128x256xf32>
    %c0_63 = arith.constant 0 : index
    %c0_64 = arith.constant 0 : index
    %125 = vector.load %arg7[%c0_63, %c0_64] : memref<1x256xf32, #tpu.memory_space<vmem>>, vector<1x256xf32>
    %126 = vector.shape_cast %125 : vector<1x256xf32> to vector<256xf32>
    %127 = vector.shape_cast %126 : vector<256xf32> to vector<1x256xf32>
    %128 = vector.broadcast %127 : vector<1x256xf32> to vector<128x256xf32>
    %129 = arith.mulf %124, %128 : vector<128x256xf32>
    %c0_65 = arith.constant 0 : index
    %c0_66 = arith.constant 0 : index
    %130 = vector.load %arg8[%c0_65, %c0_66] : memref<1x256xf32, #tpu.memory_space<vmem>>, vector<1x256xf32>
    %131 = vector.shape_cast %130 : vector<1x256xf32> to vector<256xf32>
    %132 = vector.shape_cast %131 : vector<256xf32> to vector<1x256xf32>
    %133 = vector.broadcast %132 : vector<1x256xf32> to vector<128x256xf32>
    %134 = arith.addf %129, %133 : vector<128x256xf32>
    %c0_67 = arith.constant 0 : index
    %c0_68 = arith.constant 0 : index
    %c0_69 = arith.constant 0 : index
    %135 = vector.load %arg9[%c0_67, %c0_68, %c0_69] : memref<1x128x256xf32, #tpu.memory_space<vmem>>, vector<1x128x256xf32>
    %136 = vector.shape_cast %135 : vector<1x128x256xf32> to vector<128x256xf32>
    %137 = vector.shape_cast %134 : vector<128x256xf32> to vector<1x128x256xf32>
    tpu.vector_store %arg9[%c0_67, %c0_68, %c0_69], %137 {strides = array<i32>} : memref<1x128x256xf32, #tpu.memory_space<vmem>>, vector<1x128x256xf32>,
    return
  }
  func.func @transform_0(%arg0: i32) -> (i32, i32, i32) {
    %c0_i32 = arith.constant 0 : i32
    %c0_i32_0 = arith.constant 0 : i32
    %c0_i32_1 = arith.constant 0 : i32
    return %arg0, %c0_i32, %c0_i32_0 : i32, i32, i32
  }
  func.func @transform_1(%arg0: i32) -> (i32, i32, i32) {
    %c0_i32 = arith.constant 0 : i32
    %c0_i32_0 = arith.constant 0 : i32
    %c0_i32_1 = arith.constant 0 : i32
    return %arg0, %c0_i32, %c0_i32_0 : i32, i32, i32
  }
  func.func @transform_2(%arg0: i32) -> (i32, i32) {
    %c0_i32 = arith.constant 0 : i32
    %c0_i32_0 = arith.constant 0 : i32
    %c0_i32_1 = arith.constant 0 : i32
    return %c0_i32, %c0_i32_0 : i32, i32
  }
  func.func @transform_3(%arg0: i32) -> (i32, i32) {
    %c0_i32 = arith.constant 0 : i32
    %c0_i32_0 = arith.constant 0 : i32
    %c0_i32_1 = arith.constant 0 : i32
    return %c0_i32, %c0_i32_0 : i32, i32
  }
  func.func @transform_4(%arg0: i32) -> (i32, i32) {
    %c0_i32 = arith.constant 0 : i32
    %c0_i32_0 = arith.constant 0 : i32
    %c0_i32_1 = arith.constant 0 : i32
    return %c0_i32, %c0_i32_0 : i32, i32
  }
  func.func @transform_5(%arg0: i32) -> (i32, i32) {
    %c0_i32 = arith.constant 0 : i32
    %c0_i32_0 = arith.constant 0 : i32
    %c0_i32_1 = arith.constant 0 : i32
    return %c0_i32, %c0_i32_0 : i32, i32
  }
  func.func @transform_6(%arg0: i32) -> (i32, i32) {
    %c0_i32 = arith.constant 0 : i32
    %c0_i32_0 = arith.constant 0 : i32
    %c0_i32_1 = arith.constant 0 : i32
    return %c0_i32, %c0_i32_0 : i32, i32
  }
  func.func @transform_7(%arg0: i32) -> (i32, i32) {
    %c0_i32 = arith.constant 0 : i32
    %c0_i32_0 = arith.constant 0 : i32
    %c0_i32_1 = arith.constant 0 : i32
    return %c0_i32, %c0_i32_0 : i32, i32
  }
  func.func @transform_8(%arg0: i32) -> (i32, i32, i32) {
    %c0_i32 = arith.constant 0 : i32
    %c0_i32_0 = arith.constant 0 : i32
    %c0_i32_1 = arith.constant 0 : i32
    return %arg0, %c0_i32, %c0_i32_0 : i32, i32, i32
  }
}

</mosaic_0001>

<bundles_post_ra>
// kernel: tpu_custom_call.1
= control target key start
LH: loop header
LB: loop body
LE: loop exit
PB: predicated region body
PF: predicated region fallthrough
CT: control target
= control target key end

     0   :  { %13 = vsyncpa [#allocation5], 0  ;;  %s7908_s0 = inlined_call_operand.hbm [shape: f32[2,128,256], index: 0, kind: input, shape index: {}]   ;;  %s7909_s1 = inlined_call_operand.vmem [shape: f32[2,1,128], index: 1, kind: input, shape index: {}]   ;;  %s7910_s2 = inlined_call_operand.hbm [shape: bf16[256,768], index: 2, kind: input, shape index: {}]   ;;  %s7911_s3 = inlined_call_operand.vmem [shape: f32[1,768], index: 3, kind: input, shape index: {}]   ;;  %s7912_s4 = inlined_call_operand.hbm [shape: bf16[256,256], index: 4, kind: input, shape index: {}]   ;;  %s7913_s5 = inlined_call_operand.vmem [shape: f32[1,256], index: 5, kind: input, shape index: {}]   ;;  %s7914_s6 = inlined_call_operand.vmem [shape: f32[1,256], index: 6, kind: input, shape index: {}]   ;;  %s7915_s7 = inlined_call_operand.vmem [shape: f32[1,256], index: 7, kind: input, shape index: {}]   ;;  %s7916_s8 = inlined_call_operand.hbm [shape: f32[2,128,256], index: 8, kind: output, shape index: {}]  }
   0x1   :  { %15 = vsyncpa [#allocation5 + $0x1], 0 }
   0x2   :  { %16 = vsyncpa [#allocation8], 0 }
   0x3   :  { %17 = vsyncpa [#allocation6], 0 }
   0x4   :  { %19 = vsyncpa [#allocation6 + $0x1], 0  ;;  %s5686_s27 = smov 0   ;;  %s5688_s28 = smov 0  }
   0x5   :  { %s5690_s29 = smov 0   ;;  %s5692_s30 = smov 0  }
   0x6 LB: > { %s5707_s9 = sadd.s32 4294967295, %s5626_s30   ;;  %s4316_s10 = sadd.s32 4294967294, %s5626_s30   ;;  %s5626_s30 = sphi %s5692_s30, %s8102_s30   ;;  %s5622_s29 = sphi %s5690_s29, %s8101_s29   ;;  %s5618_s28 = sphi %s5688_s28, %s8100_s28   ;;  %s5614_s27 = sphi %s5686_s27, %s8099_s27  }
   0x7   : > { %p45_p0 = scmp.ne.s32.totalorder %s5618_s28, %s5614_s27  ;;  %p7917_p1 = scmp.eq.s32.totalorder %s5707_s9, 0 }
   0x8   : > { %p227_p3 = scmp.eq.s32.totalorder %s4316_s10, 1  ;;  %p4317_p5 = scmp.ge.s32.totalorder %s5626_s30, 1 }
   0x9   : > { %p5716_p4 = por %p7917_p1, %p45_p0  ;;  %p234_p7 = scmp.lt.s32.totalorder %s5626_s30, 3 }
   0xa   : > { %p5721_p6 = por %p227_p3, %p45_p0  ;;  %s5628_s14 = smov [#allocation7]  }
   0xb   : > { %s7948_s11 = scalar_select %p5716_p4, 1, 0 }
   0xc   : > { %s7949_s12 = scalar_select %p5721_p6, 1, 0 }
   0xd   : > { %p5726_p8 = pnand %p4317_p5, %p234_p7  ;;  %s246_s15 = sshll.u32 %s5628_s14, 4  ;;  %s5730_s15 = int_to_ptr.vmem [resolvable:$true] %s246_s15 }
   0xe   : > { %s5629_s17 = smov [#allocation9]   ;;  %s5470_s21 = scalar_lea.hbm %s7910_s2, 12288 }
   0xf   : > { %p4925_p9 = pneg %p5726_p8  ;;  %s262_s18 = sshll.u32 %s5629_s17, 4  ;;  %s5741_s18 = int_to_ptr.vmem [resolvable:$true] %s262_s18 }
  0x10   : > { %p5471_p12 = scmp.ne.s32.totalorder %s7910_s2, %s5470_s21  ;;  %p5477_p5 = scmp.lt.u32.totalorder %s5470_s21, %s7910_s2 }
  0x11   : > { %p5737_p11 = pnand %p4925_p9, %p7917_p1 }
  0x13   : > { %p5472_p13 = pneg %p5737_p11 }
  0x15   : > { %p5473_p0 = pnand %p5472_p13, %p5471_p12 }
  0x17   : > { %p5474_p3 = pneg %p5473_p0 }
  0x19   : > { %p5479_p7 = pnand %p5477_p5, %p5474_p3 }
  0x1b   : > { %5482 = shalt.err (!%p5479_p7)
}
  0x1c   : > { %s5483_s26 = scalar_lea.vmem %s5730_s15, 12288  ;;  %p5491_p2 = scmp.lt.s32.totalorder %s5730_s15, %s5730_s15 }
  0x1d   : > { %p5484_p9 = scmp.ne.s32.totalorder %s5730_s15, %s5483_s26  ;;  %p5492_p12 = scmp.lt.s32.totalorder %s5483_s26, %s5483_s26 }
  0x1f   : > { %p5486_p10 = pnand %p5484_p9, %p5472_p13  ;;  %p5493_p0 = por %p5492_p12, %p5491_p2 }
  0x21   : > { %p5487_p1 = pneg %p5486_p10 }
  0x23   : > { %p5494_p6 = pnand %p5493_p0, %p5487_p1 }
  0x25   : > { %5497 = shalt.err (!%p5494_p6)
}
  0x26   : > { %s5630_s10 = smov 384   ;;  %s5631_s14 = smov 24  }
  0x27   : > { %4928 = dma.hbm_to_vmem [thread:$0]  (!%p5737_p11), %s7910_s2, 12288, %s5730_s15, [#allocation8], %s5630_s10, %s5630_s10, %s5631_s14  }
  0x28   : > { %s5498_s22 = scalar_lea.hbm %s7912_s4, 4096 }
  0x29   : > { %p5499_p2 = scmp.ne.s32.totalorder %s7912_s4, %s5498_s22  ;;  %p5505_p10 = scmp.lt.u32.totalorder %s5498_s22, %s7912_s4 }
  0x2b   : > { %p5501_p1 = pnand %p5499_p2, %p5472_p13 }
  0x2d   : > { %p5502_p6 = pneg %p5501_p1 }
  0x2f   : > { %p5507_p3 = pnand %p5505_p10, %p5502_p6 }
  0x31   : > { %5510 = shalt.err (!%p5507_p3)
}
  0x32   : > { %s5511_s15 = scalar_lea.vmem %s5741_s18, 4096  ;;  %p5519_p12 = scmp.lt.s32.totalorder %s5741_s18, %s5741_s18 }
  0x33   : > { %p5512_p5 = scmp.ne.s32.totalorder %s5741_s18, %s5511_s15  ;;  %p5520_p0 = scmp.lt.s32.totalorder %s5511_s15, %s5511_s15 }
  0x35   : > { %p5514_p7 = pnand %p5512_p5, %p5472_p13  ;;  %p5521_p2 = por %p5520_p0, %p5519_p12 }
  0x37   : > { %p5515_p9 = pneg %p5514_p7 }
  0x39   : > { %p5522_p1 = pnand %p5521_p2, %p5515_p9 }
  0x3b   : > { %5525 = shalt.err (!%p5522_p1)
}
  0x3c   : > { %s5632_s10 = smov 128   ;;  %s5633_s14 = smov 8  }
  0x3d   : > { %4931 = dma.hbm_to_vmem [thread:$0]  (!%p5737_p11), %s7912_s4, 4096, %s5741_s18, [#allocation8], %s5632_s10, %s5632_s10, %s5633_s14  }
  0x3e   : > { %s5796_s20 = sadd.s32 1, %s5626_s30   ;;  %s32_s22 = sadd.s32 1, %s5622_s29 }
  0x3f   : > { %s29_s21 = ssub.s32 %s5626_s30, %s5796_s20  ;;  %p39_p6 = scmp.ne.s32.totalorder %s5622_s29, %s5618_s28 }
  0x40   : > { %p30_p13 = scmp.eq.s32.totalorder %s29_s21, 0  ;;  %p40_p10 = scmp.eq.s32.totalorder %s5626_s30, 0 }
  0x41   : > { %p7952_p5 = scmp.eq.s32.totalorder %s5707_s9, 1  ;;  %p4942_p9 = scmp.lt.s32.totalorder %s5626_s30, 2 }
  0x42   : > { %s5805_s23 = scalar_select %p30_p13, %s5622_s29, %s32_s22  }
  0x43   : > { %p41_p3 = por %p40_p10, %p39_p6  ;;  %p5809_p7 = por %p7952_p5, %p39_p6 }
  0x44   : > { %s285_s16 = sand.u32 1, %s5622_s29   ;;  %s4495_s18 = sshll.u32 %s5626_s30, 12 }
  0x45   : > { %s7953_s24 = scalar_select %p5809_p7, 1, 0 }
  0x46   : > { %s4321_s25 = sshll.u32 %s285_s16, 8  ;;  %s5819_s10 = scalar_lea.hbm %s7908_s0, %s4495_s18 }
  0x47   : > { %s289_s14 = scalar_lea.vmem [#allocation4], %s4321_s25  ;;  %p5823_p11 = pnand %p4942_p9, %p41_p3 }
  0x48   : > { %s296_s17 = sshll.u32 %s289_s14, 4  ;;  %s5827_s21 = scalar_lea.sflag [#allocation5], %s285_s16  ;;  %s5821_s17 = int_to_ptr.vmem [resolvable:$true] %s296_s17 }
  0x49   : > { %s5526_s22 = scalar_lea.hbm %s5819_s10, 4096  ;;  %p5528_p0 = pneg %p5823_p11 }
  0x4a   : > { %p5527_p12 = scmp.ne.s32.totalorder %s5819_s10, %s5526_s22  ;;  %s5531_s26 = scalar_lea.hbm %s7908_s0, 8192 }
  0x4b   : > { %p5532_p13 = scmp.lt.u32.totalorder %s5819_s10, %s7908_s0  ;;  %p5533_p6 = scmp.lt.u32.totalorder %s5531_s26, %s5526_s22 }
  0x4c   : > { %p5529_p2 = pnand %p5528_p0, %p5527_p12  ;;  %p5535_p3 = scmp.lt.u32.totalorder %s5526_s22, %s5819_s10 }
  0x4d   : > { %p5534_p10 = por %p5533_p6, %p5532_p13 }
  0x4e   : > { %p5530_p1 = pneg %p5529_p2 }
  0x4f   : > { %p5536_p5 = por %p5535_p3, %p5534_p10 }
  0x51   : > { %p5537_p9 = pnand %p5536_p5, %p5530_p1 }
  0x53   : > { %5540 = shalt.err (!%p5537_p9)
}
  0x54   : > { %s5541_s16 = scalar_lea.vmem %s5821_s17, 4096  ;;  %s5634_s25 = smov [#allocation4]  }
  0x55   : > { %p5542_p12 = scmp.ne.s32.totalorder %s5821_s17, %s5541_s16  ;;  %s5546_s18 = sshll.u32 %s5634_s25, 4  ;;  %s5547_s18 = int_to_ptr.vmem [resolvable:$false] %s5546_s18 }
  0x56   : > { %s5548_s15 = scalar_lea.vmem %s5547_s18, 8192  ;;  %p5549_p4 = scmp.lt.s32.totalorder %s5821_s17, %s5547_s18 }
  0x57   : > { %p5544_p2 = pnand %p5542_p12, %p5528_p0  ;;  %p5550_p13 = scmp.lt.s32.totalorder %s5548_s15, %s5541_s16 }
  0x59   : > { %p5545_p7 = pneg %p5544_p2  ;;  %p5551_p6 = por %p5550_p13, %p5549_p4 }
  0x5b   : > { %p5552_p10 = pnand %p5551_p6, %p5545_p7 }
  0x5d   : > { %5555 = shalt.err (!%p5552_p10)
}
  0x5e   : > { %s5635_s22 = smov 256   ;;  %s5636_s26 = smov 16  }
  0x5f   : > { %4935 = dma.hbm_to_vmem [thread:$0]  (!%p5823_p11), %s5819_s10, 4096, %s5821_s17, %s5827_s21, %s5635_s22, %s5635_s22, %s5636_s26  }
  0x60   : > { %314 = sbr.rel (%p5726_p8) target bundleno = 2712 (0xa98), region = 52 }
  0x67   : > { %s5858_s14 = sand.u32 1, %s5618_s28   ;;  %p7955_p4 = scmp.ne.s32.totalorder %s7948_s11, 0 }
  0x68   : > { %s4325_s16 = sshll.u32 %s5858_s14, 8  ;;  %s317_s25 = scalar_lea.sflag [#allocation5], %s5858_s14 }
  0x69   : > { %s5864_s18 = scalar_lea.vmem [#allocation4], %s4325_s16 }
  0x6a   : > { %5601 = dma.done.wait (%p7955_p4), %s317_s25, 4096  }
  0x6b   : > { %5603 = vsyncadd (%p7955_p4), %s317_s25, 4294963200  ;;  %p7956_p7 = scmp.eq.s32.totalorder %s5707_s9, 0 }
  0x6d   : > { %5605 = dma.done.wait (%p7956_p7), [#allocation8], 16384   ;;  %p7957_p8 = pmov %p7956_p7 }
  0x6e   : > { %v4989_v0 = vld [vmem:[#allocation7 + $0x4] ss:$24 sps:$4 sm:$0xff]   ;;  %v4991_v1 = vld [vmem:[#allocation7] ss:$24 sps:$4 sm:$0xff]   ;;  %v4992_v2 = vld [vmem:[#allocation7 + $0x34] ss:$24 sps:$4 sm:$0xff]  }
  0x6f   : > { %5607 = vsyncadd (%p7957_p8), [#allocation8], 4294950912  ;;  %1024 = vmatprep.subr.bf16.mxu1 %v4989_v0  ;;  %v4994_v3 = vld [vmem:[#allocation7 + $0x30] ss:$24 sps:$4 sm:$0xff]   ;;  %v4995_v4 = vld [vmem:[#allocation7 + $0x64] ss:$24 sps:$4 sm:$0xff]  }
  0x70   : > { %1025 = vmatpush1.bf16.msra.mxu1 %v4991_v1  ;;  %v4997_v5 = vld [vmem:[#allocation7 + $0x60] ss:$24 sps:$4 sm:$0xff]   ;;  %v4998_v6 = vld [vmem:[#allocation7 + $0x94] ss:$24 sps:$4 sm:$0xff]   ;;  %v5000_v7 = vld [vmem:[#allocation7 + $0x90] ss:$24 sps:$4 sm:$0xff]  }
  0x71   : > { %1026 = vmatprep.subr.bf16.mxu1 %v4992_v2  ;;  %v5001_v8 = vld [vmem:[#allocation7 + $0xc4] ss:$24 sps:$4 sm:$0xff]   ;;  %v5003_v9 = vld [vmem:[#allocation7 + $0xc0] ss:$24 sps:$4 sm:$0xff]   ;;  %v5004_v10 = vld [vmem:[#allocation7 + $0xf4] ss:$24 sps:$4 sm:$0xff]  }
  0x72   : > { %v5006_v11 = vld [vmem:[#allocation7 + $0xf0] ss:$24 sps:$4 sm:$0xff]   ;;  %v5007_v12 = vld [vmem:[#allocation7 + $0x124] ss:$24 sps:$4 sm:$0xff]   ;;  %v5009_v16 = vld [vmem:[#allocation7 + $0x120] ss:$24 sps:$4 sm:$0xff]  }
  0x73   : > { %v369_v13 = vld [vmem:[%s5864_s18 + $0x8] sm:$0xff]  ;;  %v371_v14 = vld [vmem:[%s5864_s18 + $0x18] sm:$0xff]  ;;  %v368_v48 = vld [vmem:[%s5864_s18] sm:$0xff]  ;;  %vm1490_vm0 = vcmask 523264   ;;  %s5637_s10 = smov 64   ;;  %p364_p11 = scmp.lt.s32.totalorder %s5707_s9, 1 }
  0x74   : > { %1027 = vmatpush1.bf16.msra.mxu1 %v4994_v3  ;;  %v5876_v15 = vpack.c.bf16 %v371_v14, %v369_v13  ;;  %v5010_v17 = vld [vmem:[#allocation7 + $0x154] ss:$24 sps:$4 sm:$0xff]   ;;  %v5012_v18 = vld [vmem:[#allocation7 + $0x150] ss:$24 sps:$4 sm:$0xff]   ;;  %v5013_v19 = vld [vmem:[#allocation7 + $0x184] ss:$24 sps:$4 sm:$0xff]  }
  0x75   : > { %1028 = vmatprep.subr.bf16.mxu1 %v4995_v4  ;;  %v5015_v20 = vld [vmem:[#allocation7 + $0x180] ss:$24 sps:$4 sm:$0xff]   ;;  %v5016_v21 = vld [vmem:[#allocation7 + $0x1b4] ss:$24 sps:$4 sm:$0xff]   ;;  %v5057_v23 = vld [vmem:[#allocation7 + $0x10] ss:$24 sps:$4 sm:$0xff]  }
  0x76   : > { %1056 = vmatprep.mubr.bf16.mxu1 %v5876_v15  ;;  %1282 = vmatprep.mubr.bf16.mxu0 %v5876_v15  ;;  %v5055_v22 = vld [vmem:[#allocation7 + $0x14] ss:$24 sps:$4 sm:$0xff]   ;;  %v5018_v24 = vld [vmem:[#allocation7 + $0x1b0] ss:$24 sps:$4 sm:$0xff]   ;;  %v5019_v25 = vld [vmem:[#allocation7 + $0x1e4] ss:$24 sps:$4 sm:$0xff]  }
  0x77   : > { %1250 = vmatprep.subr.bf16.mxu0 %v5055_v22  ;;  %v5061_v26 = vld [vmem:[#allocation7 + $0x44] ss:$24 sps:$4 sm:$0xff]   ;;  %v5063_v27 = vld [vmem:[#allocation7 + $0x40] ss:$24 sps:$4 sm:$0xff]   ;;  %v5022_v29 = vld [vmem:[#allocation7 + $0x214] ss:$24 sps:$4 sm:$0xff]  }
  0x78   : > { %1029 = vmatpush1.bf16.msra.mxu1 %v4997_v5  ;;  %1251 = vmatpush1.bf16.msra.mxu0 %v5057_v23  ;;  %v5021_v28 = vld [vmem:[#allocation7 + $0x1e0] ss:$24 sps:$4 sm:$0xff]   ;;  %v5067_v30 = vld [vmem:[#allocation7 + $0x74] ss:$24 sps:$4 sm:$0xff]   ;;  %v5069_v31 = vld [vmem:[#allocation7 + $0x70] ss:$24 sps:$4 sm:$0xff]  }
  0x79   : > { %1030 = vmatprep.subr.bf16.mxu1 %v4998_v6  ;;  %1252 = vmatprep.subr.bf16.mxu0 %v5061_v26  ;;  %v5024_v32 = vld [vmem:[#allocation7 + $0x210] ss:$24 sps:$4 sm:$0xff]   ;;  %v5025_v33 = vld [vmem:[#allocation7 + $0x244] ss:$24 sps:$4 sm:$0xff]   ;;  %v5075_v35 = vld [vmem:[#allocation7 + $0xa0] ss:$24 sps:$4 sm:$0xff]  }
  0x7a   : > { %v5073_v34 = vld [vmem:[#allocation7 + $0xa4] ss:$24 sps:$4 sm:$0xff]   ;;  %v5027_v36 = vld [vmem:[#allocation7 + $0x240] ss:$24 sps:$4 sm:$0xff]   ;;  %v5079_v37 = vld [vmem:[#allocation7 + $0xd4] ss:$24 sps:$4 sm:$0xff]  }
  0x7b   : > { %v5028_v38 = vld [vmem:[#allocation7 + $0x274] ss:$24 sps:$4 sm:$0xff]   ;;  %v5081_v39 = vld [vmem:[#allocation7 + $0xd0] ss:$24 sps:$4 sm:$0xff]   ;;  %v5085_v41 = vld [vmem:[#allocation7 + $0x104] ss:$24 sps:$4 sm:$0xff]  }
  0x7c   : > { %1031 = vmatpush1.bf16.msra.mxu1 %v5000_v7  ;;  %1253 = vmatpush1.bf16.msra.mxu0 %v5063_v27  ;;  %v5030_v40 = vld [vmem:[#allocation7 + $0x270] ss:$24 sps:$4 sm:$0xff]   ;;  %v5031_v42 = vld [vmem:[#allocation7 + $0x2a4] ss:$24 sps:$4 sm:$0xff]   ;;  %v5087_v43 = vld [vmem:[#allocation7 + $0x100] ss:$24 sps:$4 sm:$0xff]  }
  0x7d   : > { %1032 = vmatprep.subr.bf16.mxu1 %v5001_v8  ;;  %1254 = vmatprep.subr.bf16.mxu0 %v5067_v30  ;;  %v5091_v44 = vld [vmem:[#allocation7 + $0x134] ss:$24 sps:$4 sm:$0xff]   ;;  %v5033_v45 = vld [vmem:[#allocation7 + $0x2a0] ss:$24 sps:$4 sm:$0xff]   ;;  %v5036_v47 = vld [vmem:[#allocation7 + $0x2d0] ss:$24 sps:$4 sm:$0xff]  }
  0x7e   : > { %v5034_v46 = vld [vmem:[#allocation7 + $0x2d4] ss:$24 sps:$4 sm:$0xff]   ;;  %v5093_v49 = vld [vmem:[#allocation7 + $0x130] ss:$24 sps:$4 sm:$0xff]   ;;  %v5097_v51 = vld [vmem:[#allocation7 + $0x164] ss:$24 sps:$4 sm:$0xff]  }
  0x7f   : > { %v370_v50 = vld [vmem:[%s5864_s18 + $0x10] sm:$0xff]  ;;  %v5039_v52 = vld [vmem:[#allocation7 + $0xc] ss:$24 sps:$4 sm:$0xff]   ;;  %v375_v54 = vld [vmem:[%s5864_s18 + $0x38] sm:$0xff]  ;;  %s365_s17 = scalar_select %p364_p11, %s5707_s9, 1  ;;  %vm2439_vm1 = vcmask 1048064  }
  0x80   : > { %1033 = vmatpush1.bf16.msra.mxu1 %v5003_v9  ;;  %1255 = vmatpush1.bf16.msra.mxu0 %v5069_v31  ;;  %v373_v53 = vld [vmem:[%s5864_s18 + $0x28] sm:$0xff]  ;;  %v5099_v55 = vld [vmem:[#allocation7 + $0x160] ss:$24 sps:$4 sm:$0xff]   ;;  %v5884_v56 = vpack.c.bf16 %v370_v50, %v368_v48  ;;  %v5042_v60 = vld [vmem:[#allocation7 + $0x3c] ss:$24 sps:$4 sm:$0xff]   ;;  %p8096_p1 = scmp.ne.s32.totalorder %s7953_s24, 0 }
  0x81   : > { %1034 = vmatprep.subr.bf16.mxu1 %v5004_v10  ;;  %1256 = vmatprep.subr.bf16.mxu0 %v5073_v34  ;;  %v5103_v57 = vld [vmem:[#allocation7 + $0x194] ss:$24 sps:$4 sm:$0xff]   ;;  %v5037_v58 = vld [vmem:[#allocation7 + $0x8] ss:$24 sps:$4 sm:$0xff]   ;;  %v5886_v59 = vpack.c.bf16 %v375_v54, %v373_v53  ;;  %v5040_v61 = vld [vmem:[#allocation7 + $0x38] ss:$24 sps:$4 sm:$0xff]   ;;  %s6356_s15 = scalar_lea.vmem %s7909_s1, %s365_s17 }
  0x82   : > { %v372_v62 = vld [vmem:[%s5864_s18 + $0x20] sm:$0xff]  ;;  %v5105_v63 = vld [vmem:[#allocation7 + $0x190] ss:$24 sps:$4 sm:$0xff]   ;;  %v379_v4 = vld [vmem:[%s5864_s18 + $0x58] sm:$0xff]  ;;  %s5638_s26 = smov [#allocation10]  }
  0x83   : > { %v374_v0 = vld [vmem:[%s5864_s18 + $0x30] sm:$0xff]  ;;  %v5109_v1 = vld [vmem:[#allocation7 + $0x1c4] ss:$24 sps:$4 sm:$0xff]   ;;  %v377_v3 = vld [vmem:[%s5864_s18 + $0x48] sm:$0xff]  ;;  %s5560_s25 = sshll.u32 %s5638_s26, 4  ;;  %s5561_s25 = int_to_ptr.vmem [resolvable:$false] %s5560_s25 }
  0x84   : > { %1035 = vmatpush1.bf16.msra.mxu1 %v5006_v11  ;;  %1257 = vmatpush1.bf16.msra.mxu0 %v5075_v35  ;;  %v5045_v2 = vld [vmem:[#allocation7 + $0x6c] ss:$24 sps:$4 sm:$0xff]   ;;  %v5111_v5 = vld [vmem:[#allocation7 + $0x1c0] ss:$24 sps:$4 sm:$0xff]   ;;  %v5894_v6 = vpack.c.bf16 %v374_v0, %v372_v62  ;;  %v5896_v9 = vpack.c.bf16 %v379_v4, %v377_v3  ;;  %v5048_v10 = vld [vmem:[#allocation7 + $0x9c] ss:$24 sps:$4 sm:$0xff]  }
  0x85   : > { %1036 = vmatprep.subr.bf16.mxu1 %v5007_v12  ;;  %1258 = vmatprep.subr.bf16.mxu0 %v5079_v37  ;;  %v5115_v7 = vld [vmem:[#allocation7 + $0x1f4] ss:$24 sps:$4 sm:$0xff]   ;;  %v5043_v8 = vld [vmem:[#allocation7 + $0x68] ss:$24 sps:$4 sm:$0xff]   ;;  %v5046_v11 = vld [vmem:[#allocation7 + $0x98] ss:$24 sps:$4 sm:$0xff]  }
  0x86   : > { %v376_v12 = vld [vmem:[%s5864_s18 + $0x40] sm:$0xff]  ;;  %v378_v13 = vld [vmem:[%s5864_s18 + $0x50] sm:$0xff] }
  0x87   : > { %v5117_v14 = vld [vmem:[#allocation7 + $0x1f0] ss:$24 sps:$4 sm:$0xff]   ;;  %v5904_v23 = vpack.c.bf16 %v378_v13, %v376_v12  ;;  %v5124_v27 = vld [vmem:[#allocation7 + $0x284] ss:$24 sps:$4 sm:$0xff]   ;;  %v5126_v34 = vld [vmem:[#allocation7 + $0x280] ss:$24 sps:$4 sm:$0xff]  }
  0x88   : > { %1037 = vmatpush1.bf16.msra.mxu1 %v5009_v16  ;;  %1259 = vmatpush1.bf16.msra.mxu0 %v5081_v39  ;;  %v5051_v16 = vld [vmem:[#allocation7 + $0xcc] ss:$24 sps:$4 sm:$0xff]   ;;  %v5049_v22 = vld [vmem:[#allocation7 + $0xc8] ss:$24 sps:$4 sm:$0xff]   ;;  %v382_v30 = vld [vmem:[%s5864_s18 + $0x70] sm:$0xff] }
  0x89   : > { %1038 = vmatprep.subr.bf16.mxu1 %v5010_v17  ;;  %1260 = vmatprep.subr.bf16.mxu0 %v5085_v41  ;;  %v381_v17 = vld [vmem:[%s5864_s18 + $0x68] sm:$0xff]  ;;  %v5066_v39 = vld [vmem:[#allocation7 + $0x15c] ss:$24 sps:$4 sm:$0xff]   ;;  %v5132_v48 = vld [vmem:[#allocation7 + $0x2e0] ss:$24 sps:$4 sm:$0xff]  }
  0x8a   : > { %v5123_v26 = vld [vmem:[#allocation7 + $0x250] ss:$24 sps:$4 sm:$0xff]   ;;  %v5060_v31 = vld [vmem:[#allocation7 + $0x12c] ss:$24 sps:$4 sm:$0xff]   ;;  %v5090_v0 = vld [vmem:[#allocation7 + $0x21c] ss:$24 sps:$4 sm:$0xff]  }
  0x8b   : > { %v5058_v37 = vld [vmem:[#allocation7 + $0x128] ss:$24 sps:$4 sm:$0xff]   ;;  %v5130_v41 = vld [vmem:[#allocation7 + $0x2e4] ss:$24 sps:$4 sm:$0xff]   ;;  %v5076_v53 = vld [vmem:[#allocation7 + $0x1b8] ss:$24 sps:$4 sm:$0xff]  }
  0x8c   : > { %1039 = vmatpush1.bf16.msra.mxu1 %v5012_v18  ;;  %1261 = vmatpush1.bf16.msra.mxu0 %v5087_v43  ;;  %v383_v18 = vld [vmem:[%s5864_s18 + $0x78] sm:$0xff]  ;;  %v384_v43 = vld [vmem:[%s5864_s18 + $0x80] sm:$0xff]  ;;  %v394_v3 = vld [vmem:[%s5864_s18 + $0xd0] sm:$0xff] }
  0x8d   : > { %1040 = vmatprep.subr.bf16.mxu1 %v5013_v19  ;;  %1262 = vmatprep.subr.bf16.mxu0 %v5091_v44  ;;  %v5118_v19 = vld [vmem:[#allocation7 + $0x224] ss:$24 sps:$4 sm:$0xff]   ;;  %v386_v44 = vld [vmem:[%s5864_s18 + $0x90] sm:$0xff]  ;;  %v5070_v50 = vld [vmem:[#allocation7 + $0x188] ss:$24 sps:$4 sm:$0xff]  }
  0x8e   : > { %v388_v54 = vld [vmem:[%s5864_s18 + $0xa0] sm:$0xff]  ;;  %v5102_v12 = vld [vmem:[#allocation7 + $0x27c] ss:$24 sps:$4 sm:$0xff]   ;;  %v5100_v13 = vld [vmem:[#allocation7 + $0x278] ss:$24 sps:$4 sm:$0xff]  }
  0x8f   : > { %v5082_v62 = vld [vmem:[#allocation7 + $0x1e8] ss:$24 sps:$4 sm:$0xff]   ;;  %v5096_v4 = vld [vmem:[#allocation7 + $0x24c] ss:$24 sps:$4 sm:$0xff]  }
  0x90   : > { %1041 = vmatpush1.bf16.msra.mxu1 %v5015_v20  ;;  %1263 = vmatpush1.bf16.msra.mxu0 %v5093_v49  ;;  %v5120_v20 = vld [vmem:[#allocation7 + $0x220] ss:$24 sps:$4 sm:$0xff]   ;;  %v5924_v49 = vpack.c.bf16 %v386_v44, %v384_v43 }
  0x91   : > { %1042 = vmatprep.subr.bf16.mxu1 %v5016_v21  ;;  %1264 = vmatprep.subr.bf16.mxu0 %v5097_v51  ;;  %v5121_v21 = vld [vmem:[#allocation7 + $0x254] ss:$24 sps:$4 sm:$0xff]  }
  0x94   : > { %1043 = vmatpush1.bf16.msra.mxu1 %v5018_v24  ;;  %1265 = vmatpush1.bf16.msra.mxu0 %v5099_v55  ;;  %v5054_v24 = vld [vmem:[#allocation7 + $0xfc] ss:$24 sps:$4 sm:$0xff]  }
  0x95   : > { %1044 = vmatprep.subr.bf16.mxu1 %v5019_v25  ;;  %1266 = vmatprep.subr.bf16.mxu0 %v5103_v57  ;;  %v5906_v25 = vpack.c.bf16 %v383_v18, %v381_v17  ;;  %v390_v55 = vld [vmem:[%s5864_s18 + $0xb0] sm:$0xff]  ;;  %v5084_v57 = vld [vmem:[#allocation7 + $0x1ec] ss:$24 sps:$4 sm:$0xff]  }
  0x96   : > { %v5108_v17 = vld [vmem:[#allocation7 + $0x2ac] ss:$24 sps:$4 sm:$0xff]  }
  0x98   : > { %1045 = vmatpush1.bf16.msra.mxu1 %v5021_v28  ;;  %1267 = vmatpush1.bf16.msra.mxu0 %v5105_v63  ;;  %v5052_v28 = vld [vmem:[#allocation7 + $0xf8] ss:$24 sps:$4 sm:$0xff]  }
  0x99   : > { %1046 = vmatprep.subr.bf16.mxu1 %v5022_v29  ;;  %1268 = vmatprep.subr.bf16.mxu0 %v5109_v1  ;;  %v380_v29 = vld [vmem:[%s5864_s18 + $0x60] sm:$0xff]  ;;  %v5088_v1 = vld [vmem:[#allocation7 + $0x218] ss:$24 sps:$4 sm:$0xff]  }
  0x9a   : > { %v5914_v35 = vpack.c.bf16 %v382_v30, %v380_v29 }
  0x9c   : > { %1047 = vmatpush1.bf16.msra.mxu1 %v5024_v32  ;;  %1269 = vmatpush1.bf16.msra.mxu0 %v5111_v5  ;;  %v385_v32 = vld [vmem:[%s5864_s18 + $0x88] sm:$0xff] }
  0x9d   : > { %1048 = vmatprep.subr.bf16.mxu1 %v5025_v33  ;;  %1270 = vmatprep.subr.bf16.mxu0 %v5115_v7  ;;  %v387_v33 = vld [vmem:[%s5864_s18 + $0x98] sm:$0xff]  ;;  %v397_v5 = vld [vmem:[%s5864_s18 + $0xe8] sm:$0xff] }
  0x9e   : > { %v399_v7 = vld [vmem:[%s5864_s18 + $0xf8] sm:$0xff] }
  0xa0   : > { %1049 = vmatpush1.bf16.msra.mxu1 %v5027_v36  ;;  %1271 = vmatpush1.bf16.msra.mxu0 %v5117_v14  ;;  %v5127_v36 = vld [vmem:[#allocation7 + $0x2b4] ss:$24 sps:$4 sm:$0xff]   ;;  %v396_v14 = vld [vmem:[%s5864_s18 + $0xe0] sm:$0xff] }
  0xa1   : > { %1050 = vmatprep.subr.bf16.mxu1 %v5028_v38  ;;  %1272 = vmatprep.subr.bf16.mxu0 %v5118_v19  ;;  %v5916_v38 = vpack.c.bf16 %v387_v33, %v385_v32  ;;  %v5106_v19 = vld [vmem:[#allocation7 + $0x2a8] ss:$24 sps:$4 sm:$0xff]  }
  0xa4   : > { %1051 = vmatpush1.bf16.msra.mxu1 %v5030_v40  ;;  %1273 = vmatpush1.bf16.msra.mxu0 %v5120_v20  ;;  %v5129_v40 = vld [vmem:[#allocation7 + $0x2b0] ss:$24 sps:$4 sm:$0xff]   ;;  %v5114_v20 = vld [vmem:[#allocation7 + $0x2dc] ss:$24 sps:$4 sm:$0xff]  }
  0xa5   : > { %1052 = vmatprep.subr.bf16.mxu1 %v5031_v42  ;;  %1274 = vmatprep.subr.bf16.mxu0 %v5121_v21  ;;  %v5064_v42 = vld [vmem:[#allocation7 + $0x158] ss:$24 sps:$4 sm:$0xff]  }
  0xa6   : > { %v5112_v21 = vld [vmem:[#allocation7 + $0x2d8] ss:$24 sps:$4 sm:$0xff]  }
  0xa8   : > { %1053 = vmatpush1.bf16.msra.mxu1 %v5033_v45  ;;  %1275 = vmatpush1.bf16.msra.mxu0 %v5123_v26  ;;  %v5072_v45 = vld [vmem:[#allocation7 + $0x18c] ss:$24 sps:$4 sm:$0xff]  }
  0xa9   : > { %1054 = vmatprep.subr.bf16.mxu1 %v5034_v46  ;;  %1276 = vmatprep.subr.bf16.mxu0 %v5124_v27  ;;  %v389_v46 = vld [vmem:[%s5864_s18 + $0xa8] sm:$0xff] }
  0xac   : > { %1055 = vmatpush1.bf16.msra.mxu1 %v5036_v47  ;;  %1277 = vmatpush1.bf16.msra.mxu0 %v5126_v34  ;;  %v391_v47 = vld [vmem:[%s5864_s18 + $0xb8] sm:$0xff] }
  0xad   : > { %1137 = vmatprep.subr.bf16.mxu1 %v5039_v52  ;;  %1278 = vmatprep.subr.bf16.mxu0 %v5127_v36  ;;  %v5926_v51 = vpack.c.bf16 %v391_v47, %v389_v46  ;;  %v5078_v52 = vld [vmem:[#allocation7 + $0x1bc] ss:$24 sps:$4 sm:$0xff]  }
  0xaf   : > { %1057 = vmatmul.mubr.bf16.vlgmr.msra.gmra.mrb[0].mxu1 %v5884_v56 }
  0xb0   : > { %1138 = vmatpush1.bf16.msra.mxu1 %v5037_v58  ;;  %1066 = vmatprep.mubr.bf16.mxu1 %v5886_v59  ;;  %v393_v58 = vld [vmem:[%s5864_s18 + $0xc8] sm:$0xff] }
  0xb1   : > { %1139 = vmatprep.subr.bf16.mxu1 %v5042_v60  ;;  %1279 = vmatpush1.bf16.msra.mxu0 %v5129_v40  ;;  %v395_v60 = vld [vmem:[%s5864_s18 + $0xd8] sm:$0xff] }
  0xb2   : > { %1280 = vmatprep.subr.bf16.mxu0 %v5130_v41  ;;  %v413_v63 = vpack.c.bf16 %v395_v60, %v393_v58 }
  0xb4   : > { %1140 = vmatpush1.bf16.msra.mxu1 %v5040_v61  ;;  %v5936_v61 = vpack.c.bf16 %v390_v55, %v388_v54 }
  0xb5   : > { %1141 = vmatprep.subr.bf16.mxu1 %v5045_v2  ;;  %1281 = vmatpush1.bf16.msra.mxu0 %v5132_v48  ;;  %v392_v2 = vld [vmem:[%s5864_s18 + $0xc0] sm:$0xff] }
  0xb7   : > { %1067 = vmatmul.mubr.bf16.gmra.mrb[4].mxu1 %v5894_v6 }
  0xb8   : > { %1142 = vmatpush1.bf16.msra.mxu1 %v5043_v8  ;;  %1076 = vmatprep.mubr.bf16.mxu1 %v5896_v9  ;;  %v412_v8 = vpack.c.bf16 %v394_v3, %v392_v2 }
  0xb9   : > { %1143 = vmatprep.subr.bf16.mxu1 %v5048_v10  ;;  %1283 = vmatmul.mubr.bf16.vlgmr.msra.gmra.mrb[0].mxu0 %v5884_v56  ;;  %v5094_v10 = vld [vmem:[#allocation7 + $0x248] ss:$24 sps:$4 sm:$0xff]  }
  0xba   : > { %1292 = vmatprep.mubr.bf16.mxu0 %v5886_v59 }
  0xbc   : > { %1144 = vmatpush1.bf16.msra.mxu1 %v5046_v11  ;;  %v415_v11 = vpack.c.bf16 %v399_v7, %v397_v5 }
  0xbd   : > { %1145 = vmatprep.subr.bf16.mxu1 %v5051_v16  ;;  %v398_v16 = vld [vmem:[%s5864_s18 + $0xf0] sm:$0xff] }
  0xbe   : > { %v414_v18 = vpack.c.bf16 %v398_v16, %v396_v14 }
  0xbf   : > { %1077 = vmatmul.mubr.bf16.gmra.mrb[8].mxu1 %v5904_v23 }
  0xc0   : > { %1146 = vmatpush1.bf16.msra.mxu1 %v5049_v22  ;;  %1086 = vmatprep.mubr.bf16.mxu1 %v5906_v25 }
  0xc1   : > { %1147 = vmatprep.subr.bf16.mxu1 %v5054_v24  ;;  %1293 = vmatmul.mubr.bf16.gmra.mrb[4].mxu0 %v5894_v6 }
  0xc2   : > { %1302 = vmatprep.mubr.bf16.mxu0 %v5896_v9 }
  0xc4   : > { %1148 = vmatpush1.bf16.msra.mxu1 %v5052_v28 }
  0xc5   : > { %1149 = vmatprep.subr.bf16.mxu1 %v5060_v31 }
  0xc7   : > { %1087 = vmatmul.mubr.bf16.gmra.mrb[12].mxu1 %v5914_v35 }
  0xc8   : > { %1150 = vmatpush1.bf16.msra.mxu1 %v5058_v37  ;;  %1096 = vmatprep.mubr.bf16.mxu1 %v5916_v38 }
  0xc9   : > { %1151 = vmatprep.subr.bf16.mxu1 %v5066_v39  ;;  %1303 = vmatmul.mubr.bf16.gmra.mrb[8].mxu0 %v5904_v23 }
  0xca   : > { %1312 = vmatprep.mubr.bf16.mxu0 %v5906_v25 }
  0xcc   : > { %1152 = vmatpush1.bf16.msra.mxu1 %v5064_v42 }
  0xcd   : > { %1153 = vmatprep.subr.bf16.mxu1 %v5072_v45 }
  0xcf   : > { %1097 = vmatmul.mubr.bf16.gmra.mrb[16].mxu1 %v5924_v49 }
  0xd0   : > { %1154 = vmatpush1.bf16.msra.mxu1 %v5070_v50  ;;  %1106 = vmatprep.mubr.bf16.mxu1 %v5926_v51 }
  0xd1   : > { %1155 = vmatprep.subr.bf16.mxu1 %v5078_v52  ;;  %1313 = vmatmul.mubr.bf16.gmra.mrb[12].mxu0 %v5914_v35 }
  0xd2   : > { %1322 = vmatprep.mubr.bf16.mxu0 %v5916_v38 }
  0xd4   : > { %1156 = vmatpush1.bf16.msra.mxu1 %v5076_v53 }
  0xd5   : > { %1157 = vmatprep.subr.bf16.mxu1 %v5084_v57 }
  0xd7   : > { %1107 = vmatmul.mubr.bf16.gmra.mrb[20].mxu1 %v5936_v61 }
  0xd8   : > { %1158 = vmatpush1.bf16.msra.mxu1 %v5082_v62  ;;  %1116 = vmatprep.mubr.bf16.mxu1 %v413_v63 }
  0xd9   : > { %1159 = vmatprep.subr.bf16.mxu1 %v5090_v0  ;;  %1323 = vmatmul.mubr.bf16.gmra.mrb[16].mxu0 %v5924_v49 }
  0xda   : > { %1332 = vmatprep.mubr.bf16.mxu0 %v5926_v51 }
  0xdc   : > { %1160 = vmatpush1.bf16.msra.mxu1 %v5088_v1 }
  0xdd   : > { %1161 = vmatprep.subr.bf16.mxu1 %v5096_v4 }
  0xdf   : > { %1117 = vmatmul.mubr.bf16.gmra.mrb[24].mxu1 %v412_v8 }
  0xe0   : > { %1162 = vmatpush1.bf16.msra.mxu1 %v5094_v10  ;;  %1126 = vmatprep.mubr.bf16.mxu1 %v415_v11 }
  0xe1   : > { %1163 = vmatprep.subr.bf16.mxu1 %v5102_v12  ;;  %1333 = vmatmul.mubr.bf16.gmra.mrb[20].mxu0 %v5936_v61 }
  0xe2   : > { %1342 = vmatprep.mubr.bf16.mxu0 %v413_v63 }
  0xe4   : > { %1164 = vmatpush1.bf16.msra.mxu1 %v5100_v13 }
  0xe5   : > { %1165 = vmatprep.subr.bf16.mxu1 %v5108_v17 }
  0xe7   : > { %1127 = vmatmul.mubr.bf16.gmra.mrb[28].mxu1 %v414_v18 }
  0xe8   : > { %1166 = vmatpush1.bf16.msra.mxu1 %v5106_v19  ;;  %1169 = vmatprep.mubr.bf16.mxu1 %v5876_v15  ;;  %v514_v15 = vlaneseq }
  0xe9   : > { %1167 = vmatprep.subr.bf16.mxu1 %v5114_v20  ;;  %1343 = vmatmul.mubr.bf16.gmra.mrb[24].mxu0 %v412_v8 }
  0xea   : > { %1352 = vmatprep.mubr.bf16.mxu0 %v415_v11 }
  0xec   : > { %1168 = vmatpush1.bf16.msra.mxu1 %v5112_v21 }
  0xef   : > { %1170 = vmatmul.mubr.bf16.vlgmr.msra.gmra.mrb[32].mxu1 %v5884_v56  ;;  %v5966_v56 = vshrl.u32 %v514_v15, 7 }
  0xf0   : > { %1179 = vmatprep.mubr.bf16.mxu1 %v5886_v59 }
  0xf1   : > { %1353 = vmatmul.mubr.bf16.gmra.mrb[28].mxu0 %v414_v18  ;;  %v5969_v59 = vsub.s32 0, %v5966_v56  ;;  %v536_v0 = vsub.s32 5, %v5966_v56  ;;  %v532_v2 = vsub.s32 4, %v5966_v56 }
  0xf3   : > { %7958 = vst [vmem:[#allocation14_spill] sm:$0xff] %v5969_v59 }
  0xf7   : > { %1180 = vmatmul.mubr.bf16.gmra.mrb[36].mxu1 %v5894_v6  ;;  %v5974_v6 = vld [vmem:[%s7911_s3] sm:$0x3f] }
  0xf8   : > { %1189 = vmatprep.mubr.bf16.mxu1 %v5896_v9  ;;  %v5977_v9 = vsub.s32 1, %v5966_v56  ;;  %v5981_v22 = vrot.slane %v5974_v6, %v5969_v59  ;;  %v6024_v5 = vrot.slane %v5974_v6, %v536_v0  ;;  %v6028_v10 = vrot.slane %v5974_v6, %v532_v2 }
  0xfa   : > { %7959 = vst [vmem:[#allocation15_spill] sm:$0xff] %v5977_v9  ;;  %v5985_v24 = vrot.slane %v5974_v6, %v5977_v9 }
  0xff   : > { %1190 = vmatmul.mubr.bf16.gmra.mrb[40].mxu1 %v5904_v23 }
 0x100   : > { %1199 = vmatprep.mubr.bf16.mxu1 %v5906_v25 }
 0x107   : > { %1200 = vmatmul.mubr.bf16.gmra.mrb[44].mxu1 %v5914_v35 }
 0x108   : > { %1209 = vmatprep.mubr.bf16.mxu1 %v5916_v38 }
 0x10f   : > { %1210 = vmatmul.mubr.bf16.gmra.mrb[48].mxu1 %v5924_v49 }
 0x110   : > { %1219 = vmatprep.mubr.bf16.mxu1 %v5926_v51 }
 0x117   : > { %1220 = vmatmul.mubr.bf16.gmra.mrb[52].mxu1 %v5936_v61 }
 0x118   : > { %1229 = vmatprep.mubr.bf16.mxu1 %v413_v63 }
 0x11f   : > { %1230 = vmatmul.mubr.bf16.gmra.mrb[56].mxu1 %v412_v8 }
 0x120   : > { %1239 = vmatprep.mubr.bf16.mxu1 %v415_v11 }
 0x127   : > { %1240 = vmatmul.mubr.bf16.gmra.mrb[60].mxu1 %v414_v18 }
 0x182   : > { %v1058_v23 = vpop.f32.mrb[0].mxu1 }
 0x183   : > { %v1060_v25 = vpop.f32.mrb[1].mxu1  ;;  %v1059_v27 = vadd.f32 %v1058_v23, %v5981_v22 }
 0x184   : > { %v1062_v26 = vpop.f32.mrb[2].mxu1  ;;  %v1061_v30 = vadd.f32 %v1060_v25, %v5985_v24 }
 0x185   : > { %v1063_v28 = vadd.f32 %v1062_v26, %v5981_v22  ;;  %v1064_v29 = vpop.f32.mrb[3].mxu1 }
 0x186   : > { %v1065_v31 = vadd.f32 %v1064_v29, %v5985_v24 }
 0x187   : > { %v5991_v32 = vpack.c.bf16 %v1063_v28, %v1059_v27 }
 0x188   : > { %v5993_v33 = vpack.c.bf16 %v1065_v31, %v1061_v30 }
 0x189   : > { %4641 = vmatprep.mubr.msk.bf16.mxu1 %vm1490_vm0, %v5991_v32 }
 0x18a   : > { %7960 = vst [vmem:[#allocation16_spill] sm:$0xff] %v5993_v33  ;;  %v1068_v34 = vpop.f32.mrb[4].mxu1 }
 0x18b   : > { %v1069_v35 = vadd.f32 %v1068_v34, %v5981_v22  ;;  %v1070_v36 = vpop.f32.mrb[5].mxu1 }
 0x18c   : > { %v1072_v37 = vpop.f32.mrb[6].mxu1  ;;  %v1071_v40 = vadd.f32 %v1070_v36, %v5985_v24  ;;  %v1284_v12 = vpop.f32.mrb[0].mxu0 }
 0x18d   : > { %v1073_v38 = vadd.f32 %v1072_v37, %v5981_v22  ;;  %v1074_v39 = vpop.f32.mrb[7].mxu1  ;;  %v1285_v16 = vadd.f32 %v1284_v12, %v6028_v10  ;;  %v1286_v17 = vpop.f32.mrb[1].mxu0 }
 0x18e   : > { %v1075_v41 = vadd.f32 %v1074_v39, %v5985_v24  ;;  %v1287_v20 = vadd.f32 %v1286_v17, %v6024_v5  ;;  %v1288_v21 = vpop.f32.mrb[2].mxu0 }
 0x18f   : > { %v6001_v42 = vpack.c.bf16 %v1073_v38, %v1069_v35  ;;  %v1289_v23 = vadd.f32 %v1288_v21, %v6028_v10  ;;  %v1290_v25 = vpop.f32.mrb[3].mxu0 }
 0x190   : > { %v6003_v43 = vpack.c.bf16 %v1075_v41, %v1071_v40  ;;  %v1291_v27 = vadd.f32 %v1290_v25, %v6024_v5 }
 0x191   : > { %v6041_v28 = vpack.c.bf16 %v1289_v23, %v1285_v16 }
 0x192   : > { %v1078_v44 = vpop.f32.mrb[8].mxu1  ;;  %v6043_v30 = vpack.c.bf16 %v1291_v27, %v1287_v20 }
 0x193   : > { %v1079_v45 = vadd.f32 %v1078_v44, %v5981_v22  ;;  %v1080_v46 = vpop.f32.mrb[9].mxu1 }
 0x194   : > { %v1082_v47 = vpop.f32.mrb[10].mxu1  ;;  %v1081_v50 = vadd.f32 %v1080_v46, %v5985_v24  ;;  %v1294_v36 = vpop.f32.mrb[4].mxu0 }
 0x195   : > { %v1083_v48 = vadd.f32 %v1082_v47, %v5981_v22  ;;  %v1084_v49 = vpop.f32.mrb[11].mxu1  ;;  %v1295_v39 = vadd.f32 %v1294_v36, %v6028_v10  ;;  %v1296_v40 = vpop.f32.mrb[5].mxu0  ;;  %v524_v36 = vsub.s32 2, %v5966_v56 }
 0x196   : > { %v1085_v51 = vadd.f32 %v1084_v49, %v5985_v24  ;;  %v1298_v46 = vpop.f32.mrb[6].mxu0 }
 0x197   : > { %v6009_v52 = vpack.c.bf16 %v1083_v48, %v1079_v45  ;;  %v1297_v45 = vadd.f32 %v1296_v40, %v6024_v5  ;;  %v1299_v48 = vadd.f32 %v1298_v46, %v6028_v10  ;;  %v1300_v49 = vpop.f32.mrb[7].mxu0  ;;  %v528_v40 = vsub.s32 3, %v5966_v56 }
 0x198   : > { %v6011_v53 = vpack.c.bf16 %v1085_v51, %v1081_v50  ;;  %v1301_v51 = vadd.f32 %v1300_v49, %v6024_v5 }
 0x199   : > { %v6097_v56 = vrot.slane %v5974_v6, %v528_v40 }
 0x19a   : > { %7961 = vst [vmem:[#allocation17_spill] sm:$0xff] %v6011_v53  ;;  %v1088_v54 = vpop.f32.mrb[12].mxu1 }
 0x19b   : > { %v1089_v55 = vadd.f32 %v1088_v54, %v5981_v22  ;;  %v1090_v57 = vpop.f32.mrb[13].mxu1  ;;  %v6057_v54 = vpack.c.bf16 %v1299_v48, %v1295_v39 }
 0x19c   : > { %v1092_v58 = vpop.f32.mrb[14].mxu1  ;;  %v1091_v62 = vadd.f32 %v1090_v57, %v5985_v24  ;;  %v6059_v57 = vpack.c.bf16 %v1301_v51, %v1297_v45  ;;  %v6092_v51 = vrot.slane %v5974_v6, %v524_v36 }
 0x19d   : > { %v1093_v60 = vadd.f32 %v1092_v58, %v5981_v22  ;;  %v1094_v61 = vpop.f32.mrb[15].mxu1 }
 0x19e   : > { %v1095_v63 = vadd.f32 %v1094_v61, %v5985_v24 }
 0x19f   : > { %v6018_v1 = vpack.c.bf16 %v1093_v60, %v1089_v55 }
 0x1a0   : > { %v6021_v3 = vpack.c.bf16 %v1095_v63, %v1091_v62  ;;  %v1304_v62 = vpop.f32.mrb[8].mxu0 }
 0x1a1   : > { %v1305_v2 = vadd.f32 %v1304_v62, %v6028_v10 }
 0x1a2   : > { %7962 = vst [vmem:[#allocation18_spill] sm:$0xff] %v6021_v3  ;;  %v1098_v4 = vpop.f32.mrb[16].mxu1 }
 0x1a3   : > { %v1099_v7 = vadd.f32 %v1098_v4, %v5981_v22  ;;  %v1100_v8 = vpop.f32.mrb[17].mxu1  ;;  %v1306_v4 = vpop.f32.mrb[9].mxu0 }
 0x1a4   : > { %v1102_v11 = vpop.f32.mrb[18].mxu1  ;;  %v1101_v18 = vadd.f32 %v1100_v8, %v5985_v24  ;;  %v1308_v12 = vpop.f32.mrb[10].mxu0 }
 0x1a5   : > { %v1103_v13 = vadd.f32 %v1102_v11, %v5981_v22  ;;  %v1104_v14 = vpop.f32.mrb[19].mxu1  ;;  %v1307_v11 = vadd.f32 %v1306_v4, %v6024_v5  ;;  %v1310_v16 = vpop.f32.mrb[11].mxu0 }
 0x1a6   : > { %v1105_v19 = vadd.f32 %v1104_v14, %v5985_v24  ;;  %v1309_v14 = vadd.f32 %v1308_v12, %v6028_v10 }
 0x1a7   : > { %v6035_v15 = vpack.c.bf16 %v1103_v13, %v1099_v7 }
 0x1a8   : > { %v6038_v26 = vpack.c.bf16 %v1105_v19, %v1101_v18  ;;  %v1311_v18 = vadd.f32 %v1310_v16, %v6024_v5  ;;  %v6073_v19 = vpack.c.bf16 %v1309_v14, %v1305_v2 }
 0x1aa   : > { %7963 = vst [vmem:[#allocation19_spill] sm:$0xff] %v6038_v26  ;;  %v1108_v29 = vpop.f32.mrb[20].mxu1  ;;  %v6075_v21 = vpack.c.bf16 %v1311_v18, %v1307_v11 }
 0x1ab   : > { %v1109_v31 = vadd.f32 %v1108_v29, %v5981_v22  ;;  %v1110_v34 = vpop.f32.mrb[21].mxu1 }
 0x1ac   : > { %v1112_v35 = vpop.f32.mrb[22].mxu1  ;;  %v1111_v41 = vadd.f32 %v1110_v34, %v5985_v24 }
 0x1ad   : > { %v1113_v37 = vadd.f32 %v1112_v35, %v5981_v22  ;;  %v1114_v38 = vpop.f32.mrb[23].mxu1 }
 0x1ae   : > { %v1115_v44 = vadd.f32 %v1114_v38, %v5985_v24 }
 0x1af   : > { %v6051_v47 = vpack.c.bf16 %v1113_v37, %v1109_v31  ;;  %v1314_v31 = vpop.f32.mrb[12].mxu0 }
 0x1b0   : > { %v6054_v50 = vpack.c.bf16 %v1115_v44, %v1111_v41  ;;  %v1315_v37 = vadd.f32 %v1314_v31, %v6028_v10  ;;  %v1316_v38 = vpop.f32.mrb[13].mxu0 }
 0x1b1   : > { %v1317_v41 = vadd.f32 %v1316_v38, %v6024_v5  ;;  %v1318_v44 = vpop.f32.mrb[14].mxu0 }
 0x1b2   : > { %7964 = vst [vmem:[#allocation20_spill] sm:$0xff] %v6054_v50  ;;  %v1118_v55 = vpop.f32.mrb[24].mxu1  ;;  %v1319_v46 = vadd.f32 %v1318_v44, %v6028_v10  ;;  %v1320_v48 = vpop.f32.mrb[15].mxu0 }
 0x1b3   : > { %v1119_v58 = vadd.f32 %v1118_v55, %v5981_v22  ;;  %v1120_v60 = vpop.f32.mrb[25].mxu1  ;;  %v1324_v62 = vpop.f32.mrb[16].mxu0 }
 0x1b4   : > { %v1122_v61 = vpop.f32.mrb[26].mxu1  ;;  %v1121_v7 = vadd.f32 %v1120_v60, %v5985_v24  ;;  %v6094_v55 = vpack.c.bf16 %v1319_v46, %v1315_v37  ;;  %v1325_v4 = vadd.f32 %v1324_v62, %v6028_v10 }
 0x1b5   : > { %v1123_v63 = vadd.f32 %v1122_v61, %v5981_v22  ;;  %v1124_v0 = vpop.f32.mrb[27].mxu1 }
 0x1b6   : > { %v1125_v8 = vadd.f32 %v1124_v0, %v5985_v24 }
 0x1b7   : > { %v6067_v13 = vpack.c.bf16 %v1123_v63, %v1119_v58 }
 0x1b8   : > { %v6070_v17 = vpack.c.bf16 %v1125_v8, %v1121_v7  ;;  %v1326_v7 = vpop.f32.mrb[17].mxu0 }
 0x1b9   : > { %v1327_v6 = vadd.f32 %v1326_v7, %v6024_v5  ;;  %v1328_v12 = vpop.f32.mrb[18].mxu0 }
 0x1ba   : > { %v1128_v20 = vpop.f32.mrb[28].mxu1  ;;  %v1329_v16 = vadd.f32 %v1328_v12, %v6028_v10  ;;  %v1330_v18 = vpop.f32.mrb[19].mxu0 }
 0x1bb   : > { %v1129_v23 = vadd.f32 %v1128_v20, %v5981_v22  ;;  %v1130_v25 = vpop.f32.mrb[29].mxu1  ;;  %v1334_v36 = vpop.f32.mrb[20].mxu0 }
 0x1bc   : > { %v1131_v27 = vadd.f32 %v1130_v25, %v5985_v24  ;;  %v1132_v29 = vpop.f32.mrb[30].mxu1  ;;  %v1335_v40 = vadd.f32 %v1334_v36, %v6028_v10 }
 0x1bd   : > { %v1133_v34 = vadd.f32 %v1132_v29, %v5981_v22  ;;  %v1134_v35 = vpop.f32.mrb[31].mxu1  ;;  %v1321_v22 = vadd.f32 %v1320_v48, %v6024_v5 }
 0x1be   : > { %v1135_v39 = vadd.f32 %v1134_v35, %v5985_v24 }
 0x1bf   : > { %v6085_v45 = vpack.c.bf16 %v1133_v34, %v1129_v23  ;;  %v6099_v58 = vpack.c.bf16 %v1321_v22, %v1317_v41  ;;  %v1331_v23 = vadd.f32 %v1330_v18, %v6024_v5  ;;  %v1336_v41 = vpop.f32.mrb[21].mxu0 }
 0x1c0   : > { %v6088_v49 = vpack.c.bf16 %v1135_v39, %v1131_v27  ;;  %v6114_v27 = vpack.c.bf16 %v1329_v16, %v1325_v4  ;;  %v1337_v48 = vadd.f32 %v1336_v41, %v6024_v5  ;;  %v1338_v22 = vpop.f32.mrb[22].mxu0 }
 0x1c1   : > { %7966 = vst [vmem:[#allocation22_spill] sm:$0xff] %v6099_v58  ;;  %v6116_v31 = vpack.c.bf16 %v1331_v23, %v1327_v6 }
 0x1c2   : > { %7965 = vst [vmem:[#allocation21_spill] sm:$0xff] %v6088_v49  ;;  %v1171_v24 = vpop.f32.mrb[32].mxu1 }
 0x1c3   : > { %v1173_v60 = vpop.f32.mrb[33].mxu1  ;;  %v1172_v63 = vadd.f32 %v1171_v24, %v6092_v51  ;;  %7967 = vst [vmem:[#allocation23_spill] sm:$0xff] %v6116_v31 }
 0x1c4   : > { %v1175_v61 = vpop.f32.mrb[34].mxu1  ;;  %v1174_v8 = vadd.f32 %v1173_v60, %v6097_v56  ;;  %v1339_v60 = vadd.f32 %v1338_v22, %v6028_v10 }
 0x1c5   : > { %v1176_v0 = vadd.f32 %v1175_v61, %v6092_v51  ;;  %v1177_v2 = vpop.f32.mrb[35].mxu1  ;;  %v1340_v61 = vpop.f32.mrb[23].mxu0 }
 0x1c6   : > { %v1178_v11 = vadd.f32 %v1177_v2, %v6097_v56  ;;  %v6131_v2 = vpack.c.bf16 %v1339_v60, %v1335_v40  ;;  %v1344_v6 = vpop.f32.mrb[24].mxu0 }
 0x1c7   : > { %v1365_v14 = vpack.c.bf16 %v1176_v0, %v1172_v63  ;;  %v1341_v63 = vadd.f32 %v1340_v61, %v6024_v5  ;;  %v1345_v18 = vadd.f32 %v1344_v6, %v6028_v10  ;;  %v1346_v23 = vpop.f32.mrb[25].mxu0 }
 0x1c8   : > { %v6108_v20 = vpack.c.bf16 %v1178_v11, %v1174_v8 }
 0x1c9   : > { %1957 = vrot.lane.b32.xlu0 %v1365_v14, %s5637_s10  ;;  %4881 = vmatprep.subr.msk.bf16.mxu1 %vm1490_vm0, %v1365_v14  ;;  %v1516_v25 = vsel %vm1490_vm0, %v1365_v14, 0  ;;  %v6133_v7 = vpack.c.bf16 %v1341_v63, %v1337_v48 }
 0x1ca   : > { %v1181_v29 = vpop.f32.mrb[36].mxu1  ;;  %4626 = vmatpush3.bf16.xpose.msra.mxu1 %v1516_v25 }
 0x1cb   : > { %v1183_v34 = vpop.f32.mrb[37].mxu1  ;;  %v1182_v37 = vadd.f32 %v1181_v29, %v6092_v51 }
 0x1cc   : > { %v1185_v35 = vpop.f32.mrb[38].mxu1  ;;  %v1184_v44 = vadd.f32 %v1183_v34, %v6097_v56  ;;  %v1347_v34 = vadd.f32 %v1346_v23, %v6024_v5 }
 0x1cd   : > { %v1186_v38 = vadd.f32 %v1185_v35, %v6092_v51  ;;  %v1187_v39 = vpop.f32.mrb[39].mxu1  ;;  %v1348_v35 = vpop.f32.mrb[26].mxu0 }
 0x1ce   : > { %v1188_v46 = vadd.f32 %v1187_v39, %v6097_v56 }
 0x1cf   : > { %v1371_v24 = vpack.c.bf16 %v1186_v38, %v1182_v37  ;;  %v1349_v37 = vadd.f32 %v1348_v35, %v6028_v10  ;;  %v1350_v38 = vpop.f32.mrb[27].mxu0 }
 0x1d0   : > { %v6125_v62 = vpack.c.bf16 %v1188_v46, %v1184_v44  ;;  %v1351_v40 = vadd.f32 %v1350_v38, %v6024_v5  ;;  %v1354_v61 = vpop.f32.mrb[28].mxu0 }
 0x1d1   : > { %1959 = vrot.lane.b32.xlu0 %v1371_v24, %s5637_s10  ;;  %4882 = vmatprep.subr.msk.bf16.mxu1 %vm1490_vm0, %v1371_v24  ;;  %v1519_v0 = vsel %vm1490_vm0, %v1371_v24, 0  ;;  %v6148_v44 = vpack.c.bf16 %v1349_v37, %v1345_v18 }
 0x1d2   : > { %v1191_v4 = vpop.f32.mrb[40].mxu1  ;;  %4628 = vmatpush3.bf16.xpose.msra.mxu1 %v1519_v0  ;;  %v6150_v48 = vpack.c.bf16 %v1351_v40, %v1347_v34 }
 0x1d3   : > { %v1193_v8 = vpop.f32.mrb[41].mxu1  ;;  %v1192_v12 = vadd.f32 %v1191_v4, %v6092_v51 }
 0x1d4   : > { %v1195_v11 = vpop.f32.mrb[42].mxu1  ;;  %v1194_v25 = vadd.f32 %v1193_v8, %v6097_v56  ;;  %7968 = vst [vmem:[#allocation24_spill] sm:$0xff] %v6150_v48  ;;  %v1355_v8 = vadd.f32 %v1354_v61, %v6028_v10 }
 0x1d5   : > { %v1196_v14 = vadd.f32 %v1195_v11, %v6092_v51  ;;  %v1197_v16 = vpop.f32.mrb[43].mxu1  ;;  %v6156_v11 = vpop.f32.mrb[29].mxu0 }
 0x1d6   : > { %v1198_v29 = vadd.f32 %v1197_v16, %v6097_v56 }
 0x1d7   : > { %v1377_v36 = vpack.c.bf16 %v1196_v14, %v1192_v12  ;;  %v1358_v12 = vpop.f32.mrb[30].mxu0 }
 0x1d8   : > { %v6142_v39 = vpack.c.bf16 %v1198_v29, %v1194_v25  ;;  %v1359_v16 = vadd.f32 %v1358_v12, %v6028_v10 }
 0x1d9   : > { %1961 = vrot.lane.b32.xlu1 %v1377_v36, %s5637_s10  ;;  %4883 = vmatprep.subr.msk.bf16.mxu1 %vm1490_vm0, %v1377_v36  ;;  %v1522_v41 = vsel %vm1490_vm0, %v1377_v36, 0 }
 0x1da   : > { %v1201_v46 = vpop.f32.mrb[44].mxu1  ;;  %4630 = vmatpush3.bf16.xpose.msra.mxu1 %v1522_v41  ;;  %v6165_v25 = vpack.c.bf16 %v1359_v16, %v1355_v8 }
 0x1db   : > { %v1203_v22 = vpop.f32.mrb[45].mxu1  ;;  %v1202_v63 = vadd.f32 %v1201_v46, %v6092_v51 }
 0x1dc   : > { %v1204_v24 = vadd.f32 %v1203_v22, %v6097_v56  ;;  %v1205_v60 = vpop.f32.mrb[46].mxu1 }
 0x1dd   : > { %v1206_v0 = vadd.f32 %v1205_v60, %v6092_v51  ;;  %v1207_v4 = vpop.f32.mrb[47].mxu1 }
 0x1de   : > { %v1208_v6 = vadd.f32 %v1207_v4, %v6097_v56 }
 0x1df   : > { %v1383_v14 = vpack.c.bf16 %v1206_v0, %v1202_v63 }
 0x1e0   : > { %v6160_v18 = vpack.c.bf16 %v1208_v6, %v1204_v24 }
 0x1e1   : > { %1963 = vrot.lane.b32.xlu1 %v1383_v14, %s5637_s10  ;;  %4884 = vmatprep.subr.msk.bf16.mxu1 %vm1490_vm0, %v1383_v14  ;;  %v1525_v23 = vsel %vm1490_vm0, %v1383_v14, 0 }
 0x1e2   : > { %v1211_v29 = vpop.f32.mrb[48].mxu1  ;;  %4632 = vmatpush3.bf16.xpose.msra.mxu1 %v1525_v23 }
 0x1e3   : > { %v1213_v34 = vpop.f32.mrb[49].mxu1  ;;  %v1212_v37 = vadd.f32 %v1211_v29, %v6092_v51 }
 0x1e4   : > { %v1214_v35 = vadd.f32 %v1213_v34, %v6097_v56  ;;  %v1215_v36 = vpop.f32.mrb[50].mxu1 }
 0x1e5   : > { %v1216_v10 = vadd.f32 %v1215_v36, %v6092_v51  ;;  %v1217_v38 = vpop.f32.mrb[51].mxu1 }
 0x1e6   : > { %v1218_v40 = vadd.f32 %v1217_v38, %v6097_v56 }
 0x1e7   : > { %v1389_v41 = vpack.c.bf16 %v1216_v10, %v1212_v37 }
 0x1e8   : > { %v6171_v46 = vpack.c.bf16 %v1218_v40, %v1214_v35 }
 0x1e9   : > { %1965 = vrot.lane.b32.xlu0 %v1389_v41, %s5637_s10  ;;  %4885 = vmatprep.subr.msk.bf16.mxu1 %vm1490_vm0, %v1389_v41  ;;  %v1528_v22 = vsel %vm1490_vm0, %v1389_v41, 0 }
 0x1ea   : > { %v1221_v24 = vpop.f32.mrb[52].mxu1  ;;  %4634 = vmatpush3.bf16.xpose.msra.mxu1 %v1528_v22 }
 0x1eb   : > { %v1223_v60 = vpop.f32.mrb[53].mxu1  ;;  %v1222_v0 = vadd.f32 %v1221_v24, %v6092_v51 }
 0x1ec   : > { %v1224_v61 = vadd.f32 %v1223_v60, %v6097_v56  ;;  %v1225_v63 = vpop.f32.mrb[54].mxu1 }
 0x1ed   : > { %v1226_v4 = vadd.f32 %v1225_v63, %v6092_v51  ;;  %v1227_v8 = vpop.f32.mrb[55].mxu1 }
 0x1ee   : > { %v1228_v6 = vadd.f32 %v1227_v8, %v6097_v56 }
 0x1ef   : > { %v1395_v12 = vpack.c.bf16 %v1226_v4, %v1222_v0 }
 0x1f0   : > { %v6180_v14 = vpack.c.bf16 %v1228_v6, %v1224_v61 }
 0x1f1   : > { %1967 = vrot.lane.b32.xlu1 %v1395_v12, %s5637_s10  ;;  %4886 = vmatprep.subr.msk.bf16.mxu1 %vm1490_vm0, %v1395_v12  ;;  %v1531_v16 = vsel %vm1490_vm0, %v1395_v12, 0 }
 0x1f2   : > { %v1231_v23 = vpop.f32.mrb[56].mxu1  ;;  %4636 = vmatpush3.bf16.xpose.msra.mxu1 %v1531_v16 }
 0x1f3   : > { %v1233_v29 = vpop.f32.mrb[57].mxu1  ;;  %v1232_v36 = vadd.f32 %v1231_v23, %v6092_v51 }
 0x1f4   : > { %v1234_v34 = vadd.f32 %v1233_v29, %v6097_v56  ;;  %v1235_v35 = vpop.f32.mrb[58].mxu1 }
 0x1f5   : > { %v1236_v37 = vadd.f32 %v1235_v35, %v6092_v51  ;;  %v1237_v10 = vpop.f32.mrb[59].mxu1  ;;  %v2497_v35 = vsel %vm1490_vm0, %v6108_v20, 0 }
 0x1f6   : > { %v1238_v38 = vadd.f32 %v1237_v10, %v6097_v56  ;;  %v1360_v10 = vpop.f32.mrb[31].mxu0 }
 0x1f7   : > { %v1401_v40 = vpack.c.bf16 %v1236_v37, %v1232_v36  ;;  %v1357_v36 = vadd.f32 %v6156_v11, %v6024_v5 }
 0x1f8   : > { %v6189_v41 = vpack.c.bf16 %v1238_v38, %v1234_v34  ;;  %v1361_v38 = vadd.f32 %v1360_v10, %v6024_v5 }
 0x1f9   : > { %1969 = vrot.lane.b32.xlu0 %v1401_v40, %s5637_s10  ;;  %4887 = vmatprep.subr.msk.bf16.mxu1 %vm1490_vm0, %v1401_v40  ;;  %v1534_v22 = vsel %vm1490_vm0, %v1401_v40, 0 }
 0x1fa   : > { %v1241_v24 = vpop.f32.mrb[60].mxu1  ;;  %4638 = vmatpush3.bf16.xpose.msra.mxu1 %v1534_v22  ;;  %v6299_v40 = vpack.c.bf16 %v1361_v38, %v1357_v36 }
 0x1fb   : > { %v1243_v60 = vpop.f32.mrb[61].mxu1  ;;  %v1242_v0 = vadd.f32 %v1241_v24, %v6092_v51 }
 0x1fc   : > { %v1244_v61 = vadd.f32 %v1243_v60, %v6097_v56  ;;  %v1245_v63 = vpop.f32.mrb[62].mxu1  ;;  %7970 = vst [vmem:[#allocation26_spill] sm:$0xff] %v6299_v40  ;;  %v2503_v60 = vsel %vm1490_vm0, %v6142_v39, 0 }
 0x1fd   : > { %v1246_v4 = vadd.f32 %v1245_v63, %v6092_v51  ;;  %v1247_v8 = vpop.f32.mrb[63].mxu1  ;;  %1933 = vrot.lane.b32.xlu0 %v5991_v32, %s5637_s10  ;;  %v2515_v63 = vsel %vm1490_vm0, %v6189_v41, 0 }
 0x1fe   : > { %v1248_v6 = vadd.f32 %v1247_v8, %v6097_v56 }
 0x1ff   : > { %v1407_v12 = vpack.c.bf16 %v1246_v4, %v1242_v0  ;;  %v6359_v4 = vld [vmem:[%s6356_s15] ss:$0 sm:$0xff] }
 0x200   : > { %v6200_v16 = vpack.c.bf16 %v1248_v6, %v1244_v61  ;;  %v2512_v61 = vsel %vm1490_vm0, %v6180_v14, 0 }
 0x201   : > { %1971 = vrot.lane.b32.xlu1 %v1407_v12, %s5637_s10  ;;  %4888 = vmatprep.subr.msk.bf16.mxu1 %vm1490_vm0, %v1407_v12  ;;  %v1537_v23 = vsel %vm1490_vm0, %v1407_v12, 0 }
 0x202   : > { %7969 = vst [vmem:[#allocation25_spill] sm:$0xff] %v6200_v16  ;;  %1937 = vrot.lane.b32.xlu0 %v6009_v52, %s5637_s10  ;;  %4640 = vmatpush3.bf16.xpose.msra.mxu1 %v1537_v23  ;;  %v2518_v0 = vsel %vm1490_vm0, %v6200_v16, 0 }
 0x203   : > { %4657 = vmatprep.subr.bf16.mxu1 %v6041_v28 }
 0x205   : > { %1935 = vrot.lane.b32.xlu1 %v6001_v42, %s5637_s10 }
 0x206   : > { %1941 = vrot.lane.b32.xlu0 %v6035_v15, %s5637_s10 }
 0x209   : > { %1939 = vrot.lane.b32.xlu1 %v6018_v1, %s5637_s10  ;;  %4642 = vmatmul.mubr.msk.bf16.vlgmr.msra.gmra.mrb[64].mxu1 %vm1490_vm0, %v6001_v42 }
 0x20a   : > { %1945 = vrot.lane.b32.xlu0 %v6067_v13, %s5637_s10  ;;  %4645 = vmatprep.mubr.msk.bf16.mxu1 %vm1490_vm0, %v6009_v52 }
 0x20b   : > { %4658 = vmatpush3.bf16.msra.mxu1 %v6041_v28 }
 0x20c   : > { %4659 = vmatprep.subr.bf16.mxu1 %v6057_v54 }
 0x20d   : > { %1943 = vrot.lane.b32.xlu1 %v6051_v47, %s5637_s10 }
 0x20e   : > { %2266 = vrot.lane.b32.xlu0 %v6073_v19, %s5637_s10 }
 0x20f   : > { %4660 = vmatpush3.bf16.msra.mxu1 %v6057_v54 }
 0x210   : > { %4661 = vmatprep.subr.bf16.mxu1 %v6073_v19 }
 0x211   : > { %1947 = vrot.lane.b32.xlu1 %v6085_v45, %s5637_s10  ;;  %4646 = vmatmul.mubr.msk.bf16.gmra.mrb[68].mxu1 %vm1490_vm0, %v6018_v1 }
 0x212   : > { %2272 = vrot.lane.b32.xlu0 %v6131_v2, %s5637_s10  ;;  %4649 = vmatprep.mubr.msk.bf16.mxu1 %vm1490_vm0, %v6035_v15 }
 0x213   : > { %4662 = vmatpush3.bf16.msra.mxu1 %v6073_v19 }
 0x214   : > { %4663 = vmatprep.subr.bf16.mxu1 %v6094_v55 }
 0x215   : > { %2262 = vrot.lane.b32.xlu1 %v6041_v28, %s5637_s10 }
 0x216   : > { %2276 = vrot.lane.b32.xlu0 %v6165_v25, %s5637_s10 }
 0x217   : > { %4664 = vmatpush3.bf16.msra.mxu1 %v6094_v55 }
 0x218   : > { %4665 = vmatprep.subr.bf16.mxu1 %v6114_v27 }
 0x219   : > { %2264 = vrot.lane.b32.xlu1 %v6057_v54, %s5637_s10  ;;  %4650 = vmatmul.mubr.msk.bf16.gmra.mrb[72].mxu1 %vm1490_vm0, %v6051_v47 }
 0x21a   : > { %2940 = vrot.lane.b32.xlu0 %v6125_v62, %s5637_s10  ;;  %4653 = vmatprep.mubr.msk.bf16.mxu1 %vm1490_vm0, %v6067_v13 }
 0x21b   : > { %4666 = vmatpush3.bf16.msra.mxu1 %v6114_v27 }
 0x21c   : > { %4667 = vmatprep.subr.bf16.mxu1 %v6131_v2 }
 0x21d   : > { %2268 = vrot.lane.b32.xlu1 %v6094_v55, %s5637_s10 }
 0x21f   : > { %4668 = vmatpush3.bf16.msra.mxu1 %v6131_v2 }
 0x220   : > { %4669 = vmatprep.subr.bf16.mxu1 %v6148_v44 }
 0x221   : > { %2270 = vrot.lane.b32.xlu1 %v6114_v27, %s5637_s10  ;;  %4654 = vmatmul.mubr.msk.bf16.gmra.mrb[76].mxu1 %vm1490_vm0, %v6085_v45 }
 0x223   : > { %4670 = vmatpush3.bf16.msra.mxu1 %v6148_v44 }
 0x224   : > { %4671 = vmatprep.subr.bf16.mxu1 %v6165_v25 }
 0x225   : > { %2274 = vrot.lane.b32.xlu1 %v6148_v44, %s5637_s10 }
 0x227   : > { %4672 = vmatpush3.bf16.msra.mxu1 %v6165_v25 }
 0x229   : > { %2938 = vrot.lane.b32.xlu1 %v6108_v20, %s5637_s10 }
 0x22d   : > { %2942 = vrot.lane.b32.xlu1 %v6142_v39, %s5637_s10 }
 0x23b   : > { %v1958_v32 = vpop.permute.xlu0 %1957 }
 0x23c   : > { %4889 = vmatprep.subr.msk.bf16.mxu0 %vm1490_vm0, %v1958_v32  ;;  %v1998_v42 = vsel %vm1490_vm0, %v1958_v32, 0 }
 0x23d   : > { %4690 = vmatpush3.bf16.xpose.msra.mxu0 %v1998_v42 }
 0x243   : > { %v1960_v52 = vpop.permute.xlu0 %1959 }
 0x244   : > { %4890 = vmatprep.subr.msk.bf16.mxu0 %vm1490_vm0, %v1960_v52  ;;  %v2001_v1 = vsel %vm1490_vm0, %v1960_v52, 0 }
 0x245   : > { %4692 = vmatpush3.bf16.xpose.msra.mxu0 %v2001_v1 }
 0x24b   : > { %v1962_v15 = vpop.permute.xlu1 %1961 }
 0x24c   : > { %4891 = vmatprep.subr.msk.bf16.mxu0 %vm1490_vm0, %v1962_v15  ;;  %v2004_v28 = vsel %vm1490_vm0, %v1962_v15, 0 }
 0x24d   : > { %4694 = vmatpush3.bf16.xpose.msra.mxu0 %v2004_v28 }
 0x253   : > { %v1964_v47 = vpop.permute.xlu1 %1963 }
 0x254   : > { %4892 = vmatprep.subr.msk.bf16.mxu0 %vm1490_vm0, %v1964_v47  ;;  %v2007_v54 = vsel %vm1490_vm0, %v1964_v47, 0 }
 0x255   : > { %4696 = vmatpush3.bf16.xpose.msra.mxu0 %v2007_v54 }
 0x25b   : > { %v1966_v13 = vpop.permute.xlu0 %1965 }
 0x25c   : > { %4893 = vmatprep.subr.msk.bf16.mxu0 %vm1490_vm0, %v1966_v13  ;;  %v2010_v19 = vsel %vm1490_vm0, %v1966_v13, 0 }
 0x25d   : > { %4698 = vmatpush3.bf16.xpose.msra.mxu0 %v2010_v19 }
 0x263   : > { %v1968_v45 = vpop.permute.xlu1 %1967 }
 0x264   : > { %4894 = vmatprep.subr.msk.bf16.mxu0 %vm1490_vm0, %v1968_v45  ;;  %v2013_v51 = vsel %vm1490_vm0, %v1968_v45, 0 }
 0x265   : > { %4700 = vmatpush3.bf16.xpose.msra.mxu0 %v2013_v51 }
 0x26b   : > { %v1970_v55 = vpop.permute.xlu0 %1969 }
 0x26c   : > { %4895 = vmatprep.subr.msk.bf16.mxu0 %vm1490_vm0, %v1970_v55  ;;  %v2016_v56 = vsel %vm1490_vm0, %v1970_v55, 0 }
 0x26d   : > { %4702 = vmatpush3.bf16.xpose.msra.mxu0 %v2016_v56 }
 0x26f   : > { %v1934_v27 = vpop.permute.xlu0 %1933 }
 0x270   : > { %4705 = vmatprep.mubr.msk.bf16.mxu0 %vm1490_vm0, %v1934_v27 }
 0x273   : > { %v1972_v2 = vpop.permute.xlu1 %1971 }
 0x274   : > { %4896 = vmatprep.subr.msk.bf16.mxu0 %vm1490_vm0, %v1972_v2  ;;  %v2019_v44 = vsel %vm1490_vm0, %v1972_v2, 0  ;;  %v1938_v34 = vpop.permute.xlu0 %1937 }
 0x275   : > { %4704 = vmatpush3.bf16.xpose.msra.mxu0 %v2019_v44 }
 0x276   : > { %4897 = vmatprep.subr.msk.bf16.mxu0 %vm1490_vm0, %v6108_v20  ;;  %v2500_v20 = vsel %vm1490_vm0, %v6125_v62, 0 }
 0x277   : > { %v1936_v25 = vpop.permute.xlu1 %1935 }
 0x278   : > { %v1942_v24 = vpop.permute.xlu0 %1941 }
 0x27b   : > { %v1940_v29 = vpop.permute.xlu1 %1939 }
 0x27c   : > { %4706 = vmatmul.mubr.msk.bf16.vlgmr.msra.gmra.mrb[32].mxu0 %vm1490_vm0, %v1936_v25  ;;  %v1946_v5 = vpop.permute.xlu0 %1945 }
 0x27d   : > { %4709 = vmatprep.mubr.msk.bf16.mxu0 %vm1490_vm0, %v1938_v34  ;;  %4754 = vmatpush3.bf16.xpose.msra.mxu0 %v2497_v35 }
 0x27e   : > { %4898 = vmatprep.subr.msk.bf16.mxu0 %vm1490_vm0, %v6125_v62  ;;  %v2506_v62 = vsel %vm1490_vm0, %v6160_v18, 0 }
 0x27f   : > { %v1944_v37 = vpop.permute.xlu1 %1943 }
 0x283   : > { %v1948_v22 = vpop.permute.xlu1 %1947 }
 0x284   : > { %4710 = vmatmul.mubr.msk.bf16.gmra.mrb[36].mxu0 %vm1490_vm0, %v1940_v29 }
 0x285   : > { %4713 = vmatprep.mubr.msk.bf16.mxu0 %vm1490_vm0, %v1942_v24  ;;  %4756 = vmatpush3.bf16.xpose.msra.mxu0 %v2500_v20 }
 0x286   : > { %4899 = vmatprep.subr.msk.bf16.mxu0 %vm1490_vm0, %v6142_v39  ;;  %v2509_v39 = vsel %vm1490_vm0, %v6171_v46, 0 }
 0x287   : > { %v6307_v11 = vpop.permute.xlu1 %2262 }
 0x288   : > { %4721 = vmatprep.subr.bf16.mxu1 %v6307_v11 }
 0x28c   : > { %4714 = vmatmul.mubr.msk.bf16.gmra.mrb[40].mxu0 %vm1490_vm0, %v1944_v37 }
 0x28d   : > { %4717 = vmatprep.mubr.msk.bf16.mxu0 %vm1490_vm0, %v1946_v5  ;;  %4758 = vmatpush3.bf16.xpose.msra.mxu0 %v2503_v60  ;;  %v6425_v5 = vpop.permute.xlu1 %2264 }
 0x28e   : > { %4900 = vmatprep.subr.msk.bf16.mxu0 %vm1490_vm0, %v6160_v18 }
 0x294   : > { %4718 = vmatmul.mubr.msk.bf16.gmra.mrb[44].mxu0 %vm1490_vm0, %v1948_v22 }
 0x295   : > { %4760 = vmatpush3.bf16.xpose.msra.mxu0 %v2506_v62  ;;  %4769 = vmatprep.mubr.msk.bf16.mxu0 %vm1490_vm0, %v5993_v33 }
 0x296   : > { %4901 = vmatprep.subr.msk.bf16.mxu0 %vm1490_vm0, %v6171_v46 }
 0x29d   : > { %4762 = vmatpush3.bf16.xpose.msra.mxu0 %v2509_v39 }
 0x29e   : > { %4902 = vmatprep.subr.msk.bf16.mxu0 %vm1490_vm0, %v6180_v14 }
 0x2a5   : > { %4764 = vmatpush3.bf16.xpose.msra.mxu0 %v2512_v61 }
 0x2a6   : > { %4903 = vmatprep.subr.msk.bf16.mxu0 %vm1490_vm0, %v6189_v41 }
 0x2ad   : > { %4766 = vmatpush3.bf16.xpose.msra.mxu0 %v2515_v63 }
 0x2ae   : > { %4904 = vmatprep.subr.msk.bf16.mxu0 %vm1490_vm0, %v6200_v16 }
 0x2b5   : > { %4768 = vmatpush3.bf16.xpose.msra.mxu0 %v2518_v0  ;;  %v6431_v0 = vpop.permute.xlu1 %2268 }
 0x2bc   : > { %4770 = vmatmul.mubr.msk.bf16.vlgmr.msra.gmra.mrb[48].mxu0 %vm1490_vm0, %v6003_v43 }
 0x2bd   : > { %4773 = vmatprep.mubr.msk.bf16.mxu0 %vm1490_vm0, %v6011_v53 }
 0x2c4   : > { %4774 = vmatmul.mubr.msk.bf16.gmra.mrb[52].mxu0 %vm1490_vm0, %v6021_v3 }
 0x2c5   : > { %4777 = vmatprep.mubr.msk.bf16.mxu0 %vm1490_vm0, %v6038_v26 }
 0x2cc   : > { %4778 = vmatmul.mubr.msk.bf16.gmra.mrb[56].mxu0 %vm1490_vm0, %v6054_v50 }
 0x2cd   : > { %4781 = vmatprep.mubr.msk.bf16.mxu0 %vm1490_vm0, %v6070_v17 }
 0x2d4   : > { %4782 = vmatmul.mubr.msk.bf16.gmra.mrb[60].mxu0 %vm1490_vm0, %v6088_v49 }
 0x2dc   : > { %v4643_v8 = vpop.f32.mrb[64].mxu1 }
 0x2dd   : > { %v6362_v6 = vadd.f32 %v4643_v8, %v6359_v4  ;;  %v1573_v12 = vpop.f32.mrb[65].mxu1 }
 0x2de   : > { %v4644_v23 = vpop.f32.mrb[66].mxu1  ;;  %v6369_v52 = vadd.f32 %v6359_v4, %v1573_v12  ;;  %v6436_v12 = vpop.permute.xlu0 %2266 }
 0x2df   : > { %1640 = vmax.xlane.f32.xlu0 %v6362_v6  ;;  %v1576_v32 = vpop.f32.mrb[67].mxu1  ;;  %v6374_v15 = vadd.f32 %v4644_v23, %v6359_v4 }
 0x2e0   : > { %v6366_v42 = vadd.f32 %v6359_v4, %v1576_v32 }
 0x2e2   : > { %1638 = vmax.xlane.f32.xlu1 %v6366_v42 }
 0x2e3   : > { %1636 = vmax.xlane.f32.xlu0 %v6369_v52 }
 0x2e4   : > { %v4647_v1 = vpop.f32.mrb[68].mxu1 }
 0x2e5   : > { %v6377_v28 = vadd.f32 %v4647_v1, %v6359_v4  ;;  %v1589_v47 = vpop.f32.mrb[69].mxu1 }
 0x2e6   : > { %v4648_v54 = vpop.f32.mrb[70].mxu1  ;;  %v6382_v19 = vadd.f32 %v6359_v4, %v1589_v47 }
 0x2e7   : > { %v1592_v13 = vpop.f32.mrb[71].mxu1  ;;  %1648 = vmax.xlane.f32.xlu1 %v6377_v28  ;;  %1642 = vmax.xlane.f32.xlu0 %v6374_v15  ;;  %v6385_v45 = vadd.f32 %v4648_v54, %v6359_v4  ;;  %v6445_v54 = vpop.permute.xlu1 %2270 }
 0x2e8   : > { %v6390_v55 = vadd.f32 %v6359_v4, %v1592_v13 }
 0x2eb   : > { %1644 = vmax.xlane.f32.xlu1 %v6382_v19  ;;  %1650 = vmax.xlane.f32.xlu0 %v6385_v45 }
 0x2ec   : > { %v4651_v51 = vpop.f32.mrb[72].mxu1 }
 0x2ed   : > { %v6393_v56 = vadd.f32 %v4651_v51, %v6359_v4  ;;  %v1605_v27 = vpop.f32.mrb[73].mxu1 }
 0x2ee   : > { %v4652_v2 = vpop.f32.mrb[74].mxu1  ;;  %v6398_v25 = vadd.f32 %v6359_v4, %v1605_v27  ;;  %v6449_v27 = vpop.permute.xlu0 %2272 }
 0x2ef   : > { %v1608_v44 = vpop.f32.mrb[75].mxu1  ;;  %1656 = vmax.xlane.f32.xlu1 %v6393_v56  ;;  %1646 = vmax.xlane.f32.xlu0 %v6390_v55  ;;  %v6401_v29 = vadd.f32 %v4652_v2, %v6359_v4 }
 0x2f0   : > { %v6406_v35 = vadd.f32 %v6359_v4, %v1608_v44 }
 0x2f3   : > { %1652 = vmax.xlane.f32.xlu1 %v6398_v25  ;;  %1658 = vmax.xlane.f32.xlu0 %v6401_v29 }
 0x2f4   : > { %v4655_v34 = vpop.f32.mrb[76].mxu1 }
 0x2f5   : > { %v6409_v36 = vadd.f32 %v4655_v34, %v6359_v4  ;;  %v1621_v37 = vpop.f32.mrb[77].mxu1  ;;  %v6459_v34 = vpop.permute.xlu1 %2274 }
 0x2f6   : > { %v4656_v10 = vpop.f32.mrb[78].mxu1  ;;  %v6414_v22 = vadd.f32 %v6359_v4, %v1621_v37 }
 0x2f7   : > { %v1624_v38 = vpop.f32.mrb[79].mxu1  ;;  %1664 = vmax.xlane.f32.xlu1 %v6409_v36  ;;  %1654 = vmax.xlane.f32.xlu0 %v6406_v35  ;;  %v6417_v24 = vadd.f32 %v4656_v10, %v6359_v4 }
 0x2f8   : > { %v6422_v20 = vadd.f32 %v6359_v4, %v1624_v38 }
 0x2fb   : > { %1660 = vmax.xlane.f32.xlu1 %v6414_v22  ;;  %1666 = vmax.xlane.f32.xlu0 %v6417_v24 }
 0x2ff   : > { %1662 = vmax.xlane.f32.xlu0 %v6422_v20 }
 0x34f   : > { %v4707_v60 = vpop.f32.mrb[32].mxu0 }
 0x350   : > { %v6428_v62 = vadd.f32 %v4707_v60, %v6359_v4  ;;  %v2055_v39 = vpop.f32.mrb[33].mxu0 }
 0x351   : > { %v4708_v61 = vpop.f32.mrb[34].mxu0  ;;  %v6434_v8 = vadd.f32 %v6359_v4, %v2055_v39 }
 0x352   : > { %v2058_v63 = vpop.f32.mrb[35].mxu0  ;;  %2122 = vmax.xlane.f32.xlu0 %v6428_v62  ;;  %v6440_v32 = vadd.f32 %v4708_v61, %v6359_v4  ;;  %v6467_v61 = vpop.permute.xlu0 %2276 }
 0x353   : > { %v6452_v2 = vadd.f32 %v6359_v4, %v2058_v63 }
 0x356   : > { %2118 = vmax.xlane.f32.xlu0 %v6434_v8  ;;  %v6481_v9 = vpop.permute.xlu0 %2940 }
 0x357   : > { %v4711_v23 = vpop.f32.mrb[36].mxu0  ;;  %7972 = vst [vmem:[#allocation28_spill] sm:$0xff] %v6481_v9 }
 0x358   : > { %v6443_v1 = vadd.f32 %v4711_v23, %v6359_v4  ;;  %v2071_v47 = vpop.f32.mrb[37].mxu0 }
 0x359   : > { %v4712_v13 = vpop.f32.mrb[38].mxu0  ;;  %v6455_v44 = vadd.f32 %v6359_v4, %v2071_v47 }
 0x35a   : > { %v2074_v51 = vpop.f32.mrb[39].mxu0  ;;  %2130 = vmax.xlane.f32.xlu1 %v6443_v1  ;;  %2124 = vmax.xlane.f32.xlu0 %v6440_v32  ;;  %v6462_v10 = vadd.f32 %v4712_v13, %v6359_v4  ;;  %v6477_v13 = vpop.permute.xlu1 %2938 }
 0x35b   : > { %v6465_v38 = vadd.f32 %v6359_v4, %v2074_v51  ;;  %7971 = vst [vmem:[#allocation27_spill] sm:$0xff] %v6477_v13 }
 0x35e   : > { %2126 = vmax.xlane.f32.xlu1 %v6455_v44  ;;  %2120 = vmax.xlane.f32.xlu0 %v6452_v2 }
 0x35f   : > { %v4715_v37 = vpop.f32.mrb[40].mxu0 }
 0x360   : > { %v2087_v60 = vpop.f32.mrb[41].mxu0  ;;  %v6472_v23 = vadd.f32 %v4715_v37, %v6359_v4 }
 0x361   : > { %v4716_v39 = vpop.f32.mrb[42].mxu0  ;;  %v6484_v59 = vadd.f32 %v6359_v4, %v2087_v60 }
 0x362   : > { %v2090_v63 = vpop.f32.mrb[43].mxu0  ;;  %2132 = vmax.xlane.f32.xlu1 %v6462_v10  ;;  %2128 = vmax.xlane.f32.xlu0 %v6465_v38  ;;  %v6475_v47 = vadd.f32 %v4716_v39, %v6359_v4  ;;  %v6491_v39 = vpop.permute.xlu1 %2942 }
 0x363   : > { %v6487_v49 = vadd.f32 %v6359_v4, %v2090_v63  ;;  %7973 = vst [vmem:[#allocation29_spill] sm:$0xff] %v6491_v39 }
 0x366   : > { %2138 = vmax.xlane.f32.xlu1 %v6472_v23  ;;  %2140 = vmax.xlane.f32.xlu0 %v6475_v47 }
 0x367   : > { %v4719_v51 = vpop.f32.mrb[44].mxu0 }
 0x368   : > { %v2103_v37 = vpop.f32.mrb[45].mxu0  ;;  %v6494_v13 = vadd.f32 %v4719_v51, %v6359_v4 }
 0x369   : > { %v4720_v50 = vpop.f32.mrb[46].mxu0  ;;  %v6502_v26 = vadd.f32 %v6359_v4, %v2103_v37 }
 0x36a   : > { %v2106_v40 = vpop.f32.mrb[47].mxu0  ;;  %2134 = vmax.xlane.f32.xlu1 %v6484_v59  ;;  %2136 = vmax.xlane.f32.xlu0 %v6487_v49  ;;  %v6497_v9 = vadd.f32 %v4720_v50, %v6359_v4 }
 0x36b   : > { %v6505_v48 = vadd.f32 %v6359_v4, %v2106_v40 }
 0x36c   : > { %v1641_v60 = vpop.xlane.xlu0 %1640 }
 0x36d   : > { %v1670_v51 = vsub.f32 %v6362_v6, %v1641_v60 }
 0x36e   : > { %2146 = vmax.xlane.f32.xlu1 %v6494_v13  ;;  %2148 = vmax.xlane.f32.xlu0 %v6497_v9 }
 0x36f   : > { %v1639_v63 = vpop.xlane.xlu1 %1638  ;;  %v1688_v58 = vmul.f32 1.442695, %v1670_v51 }
 0x370   : > { %v1669_v39 = vsub.f32 %v6366_v42, %v1639_v63  ;;  %v1637_v3 = vpop.xlane.xlu0 %1636 }
 0x371   : > { %v1668_v50 = vsub.f32 %v6369_v52, %v1637_v3 }
 0x372   : > { %v1686_v53 = vmul.f32 1.442695, %v1669_v39  ;;  %2142 = vmax.xlane.f32.xlu1 %v6502_v26  ;;  %2144 = vmax.xlane.f32.xlu0 %v6505_v48 }
 0x373   : > { %v1684_v31 = vmul.f32 1.442695, %v1668_v50 }
 0x374   : > { %5181 = vpow2.f32 %v1686_v53  ;;  %v1649_v33 = vpop.xlane.xlu1 %1648  ;;  %v1643_v37 = vpop.xlane.xlu0 %1642 }
 0x375   : > { %5183 = vpow2.f32 %v1684_v31  ;;  %v1671_v40 = vsub.f32 %v6374_v15, %v1643_v37  ;;  %v1674_v52 = vsub.f32 %v6377_v28, %v1649_v33 }
 0x376   : > { %5185 = vpow2.f32 %v1688_v58 }
 0x377   : > { %v1690_v16 = vmul.f32 1.442695, %v1671_v40  ;;  %v1696_v40 = vmul.f32 1.442695, %v1674_v52 }
 0x378   : > { %v1645_v42 = vpop.xlane.xlu1 %1644  ;;  %v1651_v63 = vpop.xlane.xlu0 %1650 }
 0x379   : > { %v1672_v6 = vsub.f32 %v6382_v19, %v1645_v42  ;;  %v1675_v3 = vsub.f32 %v6385_v45, %v1651_v63  ;;  %5187 = vpow2.f32 %v1690_v16 }
 0x37b   : > { %v1692_v39 = vmul.f32 1.442695, %v1672_v6  ;;  %v1698_v50 = vmul.f32 1.442695, %v1675_v3 }
 0x37c   : > { %v1657_v60 = vpop.xlane.xlu1 %1656  ;;  %v1647_v53 = vpop.xlane.xlu0 %1646 }
 0x37d   : > { %v1673_v51 = vsub.f32 %v6390_v55, %v1647_v53  ;;  %5189 = vpow2.f32 %v1692_v39  ;;  %v1678_v42 = vsub.f32 %v6393_v56, %v1657_v60 }
 0x37e   : > { %v6517_v31 = vpop.eup %5181  ;;  %5191 = vpow2.f32 %v1698_v50 }
 0x37f   : > { %v6519_v15 = vpop.eup %5183  ;;  %v1694_v37 = vmul.f32 1.442695, %v1673_v51 }
 0x380   : > { %v1653_v58 = vpop.xlane.xlu1 %1652  ;;  %v1659_v19 = vpop.xlane.xlu0 %1658  ;;  %v1764_v16 = vpack.c.bf16 %v6517_v31, %v6519_v15 }
 0x381   : > { %v1676_v33 = vsub.f32 %v6398_v25, %v1653_v58  ;;  %v1679_v28 = vsub.f32 %v6401_v29, %v1659_v19  ;;  %5193 = vpow2.f32 %v1694_v37  ;;  %v6525_v45 = vpop.eup %5185  ;;  %v1704_v29 = vmul.f32 1.442695, %v1678_v42 }
 0x382   : > { %4673 = vmatprep.mubr.bf16.mxu1 %v1764_v16  ;;  %5195 = vpow2.f32 %v1696_v40 }
 0x383   : > { %v6527_v55 = vpop.eup %5187  ;;  %v1700_v63 = vmul.f32 1.442695, %v1676_v33  ;;  %v1706_v52 = vmul.f32 1.442695, %v1679_v28 }
 0x384   : > { %v1665_v6 = vpop.xlane.xlu1 %1664  ;;  %v1655_v3 = vpop.xlane.xlu0 %1654  ;;  %v1765_v25 = vpack.c.bf16 %v6527_v55, %v6525_v45 }
 0x385   : > { %v1677_v39 = vsub.f32 %v6406_v35, %v1655_v3  ;;  %5197 = vpow2.f32 %v1700_v63  ;;  %v1682_v58 = vsub.f32 %v6409_v36, %v1665_v6 }
 0x386   : > { %4674 = vmatmul.mubr.bf16.vlgmr.msra.gmra.mrb[80].mxu1 %v1765_v25  ;;  %5199 = vpow2.f32 %v1706_v52 }
 0x387   : > { %v1702_v53 = vmul.f32 1.442695, %v1677_v39  ;;  %4722 = vmatpush3.bf16.msra.mxu1 %v6307_v11  ;;  %v6536_v60 = vpop.eup %5189  ;;  %v1712_v63 = vmul.f32 1.442695, %v1682_v58 }
 0x388   : > { %v1661_v50 = vpop.xlane.xlu1 %1660  ;;  %v1667_v51 = vpop.xlane.xlu0 %1666  ;;  %4723 = vmatprep.subr.bf16.mxu1 %v6425_v5 }
 0x389   : > { %v1680_v56 = vsub.f32 %v6414_v22, %v1661_v50  ;;  %5201 = vpow2.f32 %v1702_v53  ;;  %v1683_v35 = vsub.f32 %v6417_v24, %v1667_v51  ;;  %v6539_v37 = vpop.eup %5191 }
 0x38a   : > { %5203 = vpow2.f32 %v1704_v29 }
 0x38b   : > { %v6541_v40 = vpop.eup %5193  ;;  %v1708_v11 = vmul.f32 1.442695, %v1680_v56  ;;  %4724 = vmatpush3.bf16.msra.mxu1 %v6425_v5  ;;  %v1714_v24 = vmul.f32 1.442695, %v1683_v35 }
 0x38c   : > { %v1663_v19 = vpop.xlane.xlu0 %1662  ;;  %4725 = vmatprep.subr.bf16.mxu1 %v6436_v12  ;;  %v1766_v16 = vpack.c.bf16 %v6541_v40, %v6536_v60  ;;  %v6549_v33 = vpop.eup %5195 }
 0x38d   : > { %v1681_v22 = vsub.f32 %v6422_v20, %v1663_v19  ;;  %v1767_v42 = vpack.c.bf16 %v6539_v37, %v6549_v33  ;;  %5205 = vpow2.f32 %v1708_v11 }
 0x38e   : > { %4677 = vmatprep.mubr.bf16.mxu1 %v1766_v16 }
 0x38f   : > { %v1710_v28 = vmul.f32 1.442695, %v1681_v22  ;;  %v4771_v36 = vpop.f32.mrb[48].mxu0  ;;  %4726 = vmatpush3.bf16.msra.mxu1 %v6436_v12  ;;  %v6558_v3 = vpop.eup %5197 }
 0x390   : > { %v6555_v5 = vadd.f32 %v4771_v36, %v6359_v4  ;;  %v2554_v20 = vpop.f32.mrb[49].mxu0  ;;  %4678 = vmatmul.mubr.bf16.gmra.mrb[84].mxu1 %v1767_v42  ;;  %4727 = vmatprep.subr.bf16.mxu1 %v6431_v0  ;;  %v6564_v25 = vpop.eup %5199 }
 0x391   : > { %5207 = vpow2.f32 %v1710_v28  ;;  %v4772_v6 = vpop.f32.mrb[50].mxu0  ;;  %7974 = vst [vmem:[#allocation30_spill] sm:$0xff] %v6564_v25  ;;  %v6569_v53 = vadd.f32 %v6359_v4, %v2554_v20 }
 0x392   : > { %5209 = vpow2.f32 %v1714_v24  ;;  %v6561_v52 = vadd.f32 %v4772_v6, %v6359_v4  ;;  %v2557_v39 = vpop.f32.mrb[51].mxu0  ;;  %2621 = vmax.xlane.f32.xlu1 %v6555_v5 }
 0x393   : > { %v6566_v12 = vpop.eup %5201  ;;  %5211 = vpow2.f32 %v1712_v63  ;;  %4728 = vmatpush3.bf16.msra.mxu1 %v6431_v0  ;;  %v6579_v51 = vadd.f32 %v6359_v4, %v2557_v39 }
 0x394   : > { %7975 = vst [vmem:[#allocation31_spill] sm:$0xff] %v6566_v12  ;;  %2623 = vmax.xlane.f32.xlu0 %v6561_v52  ;;  %4729 = vmatprep.subr.bf16.mxu1 %v6445_v54  ;;  %v1768_v29 = vpack.c.bf16 %v6566_v12, %v6558_v3  ;;  %v6576_v50 = vpop.eup %5203 }
 0x395   : > { %v1769_v56 = vpack.c.bf16 %v6564_v25, %v6576_v50 }
 0x396   : > { %2617 = vmax.xlane.f32.xlu1 %v6569_v53  ;;  %4681 = vmatprep.mubr.bf16.mxu1 %v1768_v29 }
 0x397   : > { %v4775_v35 = vpop.f32.mrb[52].mxu0  ;;  %4730 = vmatpush3.bf16.msra.mxu1 %v6445_v54  ;;  %v6593_v22 = vpop.eup %5205 }
 0x398   : > { %v6586_v0 = vadd.f32 %v4775_v35, %v6359_v4  ;;  %v2570_v58 = vpop.f32.mrb[53].mxu0  ;;  %2619 = vmax.xlane.f32.xlu0 %v6579_v51  ;;  %4682 = vmatmul.mubr.bf16.gmra.mrb[88].mxu1 %v1769_v56  ;;  %7976 = vst [vmem:[#allocation32_spill] sm:$0xff] %v6593_v22 }
 0x399   : > { %4731 = vmatprep.subr.bf16.mxu1 %v6449_v27  ;;  %v6591_v11 = vadd.f32 %v6359_v4, %v2570_v58  ;;  %v4776_v19 = vpop.f32.mrb[54].mxu0 }
 0x39a   : > { %v2573_v16 = vpop.f32.mrb[55].mxu0  ;;  %2629 = vmax.xlane.f32.xlu1 %v6586_v0  ;;  %v6608_v36 = vadd.f32 %v4776_v19, %v6359_v4 }
 0x39b   : > { %v6596_v24 = vpop.eup %5207  ;;  %4732 = vmatpush3.bf16.msra.mxu1 %v6449_v27  ;;  %v6619_v29 = vadd.f32 %v6359_v4, %v2573_v16 }
 0x39c   : > { %7977 = vst [vmem:[#allocation33_spill] sm:$0xff] %v6596_v24  ;;  %v6598_v54 = vpop.eup %5209  ;;  %2625 = vmax.xlane.f32.xlu0 %v6591_v11  ;;  %v1770_v28 = vpack.c.bf16 %v6596_v24, %v6593_v22  ;;  %4733 = vmatprep.subr.bf16.mxu1 %v6459_v34 }
 0x39d   : > { %7978 = vst [vmem:[#allocation34_spill] sm:$0xff] %v6598_v54  ;;  %v6605_v42 = vpop.eup %5211 }
 0x39e   : > { %7979 = vst [vmem:[#allocation35_spill] sm:$0xff] %v6605_v42  ;;  %4685 = vmatprep.mubr.bf16.mxu1 %v1770_v28  ;;  %v1771_v63 = vpack.c.bf16 %v6598_v54, %v6605_v42 }
 0x39f   : > { %v4779_v20 = vpop.f32.mrb[56].mxu0  ;;  %4734 = vmatpush3.bf16.msra.mxu1 %v6459_v34 }
 0x3a0   : > { %v2586_v27 = vpop.f32.mrb[57].mxu0  ;;  %2631 = vmax.xlane.f32.xlu0 %v6608_v36  ;;  %4686 = vmatmul.mubr.bf16.gmra.mrb[92].mxu1 %v1771_v63  ;;  %v6629_v35 = vadd.f32 %v4779_v20, %v6359_v4 }
 0x3a1   : > { %4735 = vmatprep.subr.bf16.mxu1 %v6467_v61  ;;  %v6616_v6 = vadd.f32 %v6359_v4, %v2586_v27  ;;  %v4780_v39 = vpop.f32.mrb[58].mxu0 }
 0x3a2   : > { %v2589_v56 = vpop.f32.mrb[59].mxu0  ;;  %v6634_v28 = vadd.f32 %v4780_v39, %v6359_v4 }
 0x3a3   : > { %2633 = vmax.xlane.f32.xlu1 %v6616_v6  ;;  %4736 = vmatpush3.bf16.msra.mxu1 %v6467_v61  ;;  %v6625_v34 = vadd.f32 %v6359_v4, %v2589_v56 }
 0x3a4   : > { %2627 = vmax.xlane.f32.xlu0 %v6619_v29  ;;  %4785 = vmatprep.subr.bf16.mxu1 %v6043_v30 }
 0x3a7   : > { %v4783_v58 = vpop.f32.mrb[60].mxu0  ;;  %2635 = vmax.xlane.f32.xlu1 %v6625_v34 }
 0x3a8   : > { %v2602_v19 = vpop.f32.mrb[61].mxu0  ;;  %2637 = vmax.xlane.f32.xlu0 %v6629_v35  ;;  %v6638_v63 = vadd.f32 %v4783_v58, %v6359_v4 }
 0x3a9   : > { %v4784_v16 = vpop.f32.mrb[62].mxu0  ;;  %v6642_v20 = vadd.f32 %v6359_v4, %v2602_v19 }
 0x3aa   : > { %v2605_v61 = vpop.f32.mrb[63].mxu0  ;;  %v6652_v27 = vadd.f32 %v4784_v16, %v6359_v4 }
 0x3ac   : > { %2639 = vmax.xlane.f32.xlu0 %v6634_v28 }
 0x3b0   : > { %2645 = vmax.xlane.f32.xlu0 %v6638_v63 }
 0x3b4   : > { %2641 = vmax.xlane.f32.xlu0 %v6642_v20 }
 0x3b8   : > { %2944 = vrot.lane.b32.xlu1 %v6160_v18, %s5637_s10 }
 0x3ca   : > { %2946 = vrot.lane.b32.xlu0 %v6171_v46, %s5637_s10  ;;  %v6659_v46 = vadd.f32 %v6359_v4, %v2605_v61 }
 0x3ce   : > { %2948 = vrot.lane.b32.xlu0 %v6180_v14, %s5637_s10 }
 0x3dc   : > { %2647 = vmax.xlane.f32.xlu1 %v6652_v27 }
 0x3df   : > { %v2123_v39 = vpop.xlane.xlu0 %2122 }
 0x3e0   : > { %v2152_v18 = vsub.f32 %v6428_v62, %v2123_v39 }
 0x3e3   : > { %v2119_v56 = vpop.xlane.xlu0 %2118 }
 0x3e4   : > { %v2150_v58 = vsub.f32 %v6434_v8, %v2119_v56  ;;  %v2170_v8 = vmul.f32 1.442695, %v2152_v18 }
 0x3e6   : > { %v2166_v24 = vmul.f32 1.442695, %v2150_v58 }
 0x3e7   : > { %v2131_v19 = vpop.xlane.xlu1 %2130  ;;  %v2125_v42 = vpop.xlane.xlu0 %2124 }
 0x3e8   : > { %v2153_v54 = vsub.f32 %v6440_v32, %v2125_v42  ;;  %5213 = vpow2.f32 %v2166_v24 }
 0x3ea   : > { %v2172_v16 = vmul.f32 1.442695, %v2153_v54 }
 0x3eb   : > { %v2127_v14 = vpop.xlane.xlu1 %2126  ;;  %v2121_v25 = vpop.xlane.xlu0 %2120 }
 0x3ec   : > { %v2154_v12 = vsub.f32 %v6455_v44, %v2127_v14  ;;  %v2151_v22 = vsub.f32 %v6452_v2, %v2121_v25  ;;  %5215 = vpow2.f32 %v2172_v16 }
 0x3ed   : > { %2916 = vrot.lane.b32.xlu1 %v6003_v43, %s5637_s10  ;;  %2643 = vmax.xlane.f32.xlu0 %v6659_v46  ;;  %v2156_v43 = vsub.f32 %v6443_v1, %v2131_v19 }
 0x3ee   : > { %v2168_v32 = vmul.f32 1.442695, %v2151_v22  ;;  %v2174_v4 = vmul.f32 1.442695, %v2154_v12 }
 0x3ef   : > { %v2133_v62 = vpop.xlane.xlu1 %2132  ;;  %v2129_v42 = vpop.xlane.xlu0 %2128  ;;  %v2178_v12 = vmul.f32 1.442695, %v2156_v43 }
 0x3f0   : > { %v2157_v61 = vsub.f32 %v6462_v10, %v2133_v62  ;;  %v2155_v54 = vsub.f32 %v6465_v38, %v2129_v42  ;;  %5217 = vpow2.f32 %v2168_v32 }
 0x3f1   : > { %2926 = vrot.lane.b32.xlu1 %v6070_v17, %s5637_s10  ;;  %5219 = vpow2.f32 %v2170_v8 }
 0x3f2   : > { %v2176_v2 = vmul.f32 1.442695, %v2155_v54  ;;  %5221 = vpow2.f32 %v2174_v4  ;;  %v2180_v22 = vmul.f32 1.442695, %v2157_v61  ;;  %v6677_v56 = vpop.eup %5213 }
 0x3f3   : > { %v2139_v44 = vpop.xlane.xlu1 %2138  ;;  %v2141_v25 = vpop.xlane.xlu0 %2140 }
 0x3f4   : > { %5223 = vpow2.f32 %v2176_v2  ;;  %v2160_v10 = vsub.f32 %v6472_v23, %v2139_v44  ;;  %v2161_v38 = vsub.f32 %v6475_v47, %v2141_v25 }
 0x3f5   : > { %3245 = vrot.lane.b32.xlu1 %v6059_v57, %s5637_s10  ;;  %5225 = vpow2.f32 %v2180_v22 }
 0x3f6   : > { %v6681_v58 = vpop.eup %5215  ;;  %5227 = vpow2.f32 %v2178_v12  ;;  %v2186_v19 = vmul.f32 1.442695, %v2160_v10  ;;  %v2188_v47 = vmul.f32 1.442695, %v2161_v38 }
 0x3f7   : > { %v2135_v24 = vpop.xlane.xlu1 %2134  ;;  %v2137_v39 = vpop.xlane.xlu0 %2136 }
 0x3f8   : > { %v2158_v17 = vsub.f32 %v6484_v59, %v2135_v24  ;;  %v2159_v1 = vsub.f32 %v6487_v49, %v2137_v39 }
 0x3f9   : > { %3253 = vrot.lane.b32.xlu1 %v6133_v7, %s5637_s10 }
 0x3fa   : > { %v2182_v18 = vmul.f32 1.442695, %v2158_v17  ;;  %v2184_v23 = vmul.f32 1.442695, %v2159_v1  ;;  %v6683_v14 = vpop.eup %5217  ;;  %v7981_v1 = vld [vmem:[#allocation22_spill] sm:$0xff] }
 0x3fb   : > { %v2147_v16 = vpop.xlane.xlu1 %2146  ;;  %v2149_v8 = vpop.xlane.xlu0 %2148  ;;  %v2246_v59 = vpack.c.bf16 %v6683_v14, %v6677_v56 }
 0x3fc   : > { %v6685_v32 = vpop.eup %5219  ;;  %5229 = vpow2.f32 %v2182_v18  ;;  %v2164_v4 = vsub.f32 %v6494_v13, %v2147_v16  ;;  %v2165_v43 = vsub.f32 %v6497_v9, %v2149_v8  ;;  %v7983_v18 = vld [vmem:[#allocation23_spill] sm:$0xff]  ;;  %v7984_v8 = vld [vmem:[#allocation17_spill] sm:$0xff] }
 0x3fd   : > { %5231 = vpow2.f32 %v2184_v23  ;;  %v2247_v49 = vpack.c.bf16 %v6681_v58, %v6685_v32  ;;  %v6691_v62 = vpop.eup %5221  ;;  %4737 = vmatprep.mubr.bf16.mxu1 %v2246_v59 }
 0x3fe   : > { %5233 = vpow2.f32 %v2186_v19  ;;  %v6693_v42 = vpop.eup %5223  ;;  %v2194_v10 = vmul.f32 1.442695, %v2164_v4  ;;  %v2196_v38 = vmul.f32 1.442695, %v2165_v43  ;;  %v7982_v19 = vld [vmem:[#allocation16_spill] sm:$0xff] }
 0x3ff   : > { %5235 = vpow2.f32 %v2188_v47  ;;  %4738 = vmatmul.mubr.bf16.vlgmr.msra.gmra.mrb[96].mxu1 %v2247_v49  ;;  %v2143_v61 = vpop.xlane.xlu1 %2142  ;;  %v2145_v54 = vpop.xlane.xlu0 %2144  ;;  %v2248_v25 = vpack.c.bf16 %v6693_v42, %v6691_v62 }
 0x400   : > { %4786 = vmatpush3.bf16.msra.mxu1 %v6043_v30  ;;  %v2162_v2 = vsub.f32 %v6502_v26, %v2143_v61  ;;  %v2163_v44 = vsub.f32 %v6505_v48, %v2145_v54  ;;  %v6703_v22 = vpop.eup %5225  ;;  %v7985_v61 = vld [vmem:[#allocation18_spill] sm:$0xff]  ;;  %v7986_v54 = vld [vmem:[#allocation24_spill] sm:$0xff] }
 0x401   : > { %4787 = vmatprep.subr.bf16.mxu1 %v6059_v57  ;;  %4741 = vmatprep.mubr.bf16.mxu1 %v2248_v25  ;;  %v6707_v9 = vpop.eup %5227  ;;  %v7989_v25 = vld [vmem:[#allocation20_spill] sm:$0xff] }
 0x402   : > { %v2190_v12 = vmul.f32 1.442695, %v2162_v2  ;;  %v2192_v13 = vmul.f32 1.442695, %v2163_v44  ;;  %v2249_v26 = vpack.c.bf16 %v6703_v22, %v6707_v9  ;;  %v7987_v2 = vld [vmem:[#allocation19_spill] sm:$0xff]  ;;  %v7988_v44 = vld [vmem:[#allocation26_spill] sm:$0xff] }
 0x403   : > { %2950 = vrot.lane.b32.xlu0 %v6189_v41, %s5637_s10  ;;  %v7980_v41 = vld [vmem:[#allocation25_spill] sm:$0xff] }
 0x404   : > { %5237 = vpow2.f32 %v2190_v12  ;;  %4788 = vmatpush3.bf16.msra.mxu1 %v6059_v57  ;;  %v7990_v12 = vld [vmem:[#allocation27_spill] sm:$0xff] }
 0x405   : > { %5239 = vpow2.f32 %v2192_v13  ;;  %4789 = vmatprep.subr.bf16.mxu1 %v6075_v21  ;;  %v7991_v13 = vld [vmem:[#allocation21_spill] sm:$0xff] }
 0x406   : > { %v6713_v48 = vpop.eup %5229  ;;  %5241 = vpow2.f32 %v2194_v10 }
 0x407   : > { %v6715_v24 = vpop.eup %5231  ;;  %4742 = vmatmul.mubr.bf16.gmra.mrb[100].mxu1 %v2249_v26  ;;  %2952 = vrot.lane.b32.xlu0 %v7980_v41, %s5637_s10  ;;  %5243 = vpow2.f32 %v2196_v38 }
 0x408   : > { %v6719_v39 = vpop.eup %5233  ;;  %4790 = vmatpush3.bf16.msra.mxu1 %v6075_v21  ;;  %v2250_v57 = vpack.c.bf16 %v6715_v24, %v6713_v48 }
 0x409   : > { %v6724_v17 = vpop.eup %5235  ;;  %4791 = vmatprep.subr.bf16.mxu1 %v7981_v1 }
 0x40a   : > { %4745 = vmatprep.mubr.bf16.mxu1 %v2250_v57  ;;  %v2251_v23 = vpack.c.bf16 %v6724_v17, %v6719_v39 }
 0x40b   : > { %2914 = vrot.lane.b32.xlu0 %v7982_v19, %s5637_s10 }
 0x40c   : > { %4792 = vmatpush3.bf16.msra.mxu1 %v7981_v1 }
 0x40d   : > { %4793 = vmatprep.subr.bf16.mxu1 %v7983_v18 }
 0x40e   : > { %v6733_v47 = vpop.eup %5237 }
 0x40f   : > { %v6735_v16 = vpop.eup %5239  ;;  %4746 = vmatmul.mubr.bf16.gmra.mrb[104].mxu1 %v2251_v23  ;;  %2918 = vrot.lane.b32.xlu0 %v7984_v8, %s5637_s10 }
 0x410   : > { %4794 = vmatpush3.bf16.msra.mxu1 %v7983_v18  ;;  %v2252_v59 = vpack.c.bf16 %v6735_v16, %v6733_v47  ;;  %v6742_v49 = vpop.eup %5241 }
 0x411   : > { %4795 = vmatprep.subr.bf16.mxu1 %v6133_v7  ;;  %v6745_v4 = vpop.eup %5243 }
 0x412   : > { %4749 = vmatprep.mubr.bf16.mxu1 %v2252_v59  ;;  %v2253_v43 = vpack.c.bf16 %v6745_v4, %v6742_v49 }
 0x413   : > { %2920 = vrot.lane.b32.xlu0 %v7985_v61, %s5637_s10 }
 0x414   : > { %4796 = vmatpush3.bf16.msra.mxu1 %v6133_v7 }
 0x415   : > { %4797 = vmatprep.subr.bf16.mxu1 %v7986_v54 }
 0x417   : > { %4750 = vmatmul.mubr.bf16.gmra.mrb[108].mxu1 %v2253_v43  ;;  %2922 = vrot.lane.b32.xlu0 %v7987_v2, %s5637_s10 }
 0x418   : > { %4798 = vmatpush3.bf16.msra.mxu1 %v7986_v54 }
 0x419   : > { %4799 = vmatprep.subr.bf16.mxu1 %v7988_v44 }
 0x41b   : > { %2924 = vrot.lane.b32.xlu0 %v7989_v25, %s5637_s10 }
 0x41c   : > { %4800 = vmatpush3.bf16.msra.mxu1 %v7988_v44 }
 0x41d   : > { %4905 = vmatprep.subr.msk.bf16.mxu1 %vm1490_vm0, %v7990_v12 }
 0x41f   : > { %v2622_v7 = vpop.xlane.xlu1 %2621  ;;  %2928 = vrot.lane.b32.xlu0 %v7991_v13, %s5637_s10 }
 0x420   : > { %v2651_v26 = vsub.f32 %v6555_v5, %v2622_v7 }
 0x421   : > { %v2624_v10 = vpop.xlane.xlu0 %2623 }
 0x422   : > { %v2652_v38 = vsub.f32 %v6561_v52, %v2624_v10  ;;  %v2669_v61 = vmul.f32 1.442695, %v2651_v26 }
 0x423   : > { %v2618_v41 = vpop.xlane.xlu1 %2617  ;;  %3243 = vrot.lane.b32.xlu0 %v6043_v30, %s5637_s10 }
 0x424   : > { %v2671_v57 = vmul.f32 1.442695, %v2652_v38  ;;  %v2649_v19 = vsub.f32 %v6569_v53, %v2618_v41 }
 0x425   : > { %v2620_v23 = vpop.xlane.xlu0 %2619 }
 0x426   : > { %v2665_v8 = vmul.f32 1.442695, %v2649_v19  ;;  %v2650_v59 = vsub.f32 %v6579_v51, %v2620_v23  ;;  %5245 = vpow2.f32 %v2671_v57 }
 0x427   : > { %3247 = vrot.lane.b32.xlu0 %v6075_v21, %s5637_s10  ;;  %v2630_v30 = vpop.xlane.xlu1 %2629 }
 0x428   : > { %v2667_v43 = vmul.f32 1.442695, %v2650_v59  ;;  %5247 = vpow2.f32 %v2665_v8  ;;  %v2655_v51 = vsub.f32 %v6586_v0, %v2630_v30  ;;  %v2979_v59 = vsel %vm1490_vm0, %v7990_v12, 0 }
 0x429   : > { %v2626_v52 = vpop.xlane.xlu0 %2625 }
 0x42a   : > { %5249 = vpow2.f32 %v2667_v43  ;;  %v2653_v5 = vsub.f32 %v6591_v11, %v2626_v52  ;;  %v2677_v11 = vmul.f32 1.442695, %v2655_v51  ;;  %v7992_v43 = vld [vmem:[#allocation28_spill] sm:$0xff] }
 0x42b   : > { %5251 = vpow2.f32 %v2669_v61  ;;  %3249 = vrot.lane.b32.xlu0 %v7981_v1, %s5637_s10  ;;  %v2982_v12 = vsel %vm1490_vm0, %v7992_v43, 0 }
 0x42c   : > { %v2673_v21 = vmul.f32 1.442695, %v2653_v5 }
 0x42d   : > { %v2632_v53 = vpop.xlane.xlu0 %2631 }
 0x42e   : > { %v2656_v2 = vsub.f32 %v6608_v36, %v2632_v53  ;;  %5253 = vpow2.f32 %v2673_v21 }
 0x42f   : > { %3251 = vrot.lane.b32.xlu0 %v7983_v18, %s5637_s10 }
 0x430   : > { %v2634_v25 = vpop.xlane.xlu1 %2633  ;;  %v2679_v7 = vmul.f32 1.442695, %v2656_v2  ;;  %v6780_v38 = vpop.eup %5245 }
 0x431   : > { %v2657_v13 = vsub.f32 %v6616_v6, %v2634_v25  ;;  %v2628_v10 = vpop.xlane.xlu0 %2627 }
 0x432   : > { %v2654_v1 = vsub.f32 %v6619_v29, %v2628_v10  ;;  %v6783_v26 = vpop.eup %5247  ;;  %5255 = vpow2.f32 %v2679_v7 }
 0x433   : > { %3255 = vrot.lane.b32.xlu0 %v7986_v54, %s5637_s10  ;;  %v2681_v36 = vmul.f32 1.442695, %v2657_v13 }
 0x434   : > { %v6787_v0 = vpop.eup %5249  ;;  %v2675_v18 = vmul.f32 1.442695, %v2654_v1  ;;  %v2636_v41 = vpop.xlane.xlu1 %2635 }
 0x435   : > { %v6789_v57 = vpop.eup %5251  ;;  %v2658_v6 = vsub.f32 %v6625_v34, %v2636_v41  ;;  %v2638_v19 = vpop.xlane.xlu0 %2637  ;;  %v2745_v29 = vpack.c.bf16 %v6787_v0, %v6783_v26 }
 0x436   : > { %5257 = vpow2.f32 %v2675_v18  ;;  %v2659_v23 = vsub.f32 %v6629_v35, %v2638_v19  ;;  %v2746_v54 = vpack.c.bf16 %v6780_v38, %v6789_v57 }
 0x437   : > { %5259 = vpow2.f32 %v2677_v11  ;;  %v2683_v8 = vmul.f32 1.442695, %v2658_v6  ;;  %4801 = vmatprep.mubr.bf16.mxu1 %v2745_v29 }
 0x438   : > { %5261 = vpow2.f32 %v2681_v36  ;;  %4802 = vmatmul.mubr.bf16.vlgmr.msra.gmra.mrb[112].mxu1 %v2746_v54  ;;  %v2685_v34 = vmul.f32 1.442695, %v2659_v23  ;;  %v6802_v30 = vpop.eup %5253  ;;  %v2945_v18 = vpop.permute.xlu1 %2944 }
 0x439   : > { %5263 = vpow2.f32 %v2683_v8  ;;  %4818 = vmatpush3.bf16.xpose.msra.mxu1 %v2979_v59  ;;  %v2640_v61 = vpop.xlane.xlu0 %2639  ;;  %v2988_v19 = vsel %vm1490_vm0, %v2945_v18, 0 }
 0x43a   : > { %4906 = vmatprep.subr.msk.bf16.mxu1 %vm1490_vm0, %v7992_v43  ;;  %v2660_v35 = vsub.f32 %v6634_v28, %v2640_v61  ;;  %5265 = vpow2.f32 %v2685_v34  ;;  %v7994_v28 = vld [vmem:[#allocation29_spill] sm:$0xff] }
 0x43b   : > { %v2985_v36 = vsel %vm1490_vm0, %v7994_v28, 0 }
 0x43c   : > { %v2687_v52 = vmul.f32 1.442695, %v2660_v35  ;;  %v6804_v5 = vpop.eup %5255 }
 0x43d   : > { %v2646_v10 = vpop.xlane.xlu0 %2645 }
 0x43e   : > { %5267 = vpow2.f32 %v2687_v52 }
 0x440   : > { %v6806_v53 = vpop.eup %5257 }
 0x441   : > { %v6810_v2 = vpop.eup %5259  ;;  %4820 = vmatpush3.bf16.xpose.msra.mxu1 %v2982_v12  ;;  %v2747_v51 = vpack.c.bf16 %v6806_v53, %v6802_v30  ;;  %v2642_v6 = vpop.xlane.xlu0 %2641 }
 0x442   : > { %v6814_v21 = vpop.eup %5261  ;;  %4907 = vmatprep.subr.msk.bf16.mxu1 %vm1490_vm0, %v7994_v28  ;;  %v2748_v25 = vpack.c.bf16 %v6804_v5, %v6810_v2 }
 0x443   : > { %7993 = vst [vmem:[#allocation25_spill] sm:$0xff] %v6814_v21  ;;  %v6820_v7 = vpop.eup %5263  ;;  %4805 = vmatprep.mubr.bf16.mxu1 %v2747_v51 }
 0x444   : > { %4806 = vmatmul.mubr.bf16.gmra.mrb[116].mxu1 %v2748_v25  ;;  %v2749_v13 = vpack.c.bf16 %v6820_v7, %v6814_v21  ;;  %v6824_v1 = vpop.eup %5265 }
 0x445   : > { %7995 = vst [vmem:[#allocation22_spill] sm:$0xff] %v6824_v1  ;;  %v2947_v29 = vpop.permute.xlu0 %2946 }
 0x446   : > { %4809 = vmatprep.mubr.bf16.mxu1 %v2749_v13  ;;  %v2991_v23 = vsel %vm1490_vm0, %v2947_v29, 0 }
 0x448   : > { %v6826_v11 = vpop.eup %5267 }
 0x449   : > { %4822 = vmatpush3.bf16.xpose.msra.mxu1 %v2985_v36  ;;  %v2750_v41 = vpack.c.bf16 %v6826_v11, %v6824_v1  ;;  %v2949_v54 = vpop.permute.xlu0 %2948 }
 0x44a   : > { %4908 = vmatprep.subr.msk.bf16.mxu1 %vm1490_vm0, %v2945_v18  ;;  %v2994_v43 = vsel %vm1490_vm0, %v2949_v54, 0 }
 0x44c   : > { %4810 = vmatmul.mubr.bf16.gmra.mrb[120].mxu1 %v2750_v41 }
 0x451   : > { %4824 = vmatpush3.bf16.xpose.msra.mxu1 %v2988_v19  ;;  %v2661_v19 = vsub.f32 %v6642_v20, %v2642_v6 }
 0x452   : > { %4909 = vmatprep.subr.msk.bf16.mxu1 %vm1490_vm0, %v2947_v29 }
 0x459   : > { %4826 = vmatpush3.bf16.xpose.msra.mxu1 %v2991_v23  ;;  %v6836_v8 = vpop.f32.mrb[80].mxu1 }
 0x45a   : > { %7996 = vst [vmem:[#allocation16_spill] sm:$0xff] %v6836_v8  ;;  %4910 = vmatprep.subr.msk.bf16.mxu1 %vm1490_vm0, %v2949_v54  ;;  %v6839_v59 = vpop.f32.mrb[81].mxu1 }
 0x45b   : > { %7997 = vst [vmem:[#allocation23_spill] sm:$0xff] %v6839_v59  ;;  %v6841_v34 = vpop.f32.mrb[82].mxu1 }
 0x45c   : > { %7998 = vst [vmem:[#allocation17_spill] sm:$0xff] %v6841_v34  ;;  %v6843_v61 = vpop.f32.mrb[83].mxu1 }
 0x45d   : > { %7999 = vst [vmem:[#allocation18_spill] sm:$0xff] %v6843_v61 }
 0x461   : > { %4828 = vmatpush3.bf16.xpose.msra.mxu1 %v2994_v43 }
 0x463   : > { %v6846_v35 = vpop.f32.mrb[84].mxu1 }
 0x464   : > { %8000 = vst [vmem:[#allocation24_spill] sm:$0xff] %v6846_v35  ;;  %v6848_v52 = vpop.f32.mrb[85].mxu1 }
 0x465   : > { %8001 = vst [vmem:[#allocation19_spill] sm:$0xff] %v6848_v52  ;;  %v6850_v12 = vpop.f32.mrb[86].mxu1 }
 0x466   : > { %8002 = vst [vmem:[#allocation26_spill] sm:$0xff] %v6850_v12  ;;  %v6852_v51 = vpop.f32.mrb[87].mxu1 }
 0x467   : > { %8003 = vst [vmem:[#allocation20_spill] sm:$0xff] %v6852_v51 }
 0x469   : > { %v2648_v18 = vpop.xlane.xlu1 %2647 }
 0x46a   : > { %v2664_v23 = vsub.f32 %v6652_v27, %v2648_v18 }
 0x46b   : > { %v6854_v28 = vpop.f32.mrb[88].mxu1 }
 0x46c   : > { %8004 = vst [vmem:[#allocation27_spill] sm:$0xff] %v6854_v28  ;;  %v6856_v25 = vpop.f32.mrb[89].mxu1  ;;  %v2663_v28 = vsub.f32 %v6638_v63, %v2646_v10  ;;  %v2695_v1 = vmul.f32 1.442695, %v2664_v23 }
 0x46d   : > { %8005 = vst [vmem:[#allocation21_spill] sm:$0xff] %v6856_v25  ;;  %v6858_v13 = vpop.f32.mrb[90].mxu1  ;;  %v2689_v25 = vmul.f32 1.442695, %v2661_v19  ;;  %v2917_v19 = vpop.permute.xlu1 %2916 }
 0x46e   : > { %8006 = vst [vmem:[#allocation28_spill] sm:$0xff] %v6858_v13  ;;  %v6860_v36 = vpop.f32.mrb[91].mxu1  ;;  %v2693_v35 = vmul.f32 1.442695, %v2663_v28 }
 0x46f   : > { %8007 = vst [vmem:[#allocation29_spill] sm:$0xff] %v6860_v36  ;;  %5269 = vpow2.f32 %v2689_v25 }
 0x470   : > { %5271 = vpow2.f32 %v2695_v1 }
 0x473   : > { %v6862_v41 = vpop.f32.mrb[92].mxu1 }
 0x474   : > { %8008 = vst [vmem:[#allocation36_spill] sm:$0xff] %v6862_v41  ;;  %v6865_v29 = vpop.f32.mrb[93].mxu1 }
 0x475   : > { %8009 = vst [vmem:[#allocation37_spill] sm:$0xff] %v6865_v29  ;;  %v6868_v54 = vpop.f32.mrb[94].mxu1 }
 0x476   : > { %8010 = vst [vmem:[#allocation38_spill] sm:$0xff] %v6868_v54  ;;  %v6870_v43 = vpop.f32.mrb[95].mxu1 }
 0x477   : > { %8011 = vst [vmem:[#allocation39_spill] sm:$0xff] %v6870_v43 }
 0x479   : > { %v6877_v10 = vpop.eup %5269 }
 0x47a   : > { %v2644_v13 = vpop.xlane.xlu0 %2643  ;;  %8012 = vst [vmem:[#allocation40_spill] sm:$0xff] %v6877_v10  ;;  %v6880_v28 = vpop.eup %5271 }
 0x47b   : > { %v2662_v36 = vsub.f32 %v6659_v46, %v2644_v13 }
 0x47d   : > { %v2691_v41 = vmul.f32 1.442695, %v2662_v36 }
 0x47e   : > { %v2951_v20 = vpop.permute.xlu0 %2950 }
 0x47f   : > { %5273 = vpow2.f32 %v2691_v41  ;;  %4911 = vmatprep.subr.msk.bf16.mxu1 %vm1490_vm0, %v2951_v20  ;;  %v2997_v27 = vsel %vm1490_vm0, %v2951_v20, 0  ;;  %v2927_v20 = vpop.permute.xlu1 %2926 }
 0x480   : > { %5275 = vpow2.f32 %v2693_v35  ;;  %4830 = vmatpush3.bf16.xpose.msra.mxu1 %v2997_v27 }
 0x482   : > { %v2953_v6 = vpop.permute.xlu0 %2952 }
 0x483   : > { %4912 = vmatprep.subr.msk.bf16.mxu1 %vm1490_vm0, %v2953_v6  ;;  %v3000_v46 = vsel %vm1490_vm0, %v2953_v6, 0 }
 0x486   : > { %v2915_v63 = vpop.permute.xlu0 %2914 }
 0x488   : > { %4832 = vmatpush3.bf16.xpose.msra.mxu1 %v3000_v46  ;;  %v3246_v46 = vpop.permute.xlu1 %3245 }
 0x489   : > { %v6882_v1 = vpop.eup %5273 }
 0x48a   : > { %v6884_v25 = vpop.eup %5275  ;;  %v2919_v13 = vpop.permute.xlu0 %2918  ;;  %v2751_v35 = vpack.c.bf16 %v6882_v1, %v6877_v10 }
 0x48b   : > { %8013 = vst [vmem:[#allocation41_spill] sm:$0xff] %v6884_v25  ;;  %v2752_v36 = vpack.c.bf16 %v6880_v28, %v6884_v25 }
 0x48c   : > { %4813 = vmatprep.mubr.bf16.mxu1 %v2751_v35 }
 0x48d   : > { %4814 = vmatmul.mubr.bf16.gmra.mrb[124].mxu1 %v2752_v36  ;;  %v3254_v36 = vpop.permute.xlu1 %3253 }
 0x48e   : > { %4833 = vmatprep.mubr.msk.bf16.mxu1 %vm1490_vm0, %v2915_v63  ;;  %v2921_v18 = vpop.permute.xlu0 %2920 }
 0x492   : > { %v2923_v41 = vpop.permute.xlu0 %2922 }
 0x495   : > { %4834 = vmatmul.mubr.msk.bf16.vlgmr.msra.gmra.mrb[128].mxu1 %vm1490_vm0, %v2917_v19 }
 0x496   : > { %4837 = vmatprep.mubr.msk.bf16.mxu1 %vm1490_vm0, %v2919_v13  ;;  %v2925_v23 = vpop.permute.xlu0 %2924 }
 0x49a   : > { %v2929_v27 = vpop.permute.xlu0 %2928 }
 0x49d   : > { %4838 = vmatmul.mubr.msk.bf16.gmra.mrb[132].mxu1 %vm1490_vm0, %v2921_v18 }
 0x49e   : > { %4841 = vmatprep.mubr.msk.bf16.mxu1 %vm1490_vm0, %v2923_v41  ;;  %v3244_v6 = vpop.permute.xlu0 %3243 }
 0x49f   : > { %4849 = vmatprep.subr.bf16.mxu0 %v3244_v6 }
 0x4a0   : > { %4850 = vmatpush3.bf16.msra.mxu0 %v3244_v6 }
 0x4a1   : > { %4851 = vmatprep.subr.bf16.mxu0 %v3246_v46 }
 0x4a2   : > { %v3248_v63 = vpop.permute.xlu0 %3247 }
 0x4a4   : > { %4852 = vmatpush3.bf16.msra.mxu0 %v3246_v46 }
 0x4a5   : > { %4842 = vmatmul.mubr.msk.bf16.gmra.mrb[136].mxu1 %vm1490_vm0, %v2925_v23  ;;  %4853 = vmatprep.subr.bf16.mxu0 %v3248_v63 }
 0x4a6   : > { %4845 = vmatprep.mubr.msk.bf16.mxu1 %vm1490_vm0, %v2927_v20  ;;  %v3250_v13 = vpop.permute.xlu0 %3249 }
 0x4a8   : > { %4854 = vmatpush3.bf16.msra.mxu0 %v3248_v63 }
 0x4a9   : > { %4855 = vmatprep.subr.bf16.mxu0 %v3250_v13 }
 0x4aa   : > { %v3252_v35 = vpop.permute.xlu0 %3251 }
 0x4ac   : > { %4856 = vmatpush3.bf16.msra.mxu0 %v3250_v13 }
 0x4ad   : > { %4846 = vmatmul.mubr.msk.bf16.gmra.mrb[140].mxu1 %vm1490_vm0, %v2929_v27  ;;  %4857 = vmatprep.subr.bf16.mxu0 %v3252_v35 }
 0x4ae   : > { %v3256_v18 = vpop.permute.xlu0 %3255 }
 0x4b0   : > { %4858 = vmatpush3.bf16.msra.mxu0 %v3252_v35 }
 0x4b1   : > { %4859 = vmatprep.subr.bf16.mxu0 %v3254_v36 }
 0x4b4   : > { %4860 = vmatpush3.bf16.msra.mxu0 %v3254_v36 }
 0x4b5   : > { %4861 = vmatprep.subr.bf16.mxu0 %v3256_v18 }
 0x4b8   : > { %4862 = vmatpush3.bf16.msra.mxu0 %v3256_v18 }
 0x4d2   : > { %v6898_v41 = vpop.f32.mrb[96].mxu1 }
 0x4d3   : > { %v6900_v19 = vpop.f32.mrb[97].mxu1 }
 0x4d4   : > { %v6902_v23 = vpop.f32.mrb[98].mxu1 }
 0x4d5   : > { %v6904_v20 = vpop.f32.mrb[99].mxu1 }
 0x4da   : > { %v6906_v6 = vpop.f32.mrb[100].mxu1 }
 0x4db   : > { %8014 = vst [vmem:[#allocation42_spill] sm:$0xff] %v6906_v6  ;;  %v6908_v46 = vpop.f32.mrb[101].mxu1 }
 0x4dc   : > { %v6910_v27 = vpop.f32.mrb[102].mxu1 }
 0x4dd   : > { %8015 = vst [vmem:[#allocation43_spill] sm:$0xff] %v6910_v27  ;;  %v6912_v63 = vpop.f32.mrb[103].mxu1 }
 0x4de   : > { %8016 = vst [vmem:[#allocation44_spill] sm:$0xff] %v6912_v63 }
 0x4e2   : > { %v6914_v13 = vpop.f32.mrb[104].mxu1 }
 0x4e3   : > { %8017 = vst [vmem:[#allocation45_spill] sm:$0xff] %v6914_v13  ;;  %v6916_v35 = vpop.f32.mrb[105].mxu1 }
 0x4e4   : > { %8018 = vst [vmem:[#allocation46_spill] sm:$0xff] %v6916_v35  ;;  %v6918_v36 = vpop.f32.mrb[106].mxu1 }
 0x4e5   : > { %8019 = vst [vmem:[#allocation47_spill] sm:$0xff] %v6918_v36  ;;  %v6920_v18 = vpop.f32.mrb[107].mxu1 }
 0x4e6   : > { %8020 = vst [vmem:[#allocation48_spill] sm:$0xff] %v6920_v18 }
 0x4ea   : > { %v6922_v54 = vpop.f32.mrb[108].mxu1 }
 0x4eb   : > { %8021 = vst [vmem:[#allocation49_spill] sm:$0xff] %v6922_v54  ;;  %v6924_v43 = vpop.f32.mrb[109].mxu1 }
 0x4ec   : > { %8022 = vst [vmem:[#allocation50_spill] sm:$0xff] %v6924_v43  ;;  %v6926_v29 = vpop.f32.mrb[110].mxu1 }
 0x4ed   : > { %8023 = vst [vmem:[#allocation51_spill] sm:$0xff] %v6926_v29  ;;  %v6928_v25 = vpop.f32.mrb[111].mxu1 }
 0x4ee   : > { %8024 = vst [vmem:[#allocation52_spill] sm:$0xff] %v6928_v25 }
 0x50b   : > { %v6930_v10 = vpop.f32.mrb[112].mxu1 }
 0x50c   : > { %8025 = vst [vmem:[#allocation53_spill] sm:$0xff] %v6930_v10  ;;  %v6932_v12 = vpop.f32.mrb[113].mxu1 }
 0x50d   : > { %8026 = vst [vmem:[#allocation54_spill] sm:$0xff] %v6932_v12  ;;  %v6934_v52 = vpop.f32.mrb[114].mxu1 }
 0x50e   : > { %8027 = vst [vmem:[#allocation55_spill] sm:$0xff] %v6934_v52  ;;  %v6936_v51 = vpop.f32.mrb[115].mxu1 }
 0x50f   : > { %8028 = vst [vmem:[#allocation56_spill] sm:$0xff] %v6936_v51 }
 0x517   : > { %v6938_v8 = vpop.f32.mrb[116].mxu1 }
 0x518   : > { %8029 = vst [vmem:[#allocation57_spill] sm:$0xff] %v6938_v8  ;;  %v6940_v34 = vpop.f32.mrb[117].mxu1 }
 0x519   : > { %8030 = vst [vmem:[#allocation58_spill] sm:$0xff] %v6940_v34  ;;  %v6942_v21 = vpop.f32.mrb[118].mxu1 }
 0x51a   : > { %8031 = vst [vmem:[#allocation59_spill] sm:$0xff] %v6942_v21  ;;  %v6944_v59 = vpop.f32.mrb[119].mxu1  ;;  %v6963_v21 = vld [vmem:[%s6356_s15] ss:$0 sm:$0xff] }
 0x51b   : > { %8032 = vst [vmem:[#allocation60_spill] sm:$0xff] %v6944_v59 }
 0x51f   : > { %v6946_v61 = vpop.f32.mrb[120].mxu1 }
 0x520   : > { %8033 = vst [vmem:[#allocation61_spill] sm:$0xff] %v6946_v61  ;;  %v6948_v29 = vpop.f32.mrb[121].mxu1 }
 0x521   : > { %8034 = vst [vmem:[#allocation62_spill] sm:$0xff] %v6948_v29  ;;  %v6950_v10 = vpop.f32.mrb[122].mxu1 }
 0x522   : > { %8035 = vst [vmem:[#allocation63_spill] sm:$0xff] %v6950_v10  ;;  %v6952_v12 = vpop.f32.mrb[123].mxu1 }
 0x523   : > { %8036 = vst [vmem:[#allocation64_spill] sm:$0xff] %v6952_v12 }
 0x560   : > { %v6954_v54 = vpop.f32.mrb[124].mxu1 }
 0x561   : > { %8037 = vst [vmem:[#allocation65_spill] sm:$0xff] %v6954_v54  ;;  %v6956_v52 = vpop.f32.mrb[125].mxu1 }
 0x562   : > { %8038 = vst [vmem:[#allocation66_spill] sm:$0xff] %v6956_v52  ;;  %v6958_v51 = vpop.f32.mrb[126].mxu1 }
 0x563   : > { %8039 = vst [vmem:[#allocation67_spill] sm:$0xff] %v6958_v51  ;;  %v6960_v8 = vpop.f32.mrb[127].mxu1 }
 0x564   : > { %8040 = vst [vmem:[#allocation68_spill] sm:$0xff] %v6960_v8 }
 0x568   : > { %v4835_v34 = vpop.f32.mrb[128].mxu1 }
 0x569   : > { %v6966_v59 = vadd.f32 %v6963_v21, %v4835_v34  ;;  %v3036_v61 = vpop.f32.mrb[129].mxu1 }
 0x56a   : > { %v4836_v29 = vpop.f32.mrb[130].mxu1  ;;  %v6973_v54 = vadd.f32 %v6963_v21, %v3036_v61 }
 0x56b   : > { %3103 = vmax.xlane.f32.xlu1 %v6966_v59  ;;  %v3039_v10 = vpop.f32.mrb[131].mxu1  ;;  %v6978_v52 = vadd.f32 %v6963_v21, %v4836_v29 }
 0x56c   : > { %v6970_v12 = vadd.f32 %v6963_v21, %v3039_v10 }
 0x56e   : > { %3101 = vmax.xlane.f32.xlu0 %v6970_v12 }
 0x56f   : > { %3099 = vmax.xlane.f32.xlu1 %v6973_v54 }
 0x570   : > { %v4839_v51 = vpop.f32.mrb[132].mxu1 }
 0x571   : > { %v3052_v34 = vpop.f32.mrb[133].mxu1  ;;  %v6985_v10 = vadd.f32 %v6963_v21, %v4839_v51 }
 0x572   : > { %v4840_v8 = vpop.f32.mrb[134].mxu1  ;;  %v6990_v36 = vadd.f32 %v6963_v21, %v3052_v34 }
 0x573   : > { %3105 = vmax.xlane.f32.xlu1 %v6978_v52  ;;  %v3055_v25 = vpop.f32.mrb[135].mxu1  ;;  %v6994_v35 = vadd.f32 %v6963_v21, %v4840_v8 }
 0x574   : > { %v6982_v43 = vadd.f32 %v6963_v21, %v3055_v25 }
 0x576   : > { %3109 = vmax.xlane.f32.xlu0 %v6982_v43 }
 0x577   : > { %3111 = vmax.xlane.f32.xlu1 %v6985_v10 }
 0x578   : > { %v4843_v61 = vpop.f32.mrb[136].mxu1 }
 0x579   : > { %v3068_v29 = vpop.f32.mrb[137].mxu1 }
 0x57a   : > { %v4844_v13 = vpop.f32.mrb[138].mxu1  ;;  %v6998_v25 = vadd.f32 %v6963_v21, %v3068_v29 }
 0x57b   : > { %3107 = vmax.xlane.f32.xlu1 %v6990_v36  ;;  %v3071_v18 = vpop.f32.mrb[139].mxu1  ;;  %v7002_v63 = vadd.f32 %v6963_v21, %v4844_v13 }
 0x57c   : > { %v7016_v8 = vadd.f32 %v6963_v21, %v3071_v18 }
 0x57f   : > { %3113 = vmax.xlane.f32.xlu1 %v6994_v35 }
 0x580   : > { %v4847_v51 = vpop.f32.mrb[140].mxu1 }
 0x581   : > { %v3084_v27 = vpop.f32.mrb[141].mxu1 }
 0x582   : > { %v4848_v6 = vpop.f32.mrb[142].mxu1 }
 0x583   : > { %3115 = vmax.xlane.f32.xlu1 %v6998_v25  ;;  %v3087_v34 = vpop.f32.mrb[143].mxu1 }
 0x587   : > { %3121 = vmax.xlane.f32.xlu1 %v7002_v63 }
 0x58b   : > { %2200 = vadd.xlane.f32.xlu1 %v6683_v14  ;;  %v7026_v14 = vadd.f32 %v6963_v21, %v3084_v27 }
 0x58c   : > { %3257 = vrot.lane.b32.xlu0 %v7988_v44, %s5637_s10 }
 0x58f   : > { %2204 = vadd.xlane.f32.xlu1 %v6681_v58  ;;  %v7021_v58 = vadd.f32 %v6963_v21, %v4843_v61 }
 0x593   : > { %2208 = vadd.xlane.f32.xlu1 %v6693_v42  ;;  %v7031_v42 = vadd.f32 %v6963_v21, %v4847_v51 }
 0x597   : > { %2212 = vadd.xlane.f32.xlu1 %v6703_v22 }
 0x59b   : > { %2216 = vadd.xlane.f32.xlu1 %v6715_v24 }
 0x59f   : > { %2220 = vadd.xlane.f32.xlu1 %v6724_v17 }
 0x5a3   : > { %2224 = vadd.xlane.f32.xlu1 %v6735_v16 }
 0x5a7   : > { %2228 = vadd.xlane.f32.xlu1 %v6745_v4 }
 0x5ab   : > { %3117 = vmax.xlane.f32.xlu0 %v7016_v8  ;;  %2699 = vadd.xlane.f32.xlu1 %v6787_v0 }
 0x5af   : > { %3119 = vmax.xlane.f32.xlu0 %v7021_v58  ;;  %1718 = vadd.xlane.f32.xlu1 %v6517_v31  ;;  %v7044_v31 = vadd.f32 %v6963_v21, %v4848_v6 }
 0x5b3   : > { %2703 = vadd.xlane.f32.xlu1 %v6780_v38  ;;  %3123 = vmax.xlane.f32.xlu0 %v7026_v14 }
 0x5b7   : > { %1722 = vadd.xlane.f32.xlu1 %v6527_v55  ;;  %3127 = vmax.xlane.f32.xlu0 %v7031_v42  ;;  %v7049_v55 = vadd.f32 %v6963_v21, %v3087_v34  ;;  %v8041_v21 = vld [vmem:[#allocation32_spill] sm:$0xff] }
 0x5bb   : > { %2707 = vadd.xlane.f32.xlu1 %v6806_v53  ;;  %2198 = vadd.xlane.f32.xlu0 %v6677_v56 }
 0x5bf   : > { %1726 = vadd.xlane.f32.xlu1 %v6541_v40  ;;  %2202 = vadd.xlane.f32.xlu0 %v6685_v32 }
 0x5c3   : > { %2711 = vadd.xlane.f32.xlu1 %v6804_v5  ;;  %2206 = vadd.xlane.f32.xlu0 %v6691_v62 }
 0x5c7   : > { %1730 = vadd.xlane.f32.xlu1 %v6539_v37  ;;  %2210 = vadd.xlane.f32.xlu0 %v6707_v9 }
 0x5cb   : > { %3129 = vmax.xlane.f32.xlu1 %v7044_v31  ;;  %2214 = vadd.xlane.f32.xlu0 %v6713_v48 }
 0x5cf   : > { %3125 = vmax.xlane.f32.xlu1 %v7049_v55  ;;  %2218 = vadd.xlane.f32.xlu0 %v6719_v39 }
 0x5d3   : > { %2222 = vadd.xlane.f32.xlu0 %v6733_v47 }
 0x5d7   : > { %2226 = vadd.xlane.f32.xlu0 %v6742_v49 }
 0x5db   : > { %2697 = vadd.xlane.f32.xlu0 %v6783_v26 }
 0x5df   : > { %1716 = vadd.xlane.f32.xlu0 %v6519_v15 }
 0x5e3   : > { %2701 = vadd.xlane.f32.xlu0 %v6789_v57 }
 0x5e7   : > { %1720 = vadd.xlane.f32.xlu0 %v6525_v45 }
 0x5eb   : > { %2705 = vadd.xlane.f32.xlu0 %v6802_v30 }
 0x5ef   : > { %1724 = vadd.xlane.f32.xlu0 %v6536_v60 }
 0x5f3   : > { %2709 = vadd.xlane.f32.xlu0 %v6810_v2 }
 0x5f7   : > { %1728 = vadd.xlane.f32.xlu0 %v6549_v33 }
 0x5f8   : > { %v3104_v37 = vpop.xlane.xlu1 %3103 }
 0x5f9   : > { %v3133_v56 = vsub.f32 %v6966_v59, %v3104_v37 }
 0x5fb   : > { %2715 = vadd.xlane.f32.xlu0 %v6820_v7  ;;  %v3102_v40 = vpop.xlane.xlu0 %3101  ;;  %v3151_v60 = vmul.f32 1.442695, %v3133_v56 }
 0x5fc   : > { %v3132_v15 = vsub.f32 %v6970_v12, %v3102_v40  ;;  %v3100_v32 = vpop.xlane.xlu1 %3099 }
 0x5fd   : > { %v3131_v62 = vsub.f32 %v6973_v54, %v3100_v32 }
 0x5fe   : > { %v3149_v45 = vmul.f32 1.442695, %v3132_v15 }
 0x5ff   : > { %v3147_v22 = vmul.f32 1.442695, %v3131_v62  ;;  %1732 = vadd.xlane.f32.xlu0 %v6558_v3 }
 0x600   : > { %5277 = vpow2.f32 %v3149_v45  ;;  %v3106_v9 = vpop.xlane.xlu1 %3105 }
 0x601   : > { %5279 = vpow2.f32 %v3147_v22  ;;  %v3134_v33 = vsub.f32 %v6978_v52, %v3106_v9 }
 0x602   : > { %5281 = vpow2.f32 %v3151_v60 }
 0x603   : > { %v3153_v48 = vmul.f32 1.442695, %v3134_v33  ;;  %2719 = vadd.xlane.f32.xlu0 %v6826_v11  ;;  %v3110_v24 = vpop.xlane.xlu0 %3109 }
 0x604   : > { %v3136_v39 = vsub.f32 %v6982_v43, %v3110_v24  ;;  %v3112_v17 = vpop.xlane.xlu1 %3111 }
 0x605   : > { %5283 = vpow2.f32 %v3153_v48  ;;  %v3137_v3 = vsub.f32 %v6985_v10, %v3112_v17 }
 0x606   : > { %v3157_v16 = vmul.f32 1.442695, %v3136_v39 }
 0x607   : > { %1736 = vadd.xlane.f32.xlu0 %v6576_v50  ;;  %v3258_v47 = vpop.permute.xlu0 %3257  ;;  %v3159_v0 = vmul.f32 1.442695, %v3137_v3 }
 0x608   : > { %v3108_v49 = vpop.xlane.xlu1 %3107  ;;  %4863 = vmatprep.subr.bf16.mxu0 %v3258_v47  ;;  %5285 = vpow2.f32 %v3157_v16 }
 0x609   : > { %v3135_v4 = vsub.f32 %v6990_v36, %v3108_v49  ;;  %4864 = vmatpush3.bf16.msra.mxu0 %v3258_v47 }
 0x60a   : > { %v7074_v44 = vpop.eup %5277 }
 0x60b   : > { %v5280_v38 = vpop.eup %5279  ;;  %v3155_v26 = vmul.f32 1.442695, %v3135_v4  ;;  %2723 = vadd.xlane.f32.xlu0 %v6882_v1 }
 0x60c   : > { %v3114_v57 = vpop.xlane.xlu1 %3113  ;;  %v3227_v50 = vpack.c.bf16 %v7074_v44, %v5280_v38  ;;  %v5282_v5 = vpop.eup %5281 }
 0x60d   : > { %5287 = vpow2.f32 %v3155_v26  ;;  %v3138_v30 = vsub.f32 %v6994_v35, %v3114_v57 }
 0x60e   : > { %4865 = vmatprep.mubr.bf16.mxu0 %v3227_v50  ;;  %5289 = vpow2.f32 %v3159_v0 }
 0x60f   : > { %v7079_v53 = vpop.eup %5283  ;;  %v3161_v2 = vmul.f32 1.442695, %v3138_v30  ;;  %1740 = vadd.xlane.f32.xlu0 %v8041_v21 }
 0x610   : > { %v3116_v7 = vpop.xlane.xlu1 %3115  ;;  %v3228_v11 = vpack.c.bf16 %v7079_v53, %v5282_v5 }
 0x611   : > { %5291 = vpow2.f32 %v3161_v2  ;;  %v3139_v29 = vsub.f32 %v6998_v25, %v3116_v7 }
 0x612   : > { %4866 = vmatmul.mubr.bf16.vlgmr.msra.gmra.mrb[64].mxu0 %v3228_v11  ;;  %v7083_v52 = vpop.eup %5285 }
 0x613   : > { %3183 = vadd.xlane.f32.xlu0 %v5282_v5  ;;  %v3163_v34 = vmul.f32 1.442695, %v3139_v29 }
 0x614   : > { %v3122_v59 = vpop.xlane.xlu1 %3121 }
 0x615   : > { %v3142_v37 = vsub.f32 %v7002_v63, %v3122_v59  ;;  %5293 = vpow2.f32 %v3163_v34 }
 0x617   : > { %v5288_v12 = vpop.eup %5287  ;;  %3179 = vadd.xlane.f32.xlu0 %v5280_v38  ;;  %v3169_v62 = vmul.f32 1.442695, %v3142_v37 }
 0x618   : > { %v2201_v54 = vpop.xlane.xlu1 %2200  ;;  %v3229_v43 = vpack.c.bf16 %v7083_v52, %v5288_v12  ;;  %v5290_v1 = vpop.eup %5289 }
 0x61a   : > { %4869 = vmatprep.mubr.bf16.mxu0 %v3229_v43 }
 0x61b   : > { %v7086_v6 = vpop.eup %5291  ;;  %3191 = vadd.xlane.f32.xlu0 %v5290_v1 }
 0x61c   : > { %v2205_v27 = vpop.xlane.xlu1 %2204  ;;  %v3230_v13 = vpack.c.bf16 %v7086_v6, %v5290_v1 }
 0x61e   : > { %4870 = vmatmul.mubr.bf16.gmra.mrb[68].mxu0 %v3230_v13 }
 0x61f   : > { %3187 = vadd.xlane.f32.xlu0 %v5288_v12  ;;  %v5294_v39 = vpop.eup %5293 }
 0x620   : > { %v2209_v35 = vpop.xlane.xlu1 %2208 }
 0x624   : > { %v2213_v36 = vpop.xlane.xlu1 %2212 }
 0x628   : > { %v7089_v18 = vpop.xlane.xlu1 %2216 }
 0x62c   : > { %v7091_v10 = vpop.xlane.xlu1 %2220 }
 0x630   : > { %v7093_v61 = vpop.xlane.xlu1 %2224 }
 0x634   : > { %v7096_v51 = vpop.xlane.xlu1 %2228 }
 0x638   : > { %v7099_v40 = vpop.xlane.xlu1 %2699  ;;  %v3118_v56 = vpop.xlane.xlu0 %3117 }
 0x639   : > { %v3140_v15 = vsub.f32 %v7016_v8, %v3118_v56 }
 0x63b   : > { %v3165_v32 = vmul.f32 1.442695, %v3140_v15 }
 0x63c   : > { %v7102_v45 = vpop.xlane.xlu1 %1718  ;;  %v3120_v22 = vpop.xlane.xlu0 %3119 }
 0x63d   : > { %5295 = vpow2.f32 %v3165_v32  ;;  %v3141_v60 = vsub.f32 %v7021_v58, %v3120_v22 }
 0x63e   : > { %5297 = vpow2.f32 %v3169_v62 }
 0x63f   : > { %v3167_v25 = vmul.f32 1.442695, %v3141_v60 }
 0x640   : > { %v7105_v9 = vpop.xlane.xlu1 %2703  ;;  %v3124_v33 = vpop.xlane.xlu0 %3123 }
 0x641   : > { %5299 = vpow2.f32 %v3167_v25  ;;  %v3143_v8 = vsub.f32 %v7026_v14, %v3124_v33 }
 0x642   : > { %5301 = vrcp.f32 %v2201_v54 }
 0x643   : > { %v3171_v49 = vmul.f32 1.442695, %v3143_v8  ;;  %v8045_v8 = vld [vmem:[#allocation46_spill] sm:$0xff] }
 0x644   : > { %v7107_v63 = vpop.xlane.xlu1 %1722  ;;  %v3128_v48 = vpop.xlane.xlu0 %3127 }
 0x645   : > { %v3145_v24 = vsub.f32 %v7031_v42, %v3128_v48 }
 0x647   : > { %v7111_v17 = vpop.eup %5295  ;;  %v3175_v47 = vmul.f32 1.442695, %v3145_v24 }
 0x648   : > { %v7113_v16 = vpop.xlane.xlu1 %2707  ;;  %v2199_v58 = vpop.xlane.xlu0 %2198  ;;  %v3231_v3 = vpack.c.bf16 %v7111_v17, %v5294_v39 }
 0x649   : > { %5303 = vpow2.f32 %v3175_v47  ;;  %v7116_v4 = vpop.eup %5297 }
 0x64a   : > { %4873 = vmatprep.mubr.bf16.mxu0 %v3231_v3  ;;  %5305 = vrcp.f32 %v2199_v58 }
 0x64b   : > { %v5300_v38 = vpop.eup %5299  ;;  %5307 = vrcp.f32 %v2205_v27 }
 0x64c   : > { %v7118_v14 = vpop.xlane.xlu1 %1726  ;;  %3199 = vadd.xlane.f32.xlu0 %v5300_v38  ;;  %v2203_v42 = vpop.xlane.xlu0 %2202  ;;  %v3232_v26 = vpack.c.bf16 %v7116_v4, %v5300_v38  ;;  %5309 = vpow2.f32 %v3171_v49 }
 0x64d   : > { %5311 = vrcp.f32 %v2203_v42  ;;  %v5302_v50 = vpop.eup %5301  ;;  %v8047_v42 = vld [vmem:[#allocation45_spill] sm:$0xff] }
 0x64e   : > { %4874 = vmatmul.mubr.bf16.gmra.mrb[72].mxu0 %v3232_v26  ;;  %5313 = vrcp.f32 %v2209_v35  ;;  %v2384_v59 = vmul.f32 %v5302_v50, %v6904_v20 }
 0x650   : > { %v7121_v0 = vpop.xlane.xlu1 %2711  ;;  %3195 = vadd.xlane.f32.xlu0 %v5294_v39  ;;  %v2207_v57 = vpop.xlane.xlu0 %2206  ;;  %v8046_v39 = vld [vmem:[#allocation48_spill] sm:$0xff] }
 0x651   : > { %5315 = vrcp.f32 %v2207_v57  ;;  %v8048_v57 = vld [vmem:[#allocation47_spill] sm:$0xff] }
 0x652   : > { %5317 = vrcp.f32 %v2213_v36 }
 0x653   : > { %v7123_v30 = vpop.eup %5303 }
 0x654   : > { %v7125_v5 = vpop.xlane.xlu1 %1730  ;;  %3207 = vadd.xlane.f32.xlu0 %v7123_v30  ;;  %v2211_v2 = vpop.xlane.xlu0 %2210 }
 0x655   : > { %v5306_v21 = vpop.eup %5305  ;;  %5319 = vrcp.f32 %v2211_v2 }
 0x656   : > { %v5308_v7 = vpop.eup %5307  ;;  %v2383_v11 = vmul.f32 %v5306_v21, %v6900_v19  ;;  %5321 = vrcp.f32 %v7089_v18 }
 0x657   : > { %v7130_v12 = vpop.eup %5309  ;;  %v7139_v19 = vmul.f32 %v5308_v7, %v6902_v23  ;;  %v8042_v23 = vld [vmem:[#allocation44_spill] sm:$0xff] }
 0x658   : > { %v5312_v54 = vpop.eup %5311  ;;  %v3130_v43 = vpop.xlane.xlu1 %3129  ;;  %3203 = vadd.xlane.f32.xlu0 %v7130_v12  ;;  %v2399_v1 = vpack.c.bf16 %v2384_v59, %v2383_v11 }
 0x659   : > { %v2215_v27 = vpop.xlane.xlu0 %2214  ;;  %v3146_v13 = vsub.f32 %v7044_v31, %v3130_v43  ;;  %v7136_v35 = vmul.f32 %v5312_v54, %v6898_v41  ;;  %v5314_v20 = vpop.eup %5313 }
 0x65a   : > { %5323 = vrcp.f32 %v2215_v27  ;;  %2415 = vrot.lane.b32.xlu1 %v2399_v1, %s5637_s10  ;;  %v7151_v56 = vmul.f32 %v5314_v20, %v8042_v23  ;;  %v8049_v1 = vld [vmem:[#allocation50_spill] sm:$0xff] }
 0x65b   : > { %v2400_v36 = vpack.c.bf16 %v7139_v19, %v7136_v35  ;;  %v5316_v18 = vpop.eup %5315  ;;  %5325 = vrcp.f32 %v7091_v10  ;;  %v3177_v29 = vmul.f32 1.442695, %v3146_v13  ;;  %v8050_v13 = vld [vmem:[#allocation52_spill] sm:$0xff] }
 0x65c   : > { %v3126_v34 = vpop.xlane.xlu1 %3125  ;;  %2727 = vadd.xlane.f32.xlu0 %v6880_v28  ;;  %v7148_v37 = vmul.f32 %v5316_v18, %v6908_v46  ;;  %v5318_v15 = vpop.eup %5317  ;;  %v8044_v46 = vld [vmem:[#allocation43_spill] sm:$0xff] }
 0x65d   : > { %v2219_v31 = vpop.xlane.xlu0 %2218  ;;  %v3144_v41 = vsub.f32 %v7049_v55, %v3126_v34  ;;  %v8043_v55 = vld [vmem:[#allocation42_spill] sm:$0xff]  ;;  %v7160_v25 = vmul.f32 %v5318_v15, %v8044_v46 }
 0x65e   : > { %5327 = vrcp.f32 %v2219_v31  ;;  %v2401_v10 = vpack.c.bf16 %v7151_v56, %v7148_v37  ;;  %v8052_v31 = vld [vmem:[#allocation51_spill] sm:$0xff]  ;;  %v8074_v56 = vld [vmem:[#allocation33_spill] sm:$0xff] }
 0x65f   : > { %5329 = vrcp.f32 %v7093_v61  ;;  %v3173_v32 = vmul.f32 1.442695, %v3144_v41  ;;  %v5320_v62 = vpop.eup %5319 }
 0x660   : > { %5331 = vpow2.f32 %v3177_v29  ;;  %v5322_v22 = vpop.eup %5321  ;;  %v7157_v60 = vmul.f32 %v5320_v62, %v8043_v55  ;;  %v8051_v29 = vld [vmem:[#allocation49_spill] sm:$0xff]  ;;  %v8054_v62 = vld [vmem:[#allocation54_spill] sm:$0xff] }
 0x661   : > { %v2223_v28 = vpop.xlane.xlu0 %2222  ;;  %5333 = vpow2.f32 %v3173_v32  ;;  %v7169_v47 = vmul.f32 %v5322_v22, %v8046_v39  ;;  %v8056_v39 = vld [vmem:[#allocation23_spill] sm:$0xff] }
 0x662   : > { %5335 = vrcp.f32 %v2223_v28  ;;  %v2402_v61 = vpack.c.bf16 %v7160_v25, %v7157_v60 }
 0x663   : > { %5337 = vrcp.f32 %v7096_v51 }
 0x664   : > { %v5324_v33 = vpop.eup %5323 }
 0x665   : > { %v2227_v48 = vpop.xlane.xlu0 %2226  ;;  %v7166_v24 = vmul.f32 %v5324_v33, %v8045_v8  ;;  %v5326_v58 = vpop.eup %5325 }
 0x666   : > { %5339 = vrcp.f32 %v2227_v48  ;;  %v7178_v50 = vmul.f32 %v5326_v58, %v8048_v57  ;;  %v8055_v48 = vld [vmem:[#allocation18_spill] sm:$0xff] }
 0x667   : > { %v2403_v3 = vpack.c.bf16 %v7169_v47, %v7166_v24  ;;  %5341 = vrcp.f32 %v7099_v40  ;;  %v5157_v24 = vld [vmem:[#allocation9 + $0x80] ss:$8 sps:$4 sm:$0xff]   ;;  %v5162_v47 = vld [vmem:[#allocation9 + $0x94] ss:$8 sps:$4 sm:$0xff]  }
 0x668   : > { %v5328_v49 = vpop.eup %5327 }
 0x669   : > { %v2698_v38 = vpop.xlane.xlu0 %2697  ;;  %v5330_v51 = vpop.eup %5329  ;;  %v7175_v26 = vmul.f32 %v5328_v49, %v8047_v42  ;;  %v8057_v42 = vld [vmem:[#allocation55_spill] sm:$0xff] }
 0x66a   : > { %5343 = vrcp.f32 %v2698_v38  ;;  %v7180_v2 = vpop.eup %5331  ;;  %v7195_v20 = vmul.f32 %v5330_v51, %v8050_v13  ;;  %v8060_v13 = vld [vmem:[#allocation17_spill] sm:$0xff] }
 0x66b   : > { %v7182_v21 = vpop.eup %5333  ;;  %5345 = vrcp.f32 %v7102_v45  ;;  %v2404_v7 = vpack.c.bf16 %v7178_v50, %v7175_v26  ;;  %v3234_v43 = vpack.c.bf16 %v7180_v2, %v7123_v30 }
 0x66c   : > { %v5336_v40 = vpop.eup %5335  ;;  %v3233_v59 = vpack.c.bf16 %v7182_v21, %v7130_v12 }
 0x66d   : > { %v1717_v11 = vpop.xlane.xlu0 %1716  ;;  %v5338_v54 = vpop.eup %5337  ;;  %v7192_v27 = vmul.f32 %v5336_v40, %v8049_v1  ;;  %v8058_v40 = vld [vmem:[#allocation53_spill] sm:$0xff] }
 0x66e   : > { %5347 = vrcp.f32 %v1717_v11  ;;  %4877 = vmatprep.mubr.bf16.mxu0 %v3233_v59  ;;  %v7204_v30 = vmul.f32 %v5338_v54, %v8052_v31  ;;  %v8059_v54 = vld [vmem:[#allocation25_spill] sm:$0xff] }
 0x66f   : > { %5349 = vrcp.f32 %v7105_v9  ;;  %4878 = vmatmul.mubr.bf16.gmra.mrb[76].mxu0 %v3234_v43  ;;  %v2405_v18 = vpack.c.bf16 %v7195_v20, %v7192_v27  ;;  %v8053_v9 = vld [vmem:[#allocation56_spill] sm:$0xff] }
 0x670   : > { %v5340_v45 = vpop.eup %5339 }
 0x671   : > { %v2702_v12 = vpop.xlane.xlu0 %2701  ;;  %v7201_v34 = vmul.f32 %v5340_v45, %v8051_v29  ;;  %v5342_v41 = vpop.eup %5341 }
 0x672   : > { %5351 = vrcp.f32 %v2702_v12  ;;  %v2851_v32 = vmul.f32 %v5342_v41, %v8053_v9  ;;  %v8061_v12 = vld [vmem:[#allocation16_spill] sm:$0xff]  ;;  %v8062_v41 = vld [vmem:[#allocation31_spill] sm:$0xff] }
 0x673   : > { %v2406_v23 = vpack.c.bf16 %v7204_v30, %v7201_v34  ;;  %5353 = vrcp.f32 %v7107_v63 }
 0x674   : > { %v5344_v15 = vpop.eup %5343 }
 0x675   : > { %v2850_v28 = vmul.f32 %v5344_v15, %v8054_v62  ;;  %v1721_v22 = vpop.xlane.xlu0 %1720  ;;  %v5346_v55 = vpop.eup %5345 }
 0x676   : > { %5355 = vrcp.f32 %v1721_v22  ;;  %v1870_v8 = vmul.f32 %v5346_v55, %v8055_v48  ;;  %v8065_v48 = vld [vmem:[#allocation20_spill] sm:$0xff] }
 0x677   : > { %v2866_v46 = vpack.c.bf16 %v2851_v32, %v2850_v28  ;;  %5357 = vrcp.f32 %v7113_v16  ;;  %v8063_v32 = vld [vmem:[#allocation60_spill] sm:$0xff]  ;;  %v8064_v28 = vld [vmem:[#allocation58_spill] sm:$0xff] }
 0x678   : > { %v5348_v33 = vpop.eup %5347 }
 0x679   : > { %v1869_v58 = vmul.f32 %v5348_v33, %v8056_v39  ;;  %v2706_v49 = vpop.xlane.xlu0 %2705  ;;  %2874 = vst.msk [vmem:[#allocation3 + $0x8] sm:$0xff] %vm1490_vm0, %v2866_v46  ;;  %v5350_v38 = vpop.eup %5349  ;;  %v8066_v39 = vld [vmem:[#allocation19_spill] sm:$0xff] }
 0x67a   : > { %5359 = vrcp.f32 %v2706_v49  ;;  %v2853_v57 = vmul.f32 %v5350_v38, %v8057_v42  ;;  %v8068_v42 = vld [vmem:[#allocation57_spill] sm:$0xff] }
 0x67b   : > { %v1885_v63 = vpack.c.bf16 %v1870_v8, %v1869_v58  ;;  %5361 = vrcp.f32 %v7118_v14 }
 0x67c   : > { %v5352_v51 = vpop.eup %5351 }
 0x67d   : > { %v2852_v11 = vmul.f32 %v5352_v51, %v8058_v40  ;;  %v1725_v59 = vpop.xlane.xlu0 %1724  ;;  %1893 = vst.msk [vmem:[#allocation3] sm:$0xff] %vm1490_vm0, %v1885_v63  ;;  %v5354_v16 = vpop.eup %5353  ;;  %v8067_v63 = vld [vmem:[#allocation59_spill] sm:$0xff] }
 0x67e   : > { %5363 = vrcp.f32 %v1725_v59  ;;  %2713 = vadd.xlane.f32.xlu1 %v8059_v54  ;;  %v1872_v45 = vmul.f32 %v5354_v16, %v8060_v13  ;;  %v8069_v16 = vld [vmem:[#allocation26_spill] sm:$0xff] }
 0x67f   : > { %v2867_v43 = vpack.c.bf16 %v2853_v57, %v2852_v11  ;;  %5365 = vrcp.f32 %v7121_v0 }
 0x680   : > { %v5356_v1 = vpop.eup %5355 }
 0x681   : > { %v1871_v29 = vmul.f32 %v5356_v1, %v8061_v12  ;;  %v2710_v14 = vpop.xlane.xlu0 %2709  ;;  %2875 = vst.msk [vmem:[#allocation3 + $0x18] sm:$0xff] %vm1490_vm0, %v2867_v43  ;;  %v5358_v31 = vpop.eup %5357  ;;  %v8070_v43 = vld [vmem:[#allocation24_spill] sm:$0xff]  ;;  %v8072_v12 = vld [vmem:[#allocation30_spill] sm:$0xff] }
 0x682   : > { %5367 = vrcp.f32 %v2710_v14  ;;  %1734 = vadd.xlane.f32.xlu1 %v8062_v41  ;;  %v2855_v62 = vmul.f32 %v5358_v31, %v8063_v32 }
 0x683   : > { %v1886_v15 = vpack.c.bf16 %v1872_v45, %v1871_v29  ;;  %5369 = vrcp.f32 %v7125_v5  ;;  %v8071_v45 = vld [vmem:[#allocation22_spill] sm:$0xff] }
 0x684   : > { %v5360_v9 = vpop.eup %5359 }
 0x685   : > { %v2854_v22 = vmul.f32 %v5360_v9, %v8064_v28  ;;  %v1729_v0 = vpop.xlane.xlu0 %1728  ;;  %1894 = vst.msk [vmem:[#allocation3 + $0x10] sm:$0xff] %vm1490_vm0, %v1886_v15  ;;  %v5362_v55 = vpop.eup %5361 }
 0x686   : > { %5371 = vrcp.f32 %v1729_v0  ;;  %v1874_v8 = vmul.f32 %v5362_v55, %v8065_v48 }
 0x687   : > { %v2868_v46 = vpack.c.bf16 %v2855_v62, %v2854_v22  ;;  %v8076_v22 = vld [vmem:[#allocation62_spill] sm:$0xff] }
 0x688   : > { %v5364_v33 = vpop.eup %5363 }
 0x689   : > { %v1873_v58 = vmul.f32 %v5364_v33, %v8066_v39  ;;  %2876 = vst.msk [vmem:[#allocation3 + $0x28] sm:$0xff] %vm1490_vm0, %v2868_v46  ;;  %v5366_v49 = vpop.eup %5365 }
 0x68a   : > { %v2857_v51 = vmul.f32 %v5366_v49, %v8067_v63  ;;  %v5133_v63 = vld [vmem:[#allocation9] ss:$8 sps:$4 sm:$0xff]  }
 0x68b   : > { %v1887_v38 = vpack.c.bf16 %v1874_v8, %v1873_v58  ;;  %v8078_v8 = vld [vmem:[#allocation29_spill] sm:$0xff] }
 0x68c   : > { %v5368_v5 = vpop.eup %5367 }
 0x68d   : > { %v2856_v57 = vmul.f32 %v5368_v5, %v8068_v42  ;;  %1895 = vst.msk [vmem:[#allocation3 + $0x20] sm:$0xff] %vm1490_vm0, %v1887_v38  ;;  %v5370_v40 = vpop.eup %5369  ;;  %v5138_v42 = vld [vmem:[#allocation9 + $0x14] ss:$8 sps:$4 sm:$0xff]  }
 0x68e   : > { %v1876_v54 = vmul.f32 %v5370_v40, %v8069_v16 }
 0x68f   : > { %v2869_v11 = vpack.c.bf16 %v2857_v51, %v2856_v57  ;;  %v5135_v51 = vld [vmem:[#allocation9 + $0x4] ss:$8 sps:$4 sm:$0xff]  }
 0x690   : > { %v5372_v59 = vpop.eup %5371  ;;  %3648 = vmatprep.subr.bf16.mxu0 %v5135_v51  ;;  %v5159_v51 = vld [vmem:[#allocation9 + $0x84] ss:$8 sps:$4 sm:$0xff]  }
 0x691   : > { %v1875_v1 = vmul.f32 %v5372_v59, %v8070_v43  ;;  %2877 = vst.msk [vmem:[#allocation3 + $0x38] sm:$0xff] %vm1490_vm0, %v2869_v11  ;;  %3649 = vmatpush1.bf16.msra.mxu0 %v5133_v63  ;;  %v5136_v59 = vld [vmem:[#allocation9 + $0x10] ss:$8 sps:$4 sm:$0xff]  }
 0x692   : > { %3650 = vmatprep.subr.bf16.mxu0 %v5138_v42  ;;  %v5154_v63 = vld [vmem:[#allocation9 + $0x70] ss:$8 sps:$4 sm:$0xff]  }
 0x693   : > { %v1888_v13 = vpack.c.bf16 %v1876_v54, %v1875_v1  ;;  %2417 = vrot.lane.b32.xlu1 %v2400_v36, %s5637_s10  ;;  %v8073_v36 = vld [vmem:[#allocation40_spill] sm:$0xff] }
 0x694   : > { %v5160_v42 = vld [vmem:[#allocation9 + $0x90] ss:$8 sps:$4 sm:$0xff]  }
 0x695   : > { %1896 = vst.msk [vmem:[#allocation3 + $0x30] sm:$0xff] %vm1490_vm0, %v1888_v13  ;;  %3651 = vmatpush1.bf16.msra.mxu0 %v5136_v59  ;;  %v8080_v13 = vld [vmem:[#allocation34_spill] sm:$0xff] }
 0x6b7   : > { %2717 = vadd.xlane.f32.xlu1 %v8071_v45 }
 0x6bb   : > { %1738 = vadd.xlane.f32.xlu1 %v8072_v12  ;;  %v8081_v12 = vld [vmem:[#allocation63_spill] sm:$0xff] }
 0x6cc   : > { %v2416_v29 = vpop.permute.xlu1 %2415  ;;  %2419 = vrot.lane.b32.xlu1 %v2401_v10, %s5637_s10  ;;  %v2716_v10 = vpop.xlane.xlu0 %2715 }
 0x6cd   : > { %2440 = vst.msk [vmem:[#allocation3] sm:$0xff] %vm2439_vm1, %v2416_v29  ;;  %5373 = vrcp.f32 %v2716_v10 }
 0x6d0   : > { %v1733_v32 = vpop.xlane.xlu0 %1732 }
 0x6d4   : > { %v2720_v5 = vpop.xlane.xlu0 %2719 }
 0x6d7   : > { %v5374_v28 = vpop.eup %5373 }
 0x6d8   : > { %v1737_v40 = vpop.xlane.xlu0 %1736 }
 0x6e5   : > { %v7250_v14 = vpop.f32.mrb[64].mxu0 }
 0x6e6   : > { %v7252_v31 = vpop.f32.mrb[65].mxu0 }
 0x6e7   : > { %v7254_v35 = vpop.f32.mrb[66].mxu0 }
 0x6e8   : > { %v7256_v19 = vpop.f32.mrb[67].mxu0 }
 0x6f0   : > { %2721 = vadd.xlane.f32.xlu1 %v8073_v36  ;;  %v8082_v36 = vld [vmem:[#allocation61_spill] sm:$0xff] }
 0x6f1   : > { %v7259_v41 = vpop.f32.mrb[68].mxu0 }
 0x6f2   : > { %v7261_v15 = vpop.f32.mrb[69].mxu0 }
 0x6f3   : > { %v7263_v9 = vpop.f32.mrb[70].mxu0 }
 0x6f4   : > { %3185 = vadd.xlane.f32.xlu1 %v7079_v53  ;;  %v7266_v37 = vpop.f32.mrb[71].mxu0 }
 0x6f8   : > { %3181 = vadd.xlane.f32.xlu1 %v7074_v44 }
 0x6fc   : > { %1742 = vadd.xlane.f32.xlu1 %v8074_v56 }
 0x700   : > { %3193 = vadd.xlane.f32.xlu1 %v7086_v6  ;;  %v8075_v6 = vld [vmem:[#allocation64_spill] sm:$0xff] }
 0x704   : > { %3189 = vadd.xlane.f32.xlu1 %v7083_v52 }
 0x708   : > { %3201 = vadd.xlane.f32.xlu1 %v7116_v4  ;;  %v2859_v4 = vmul.f32 %v5374_v28, %v8075_v6  ;;  %v8084_v28 = vld [vmem:[#allocation28_spill] sm:$0xff] }
 0x70b   : > { %v2714_v62 = vpop.xlane.xlu1 %2713 }
 0x70c   : > { %5375 = vrcp.f32 %v2714_v62  ;;  %3197 = vadd.xlane.f32.xlu1 %v7111_v17  ;;  %v8077_v17 = vld [vmem:[#allocation21_spill] sm:$0xff] }
 0x70d   : > { %5377 = vrcp.f32 %v1733_v32 }
 0x70f   : > { %v1735_v53 = vpop.xlane.xlu1 %1734 }
 0x710   : > { %5379 = vrcp.f32 %v1735_v53  ;;  %3209 = vadd.xlane.f32.xlu1 %v7180_v2  ;;  %v8083_v53 = vld [vmem:[#allocation27_spill] sm:$0xff] }
 0x711   : > { %5381 = vrcp.f32 %v2720_v5  ;;  %v2724_v5 = vpop.xlane.xlu0 %2723 }
 0x713   : > { %v2418_v44 = vpop.permute.xlu1 %2417 }
 0x714   : > { %2441 = vst.msk [vmem:[#allocation3 + $0x10] sm:$0xff] %vm2439_vm1, %v2418_v44  ;;  %3205 = vadd.xlane.f32.xlu1 %v7182_v21 }
 0x716   : > { %v5376_v52 = vpop.eup %5375 }
 0x717   : > { %v2858_v0 = vmul.f32 %v5376_v52, %v8076_v22  ;;  %v5378_v55 = vpop.eup %5377  ;;  %v5139_v22 = vld [vmem:[#allocation9 + $0x20] ss:$8 sps:$4 sm:$0xff]  }
 0x718   : > { %v1877_v48 = vmul.f32 %v5378_v55, %v8077_v17  ;;  %v5142_v55 = vld [vmem:[#allocation9 + $0x30] ss:$8 sps:$4 sm:$0xff]   ;;  %v5150_v17 = vld [vmem:[#allocation9 + $0x54] ss:$8 sps:$4 sm:$0xff]  }
 0x719   : > { %v2870_v46 = vpack.c.bf16 %v2859_v4, %v2858_v0  ;;  %v5141_v4 = vld [vmem:[#allocation9 + $0x24] ss:$8 sps:$4 sm:$0xff]   ;;  %v5144_v0 = vld [vmem:[#allocation9 + $0x34] ss:$8 sps:$4 sm:$0xff]  }
 0x71a   : > { %v5380_v33 = vpop.eup %5379  ;;  %3652 = vmatprep.subr.bf16.mxu0 %v5141_v4 }
 0x71b   : > { %v1878_v39 = vmul.f32 %v5380_v33, %v8078_v8  ;;  %2878 = vst.msk [vmem:[#allocation3 + $0x48] sm:$0xff] %vm1490_vm0, %v2870_v46  ;;  %v5382_v1 = vpop.eup %5381  ;;  %3653 = vmatpush1.bf16.msra.mxu0 %v5139_v22  ;;  %v5147_v46 = vld [vmem:[#allocation9 + $0x44] ss:$8 sps:$4 sm:$0xff]   ;;  %v5145_v33 = vld [vmem:[#allocation9 + $0x40] ss:$8 sps:$4 sm:$0xff]  }
 0x71c   : > { %v2861_v29 = vmul.f32 %v5382_v1, %v8081_v12  ;;  %3654 = vmatprep.subr.bf16.mxu0 %v5144_v0  ;;  %v5151_v8 = vld [vmem:[#allocation9 + $0x60] ss:$8 sps:$4 sm:$0xff]  }
 0x71d   : > { %v1889_v2 = vpack.c.bf16 %v1878_v39, %v1877_v48  ;;  %v5148_v48 = vld [vmem:[#allocation9 + $0x50] ss:$8 sps:$4 sm:$0xff]   ;;  %v5153_v39 = vld [vmem:[#allocation9 + $0x64] ss:$8 sps:$4 sm:$0xff]  }
 0x71e   : > { %v8086_v22 = vld [vmem:[#allocation66_spill] sm:$0xff] }
 0x71f   : > { %1897 = vst.msk [vmem:[#allocation3 + $0x40] sm:$0xff] %vm1490_vm0, %v1889_v2  ;;  %3655 = vmatpush1.bf16.msra.mxu0 %v5142_v55  ;;  %v5156_v2 = vld [vmem:[#allocation9 + $0x74] ss:$8 sps:$4 sm:$0xff]  }
 0x720   : > { %3656 = vmatprep.subr.bf16.mxu0 %v5147_v46  ;;  %v5178_v46 = vld [vmem:[#allocation9 + $0xf0] ss:$8 sps:$4 sm:$0xff]  }
 0x721   : > { %v7283_v58 = vpop.f32.mrb[72].mxu0 }
 0x722   : > { %v7285_v21 = vpop.f32.mrb[73].mxu0 }
 0x723   : > { %v7287_v49 = vpop.f32.mrb[74].mxu0  ;;  %3657 = vmatpush1.bf16.msra.mxu0 %v5145_v33 }
 0x724   : > { %v7289_v38 = vpop.f32.mrb[75].mxu0  ;;  %3658 = vmatprep.subr.bf16.mxu0 %v5150_v17 }
 0x725   : > { %2421 = vrot.lane.b32.xlu1 %v2402_v61, %s5637_s10  ;;  %v8079_v61 = vld [vmem:[#allocation41_spill] sm:$0xff] }
 0x727   : > { %3659 = vmatpush1.bf16.msra.mxu0 %v5148_v48 }
 0x728   : > { %3660 = vmatprep.subr.bf16.mxu0 %v5153_v39 }
 0x72b   : > { %3661 = vmatpush1.bf16.msra.mxu0 %v5151_v8 }
 0x72c   : > { %3662 = vmatprep.subr.bf16.mxu0 %v5156_v2 }
 0x72f   : > { %3663 = vmatpush1.bf16.msra.mxu0 %v5154_v63 }
 0x730   : > { %3664 = vmatprep.subr.bf16.mxu0 %v5159_v51 }
 0x733   : > { %3665 = vmatpush1.bf16.msra.mxu0 %v5157_v24 }
 0x734   : > { %3666 = vmatprep.subr.bf16.mxu0 %v5162_v47 }
 0x737   : > { %3667 = vmatpush1.bf16.msra.mxu0 %v5160_v42 }
 0x742   : > { %v7295_v57 = vpop.f32.mrb[76].mxu0 }
 0x743   : > { %v7297_v11 = vpop.f32.mrb[77].mxu0 }
 0x744   : > { %v2718_v16 = vpop.xlane.xlu1 %2717  ;;  %v7299_v54 = vpop.f32.mrb[78].mxu0 }
 0x745   : > { %5383 = vrcp.f32 %v2718_v16  ;;  %v7301_v60 = vpop.f32.mrb[79].mxu0  ;;  %v5163_v16 = vld [vmem:[#allocation9 + $0xa0] ss:$8 sps:$4 sm:$0xff]  }
 0x746   : > { %5385 = vrcp.f32 %v1737_v40  ;;  %v5165_v40 = vld [vmem:[#allocation9 + $0xa4] ss:$8 sps:$4 sm:$0xff]  }
 0x747   : > { %3668 = vmatprep.subr.bf16.mxu0 %v5165_v40 }
 0x748   : > { %v1739_v25 = vpop.xlane.xlu1 %1738  ;;  %3669 = vmatpush1.bf16.msra.mxu0 %v5163_v16  ;;  %v8087_v16 = vld [vmem:[#allocation37_spill] sm:$0xff] }
 0x749   : > { %5387 = vrcp.f32 %v1739_v25  ;;  %2725 = vadd.xlane.f32.xlu1 %v8079_v61  ;;  %v5168_v25 = vld [vmem:[#allocation9 + $0xb4] ss:$8 sps:$4 sm:$0xff]   ;;  %v5166_v61 = vld [vmem:[#allocation9 + $0xb0] ss:$8 sps:$4 sm:$0xff]  }
 0x74a   : > { %3670 = vmatprep.subr.bf16.mxu0 %v5168_v25  ;;  %5389 = vrcp.f32 %v2724_v5 }
 0x74c   : > { %v2420_v43 = vpop.permute.xlu1 %2419  ;;  %3671 = vmatpush1.bf16.msra.mxu0 %v5166_v61  ;;  %v8088_v61 = vld [vmem:[#allocation39_spill] sm:$0xff] }
 0x74d   : > { %2442 = vst.msk [vmem:[#allocation3 + $0x20] sm:$0xff] %vm2439_vm1, %v2420_v43  ;;  %1746 = vadd.xlane.f32.xlu1 %v8080_v13  ;;  %v5171_v43 = vld [vmem:[#allocation9 + $0xc4] ss:$8 sps:$4 sm:$0xff]  }
 0x74e   : > { %3672 = vmatprep.subr.bf16.mxu0 %v5171_v43 }
 0x74f   : > { %v5384_v45 = vpop.eup %5383 }
 0x750   : > { %v2860_v56 = vmul.f32 %v5384_v45, %v8082_v36  ;;  %v5386_v10 = vpop.eup %5385  ;;  %v5169_v45 = vld [vmem:[#allocation9 + $0xc0] ss:$8 sps:$4 sm:$0xff]   ;;  %v5174_v36 = vld [vmem:[#allocation9 + $0xd4] ss:$8 sps:$4 sm:$0xff]  }
 0x751   : > { %v1879_v44 = vmul.f32 %v5386_v10, %v8083_v53  ;;  %3673 = vmatpush1.bf16.msra.mxu0 %v5169_v45 }
 0x752   : > { %v2871_v32 = vpack.c.bf16 %v2861_v29, %v2860_v56  ;;  %v5172_v56 = vld [vmem:[#allocation9 + $0xd0] ss:$8 sps:$4 sm:$0xff]   ;;  %3674 = vmatprep.subr.bf16.mxu0 %v5174_v36 }
 0x753   : > { %v5388_v62 = vpop.eup %5387 }
 0x754   : > { %v1880_v52 = vmul.f32 %v5388_v62, %v8084_v28  ;;  %2879 = vst.msk [vmem:[#allocation3 + $0x58] sm:$0xff] %vm1490_vm0, %v2871_v32  ;;  %v5390_v32 = vpop.eup %5389  ;;  %v5177_v62 = vld [vmem:[#allocation9 + $0xe4] ss:$8 sps:$4 sm:$0xff]   ;;  %v5175_v28 = vld [vmem:[#allocation9 + $0xe0] ss:$8 sps:$4 sm:$0xff]  }
 0x755   : > { %3675 = vmatpush1.bf16.msra.mxu0 %v5172_v56 }
 0x756   : > { %v1890_v6 = vpack.c.bf16 %v1880_v52, %v1879_v44  ;;  %v5180_v52 = vld [vmem:[#allocation9 + $0xf4] ss:$8 sps:$4 sm:$0xff]   ;;  %3676 = vmatprep.subr.bf16.mxu0 %v5177_v62 }
 0x758   : > { %1898 = vst.msk [vmem:[#allocation3 + $0x50] sm:$0xff] %vm1490_vm0, %v1890_v6  ;;  %v8085_v6 = vld [vmem:[#allocation68_spill] sm:$0xff] }
 0x759   : > { %v2863_v4 = vmul.f32 %v5390_v32, %v8085_v6  ;;  %3677 = vmatpush1.bf16.msra.mxu0 %v5175_v28 }
 0x75a   : > { %3678 = vmatprep.subr.bf16.mxu0 %v5180_v52 }
 0x75d   : > { %3679 = vmatpush1.bf16.msra.mxu0 %v5178_v46 }
 0x75e   : > { %2423 = vrot.lane.b32.xlu1 %v2403_v3, %s5637_s10  ;;  %v1741_v3 = vpop.xlane.xlu0 %1740 }
 0x762   : > { %v3184_v59 = vpop.xlane.xlu0 %3183 }
 0x766   : > { %v3180_v1 = vpop.xlane.xlu0 %3179 }
 0x76a   : > { %v3192_v29 = vpop.xlane.xlu0 %3191 }
 0x76e   : > { %v3188_v44 = vpop.xlane.xlu0 %3187 }
 0x772   : > { %v3200_v8 = vpop.xlane.xlu0 %3199 }
 0x77d   : > { %v2722_v13 = vpop.xlane.xlu1 %2721 }
 0x77e   : > { %5391 = vrcp.f32 %v2722_v13 }
 0x77f   : > { %5393 = vrcp.f32 %v3184_v59 }
 0x781   : > { %v3186_v12 = vpop.xlane.xlu1 %3185 }
 0x782   : > { %5395 = vrcp.f32 %v3186_v12 }
 0x783   : > { %5397 = vrcp.f32 %v3180_v1 }
 0x785   : > { %v3182_v10 = vpop.xlane.xlu1 %3181 }
 0x786   : > { %5399 = vrcp.f32 %v3182_v10 }
 0x787   : > { %5401 = vrcp.f32 %v1741_v3 }
 0x788   : > { %v5392_v53 = vpop.eup %5391 }
 0x789   : > { %v2862_v0 = vmul.f32 %v5392_v53, %v8086_v22  ;;  %v1743_v55 = vpop.xlane.xlu1 %1742  ;;  %v5394_v33 = vpop.eup %5393 }
 0x78a   : > { %5403 = vrcp.f32 %v1743_v55  ;;  %v3366_v39 = vmul.f32 %v5394_v33, %v7250_v14  ;;  %v3196_v14 = vpop.xlane.xlu0 %3195 }
 0x78b   : > { %v2872_v17 = vpack.c.bf16 %v2863_v4, %v2862_v0  ;;  %5405 = vrcp.f32 %v3192_v29 }
 0x78c   : > { %v5396_v48 = vpop.eup %5395 }
 0x78d   : > { %v3194_v2 = vpop.xlane.xlu1 %3193  ;;  %v3367_v5 = vmul.f32 %v5396_v48, %v7254_v35  ;;  %2880 = vst.msk [vmem:[#allocation3 + $0x68] sm:$0xff] %vm1490_vm0, %v2872_v17  ;;  %v5398_v63 = vpop.eup %5397 }
 0x78e   : > { %5407 = vrcp.f32 %v3194_v2  ;;  %v3364_v47 = vmul.f32 %v5398_v63, %v7252_v31  ;;  %v3208_v12 = vpop.xlane.xlu0 %3207 }
 0x78f   : > { %v3381_v51 = vpack.c.bf16 %v3367_v5, %v3366_v39  ;;  %5409 = vrcp.f32 %v3188_v44 }
 0x790   : > { %v5400_v24 = vpop.eup %5399 }
 0x791   : > { %v3190_v3 = vpop.xlane.xlu1 %3189  ;;  %3398 = vrot.lane.b32.xlu0 %v3381_v51, %s5637_s10  ;;  %v3365_v42 = vmul.f32 %v5400_v24, %v7256_v19  ;;  %v5402_v40 = vpop.eup %5401 }
 0x792   : > { %5411 = vrcp.f32 %v3190_v3  ;;  %v1881_v25 = vmul.f32 %v5402_v40, %v8087_v16  ;;  %v3204_v28 = vpop.xlane.xlu0 %3203  ;;  %v8090_v3 = vld [vmem:[#allocation67_spill] sm:$0xff]  ;;  %v8091_v40 = vld [vmem:[#allocation65_spill] sm:$0xff]  ;;  %v3428_v16 = vld [vmem:[#allocation3] sm:$0xff] }
 0x793   : > { %v3380_v59 = vpack.c.bf16 %v3365_v42, %v3364_v47  ;;  %5413 = vrcp.f32 %v3200_v8 }
 0x794   : > { %v5404_v35 = vpop.eup %5403 }
 0x795   : > { %v1882_v43 = vmul.f32 %v5404_v35, %v8088_v61  ;;  %v3202_v1 = vpop.xlane.xlu1 %3201  ;;  %3396 = vrot.lane.b32.xlu0 %v3380_v59, %s5637_s10  ;;  %v5406_v31 = vpop.eup %5405 }
 0x796   : > { %5415 = vrcp.f32 %v3202_v1  ;;  %v3370_v19 = vmul.f32 %v5406_v31, %v7259_v41  ;;  %v2728_v24 = vpop.xlane.xlu0 %2727 }
 0x797   : > { %v1891_v13 = vpack.c.bf16 %v1882_v43, %v1881_v25  ;;  %5417 = vrcp.f32 %v3196_v14  ;;  %v3430_v25 = vld [vmem:[#allocation3 + $0x10] sm:$0xff]  ;;  %v3432_v43 = vld [vmem:[#allocation3 + $0x20] sm:$0xff] }
 0x798   : > { %v5408_v45 = vpop.eup %5407 }
 0x799   : > { %v3198_v29 = vpop.xlane.xlu1 %3197  ;;  %v3371_v36 = vmul.f32 %v5408_v45, %v7263_v9  ;;  %1899 = vst.msk [vmem:[#allocation3 + $0x60] sm:$0xff] %vm1490_vm0, %v1891_v13  ;;  %v5410_v56 = vpop.eup %5409 }
 0x79a   : > { %5419 = vrcp.f32 %v3198_v29  ;;  %v3368_v62 = vmul.f32 %v5410_v56, %v7261_v15  ;;  %v8093_v56 = vld [vmem:[#allocation36_spill] sm:$0xff] }
 0x79b   : > { %v3383_v10 = vpack.c.bf16 %v3371_v36, %v3370_v19  ;;  %5421 = vrcp.f32 %v3208_v12 }
 0x79c   : > { %v5412_v32 = vpop.eup %5411 }
 0x79d   : > { %v3210_v53 = vpop.xlane.xlu1 %3209  ;;  %3402 = vrot.lane.b32.xlu0 %v3383_v10, %s5637_s10  ;;  %v3369_v44 = vmul.f32 %v5412_v32, %v7266_v37  ;;  %v5414_v41 = vpop.eup %5413 }
 0x79e   : > { %5423 = vrcp.f32 %v3210_v53  ;;  %v3374_v9 = vmul.f32 %v5414_v41, %v7283_v58 }
 0x79f   : > { %v3382_v52 = vpack.c.bf16 %v3369_v44, %v3368_v62  ;;  %5425 = vrcp.f32 %v3204_v28 }
 0x7a0   : > { %v5416_v6 = vpop.eup %5415 }
 0x7a1   : > { %v3206_v4 = vpop.xlane.xlu1 %3205  ;;  %3400 = vrot.lane.b32.xlu0 %v3382_v52, %s5637_s10  ;;  %v3375_v22 = vmul.f32 %v5416_v6, %v7287_v49  ;;  %v5418_v15 = vpop.eup %5417 }
 0x7a2   : > { %5427 = vrcp.f32 %v3206_v4  ;;  %v3372_v46 = vmul.f32 %v5418_v15, %v7285_v21  ;;  %v3476_v15 = vld [vmem:[%s7913_s5] sm:$0x3] }
 0x7a3   : > { %v3385_v0 = vpack.c.bf16 %v3375_v22, %v3374_v9  ;;  %5429 = vrcp.f32 %v2728_v24 }
 0x7a4   : > { %v5420_v55 = vpop.eup %5419 }
 0x7a5   : > { %v2422_v37 = vpop.permute.xlu1 %2421  ;;  %3406 = vrot.lane.b32.xlu1 %v3385_v0, %s5637_s10  ;;  %v3373_v33 = vmul.f32 %v5420_v55, %v7289_v38  ;;  %v5422_v17 = vpop.eup %5421  ;;  %v8089_v38 = vld [vmem:[#allocation35_spill] sm:$0xff]  ;;  %v8094_v0 = vld [vmem:[#allocation14_spill] sm:$0xff] }
 0x7a6   : > { %2443 = vst.msk [vmem:[#allocation3 + $0x30] sm:$0xff] %vm2439_vm1, %v2422_v37  ;;  %v3378_v8 = vmul.f32 %v5422_v17, %v7295_v57  ;;  %v7382_v55 = vrot.slane %v3476_v15, %v8094_v0  ;;  %v3761_v17 = vld [vmem:[%s5864_s18] sm:$0xff] }
 0x7a7   : > { %v3384_v58 = vpack.c.bf16 %v3373_v33, %v3372_v46  ;;  %v8095_v46 = vld [vmem:[#allocation15_spill] sm:$0xff] }
 0x7a8   : > { %v5424_v48 = vpop.eup %5423  ;;  %v7385_v37 = vrot.slane %v3476_v15, %v8095_v46 }
 0x7a9   : > { %v3379_v49 = vmul.f32 %v5424_v48, %v7299_v54  ;;  %v5426_v39 = vpop.eup %5425 }
 0x7aa   : > { %v3376_v63 = vmul.f32 %v5426_v39, %v7297_v11 }
 0x7ab   : > { %v3387_v2 = vpack.c.bf16 %v3379_v49, %v3378_v8  ;;  %v3762_v8 = vld [vmem:[%s5864_s18 + $0x8] sm:$0xff] }
 0x7ac   : > { %v5428_v5 = vpop.eup %5427 }
 0x7ad   : > { %v3377_v21 = vmul.f32 %v5428_v5, %v7301_v60  ;;  %v5430_v54 = vpop.eup %5429  ;;  %v3434_v45 = vld [vmem:[#allocation3 + $0x30] sm:$0xff] }
 0x7ae   : > { %v2865_v42 = vmul.f32 %v5430_v54, %v8090_v3 }
 0x7af   : > { %v3386_v51 = vpack.c.bf16 %v3377_v21, %v3376_v63 }
 0x7b1   : > { %3408 = vrot.lane.b32.xlu1 %v3386_v51, %s5637_s10  ;;  %v3764_v51 = vld [vmem:[%s5864_s18 + $0x18] sm:$0xff] }
 0x7b5   : > { %3410 = vrot.lane.b32.xlu1 %v3387_v2, %s5637_s10  ;;  %v3763_v2 = vld [vmem:[%s5864_s18 + $0x10] sm:$0xff] }
 0x7c0   : > { %1744 = vadd.xlane.f32.xlu0 %v8089_v38 }
 0x7d6   : > { %v2726_v47 = vpop.xlane.xlu1 %2725  ;;  %3404 = vrot.lane.b32.xlu0 %v3384_v58, %s5637_s10 }
 0x7d7   : > { %5431 = vrcp.f32 %v2726_v47 }
 0x7da   : > { %v1747_v57 = vpop.xlane.xlu1 %1746  ;;  %2425 = vrot.lane.b32.xlu0 %v2404_v7, %s5637_s10  ;;  %v8092_v7 = vld [vmem:[#allocation38_spill] sm:$0xff] }
 0x7db   : > { %5433 = vrcp.f32 %v1747_v57 }
 0x7de   : > { %v2424_v11 = vpop.permute.xlu1 %2423  ;;  %2427 = vrot.lane.b32.xlu0 %v2405_v18, %s5637_s10 }
 0x7df   : > { %2444 = vst.msk [vmem:[#allocation3 + $0x40] sm:$0xff] %vm2439_vm1, %v2424_v11 }
 0x7e1   : > { %v5432_v60 = vpop.eup %5431 }
 0x7e2   : > { %v2864_v14 = vmul.f32 %v5432_v60, %v8091_v40  ;;  %2429 = vrot.lane.b32.xlu0 %v2406_v23, %s5637_s10  ;;  %v3765_v60 = vld [vmem:[%s5864_s18 + $0x20] sm:$0xff]  ;;  %s7737_s10 = scalar_lea.vmem [#allocation10], %s4325_s16  ;;  %s4496_s16 = sshll.u32 %s5707_s9, 12 }
 0x7e3   : > { %s4215_s17 = sshll.u32 %s7737_s10, 4  ;;  %s7856_s15 = scalar_lea.hbm %s7916_s8, %s4496_s16  ;;  %s7858_s17 = int_to_ptr.vmem [resolvable:$true] %s4215_s17 }
 0x7e4   : > { %v2873_v26 = vpack.c.bf16 %v2865_v42, %v2864_v14  ;;  %v3766_v14 = vld [vmem:[%s5864_s18 + $0x28] sm:$0xff]  ;;  %s4202_s9 = scalar_lea.sflag [#allocation6], %s5858_s14  ;;  %s5556_s22 = scalar_lea.vmem %s7858_s17, 4096 }
 0x7e5   : > { %v5434_v50 = vpop.eup %5433  ;;  %p5557_p0 = scmp.ne.s32.totalorder %s7858_s17, %s5556_s22  ;;  %p5563_p9 = scmp.lt.s32.totalorder %s7858_s17, %s5561_s25 }
 0x7e6   : > { %v1884_v59 = vmul.f32 %v5434_v50, %v8092_v7  ;;  %2881 = vst.msk [vmem:[#allocation3 + $0x78] sm:$0xff] %vm1490_vm0, %v2873_v26  ;;  %v3436_v53 = vld [vmem:[#allocation3 + $0x40] sm:$0xff]  ;;  %v3767_v7 = vld [vmem:[%s5864_s18 + $0x30] sm:$0xff] }
 0x7e7   : > { %p5558_p3 = pnand %p5557_p0, %p8096_p1 }
 0x7e9   : > { %p5559_p5 = pneg %p5558_p3 }
 0x803   : > { %v3399_v27 = vpop.permute.xlu0 %3398 }
 0x804   : > { %3421 = vst.msk [vmem:[#allocation3 + $0x18] sm:$0xff] %vm2439_vm1, %v3399_v27 }
 0x807   : > { %v3397_v20 = vpop.permute.xlu0 %3396 }
 0x808   : > { %3420 = vst.msk [vmem:[#allocation3 + $0x8] sm:$0xff] %vm2439_vm1, %v3397_v20 }
 0x80b   : > { %v3431_v34 = vld [vmem:[#allocation3 + $0x18] sm:$0xff] }
 0x80f   : > { %v3403_v18 = vpop.permute.xlu0 %3402  ;;  %v3429_v35 = vld [vmem:[#allocation3 + $0x8] sm:$0xff] }
 0x810   : > { %3423 = vst.msk [vmem:[#allocation3 + $0x38] sm:$0xff] %vm2439_vm1, %v3403_v18  ;;  %3680 = vmatprep.mubr.bf16.mxu0 %v3429_v35  ;;  %v3768_v18 = vld [vmem:[%s5864_s18 + $0x38] sm:$0xff] }
 0x811   : > { %3681 = vmatmul.mubr.bf16.vlgmr.msra.gmra.mrb[80].mxu0 %v3428_v16 }
 0x812   : > { %3690 = vmatprep.mubr.bf16.mxu0 %v3431_v34 }
 0x813   : > { %v3401_v30 = vpop.permute.xlu0 %3400 }
 0x814   : > { %3422 = vst.msk [vmem:[#allocation3 + $0x28] sm:$0xff] %vm2439_vm1, %v3401_v30 }
 0x817   : > { %v3407_v23 = vpop.permute.xlu1 %3406  ;;  %v3435_v1 = vld [vmem:[#allocation3 + $0x38] sm:$0xff] }
 0x818   : > { %3425 = vst.msk [vmem:[#allocation3 + $0x58] sm:$0xff] %vm2439_vm1, %v3407_v23 }
 0x819   : > { %3691 = vmatmul.mubr.bf16.gmra.mrb[84].mxu0 %v3430_v25 }
 0x81b   : > { %v3433_v61 = vld [vmem:[#allocation3 + $0x28] sm:$0xff] }
 0x81c   : > { %3700 = vmatprep.mubr.bf16.mxu0 %v3433_v61  ;;  %v3769_v61 = vld [vmem:[%s5864_s18 + $0x40] sm:$0xff] }
 0x81f   : > { %v3439_v44 = vld [vmem:[#allocation3 + $0x58] sm:$0xff] }
 0x821   : > { %3701 = vmatmul.mubr.bf16.gmra.mrb[88].mxu0 %v3432_v43 }
 0x822   : > { %3710 = vmatprep.mubr.bf16.mxu0 %v3435_v1 }
 0x823   : > { %v3409_v31 = vpop.permute.xlu1 %3408 }
 0x824   : > { %3426 = vst.msk [vmem:[#allocation3 + $0x68] sm:$0xff] %vm2439_vm1, %v3409_v31 }
 0x827   : > { %v3411_v13 = vpop.permute.xlu1 %3410 }
 0x828   : > { %3427 = vst.msk [vmem:[#allocation3 + $0x78] sm:$0xff] %vm2439_vm1, %v3411_v13  ;;  %v3770_v13 = vld [vmem:[%s5864_s18 + $0x48] sm:$0xff] }
 0x829   : > { %3711 = vmatmul.mubr.bf16.gmra.mrb[92].mxu0 %v3434_v45 }
 0x82b   : > { %v3441_v6 = vld [vmem:[#allocation3 + $0x68] sm:$0xff] }
 0x82f   : > { %v3443_v4 = vld [vmem:[#allocation3 + $0x78] sm:$0xff] }
 0x84d   : > { %v1745_v12 = vpop.xlane.xlu0 %1744 }
 0x84e   : > { %5435 = vrcp.f32 %v1745_v12 }
 0x851   : > { %v3405_v19 = vpop.permute.xlu0 %3404 }
 0x852   : > { %3424 = vst.msk [vmem:[#allocation3 + $0x48] sm:$0xff] %vm2439_vm1, %v3405_v19  ;;  %v3771_v19 = vld [vmem:[%s5864_s18 + $0x50] sm:$0xff] }
 0x855   : > { %v2426_v29 = vpop.permute.xlu0 %2425 }
 0x856   : > { %2445 = vst.msk [vmem:[#allocation3 + $0x50] sm:$0xff] %vm2439_vm1, %v2426_v29 }
 0x858   : > { %v5436_v36 = vpop.eup %5435 }
 0x859   : > { %v1883_v10 = vmul.f32 %v5436_v36, %v8093_v56  ;;  %v2428_v32 = vpop.permute.xlu0 %2427  ;;  %v3437_v62 = vld [vmem:[#allocation3 + $0x48] sm:$0xff] }
 0x85a   : > { %2446 = vst.msk [vmem:[#allocation3 + $0x60] sm:$0xff] %vm2439_vm1, %v2428_v32  ;;  %3720 = vmatprep.mubr.bf16.mxu0 %v3437_v62 }
 0x85b   : > { %3721 = vmatmul.mubr.bf16.gmra.mrb[96].mxu0 %v3436_v53  ;;  %v1892_v28 = vpack.c.bf16 %v1884_v59, %v1883_v10  ;;  %v3772_v10 = vld [vmem:[%s5864_s18 + $0x58] sm:$0xff] }
 0x85c   : > { %3730 = vmatprep.mubr.bf16.mxu0 %v3439_v44 }
 0x85d   : > { %1900 = vst.msk [vmem:[#allocation3 + $0x70] sm:$0xff] %vm1490_vm0, %v1892_v28  ;;  %v2430_v41 = vpop.permute.xlu0 %2429  ;;  %v3438_v52 = vld [vmem:[#allocation3 + $0x50] sm:$0xff] }
 0x85e   : > { %2447 = vst.msk [vmem:[#allocation3 + $0x70] sm:$0xff] %vm2439_vm1, %v2430_v41 }
 0x861   : > { %v3440_v9 = vld [vmem:[#allocation3 + $0x60] sm:$0xff] }
 0x863   : > { %3731 = vmatmul.mubr.bf16.gmra.mrb[100].mxu0 %v3438_v52  ;;  %v3773_v52 = vld [vmem:[%s5864_s18 + $0x60] sm:$0xff] }
 0x864   : > { %3740 = vmatprep.mubr.bf16.mxu0 %v3441_v6 }
 0x865   : > { %v3442_v22 = vld [vmem:[#allocation3 + $0x70] sm:$0xff] }
 0x86b   : > { %3741 = vmatmul.mubr.bf16.gmra.mrb[104].mxu0 %v3440_v9 }
 0x86c   : > { %3750 = vmatprep.mubr.bf16.mxu0 %v3443_v4 }
 0x873   : > { %3751 = vmatmul.mubr.bf16.gmra.mrb[108].mxu0 %v3442_v22  ;;  %v3774_v22 = vld [vmem:[%s5864_s18 + $0x68] sm:$0xff] }
 0x8e4   : > { %v3682_v33 = vpop.f32.mrb[80].mxu0 }
 0x8e5   : > { %v3683_v58 = vadd.f32 %v3682_v33, %v7382_v55  ;;  %v3684_v48 = vpop.f32.mrb[81].mxu0 }
 0x8e6   : > { %v3685_v49 = vadd.f32 %v3684_v48, %v7385_v37  ;;  %v3686_v39 = vpop.f32.mrb[82].mxu0 }
 0x8e7   : > { %v7392_v5 = vadd.f32 %v3761_v17, %v3683_v58  ;;  %v3687_v63 = vadd.f32 %v3686_v39, %v7382_v55  ;;  %v3688_v21 = vpop.f32.mrb[83].mxu0  ;;  %v3775_v17 = vld [vmem:[%s5864_s18 + $0x70] sm:$0xff] }
 0x8e8   : > { %v7396_v38 = vadd.f32 %v3762_v8, %v3685_v49  ;;  %v3689_v24 = vadd.f32 %v3688_v21, %v7385_v37  ;;  %v3776_v49 = vld [vmem:[%s5864_s18 + $0x78] sm:$0xff] }
 0x8e9   : > { %v7399_v47 = vadd.f32 %v3763_v2, %v3687_v63 }
 0x8ea   : > { %v7401_v57 = vadd.f32 %v3764_v51, %v3689_v24  ;;  %v3825_v11 = vadd.f32 %v7396_v38, %v7392_v5 }
 0x8ec   : > { %v3692_v54 = vpop.f32.mrb[84].mxu0  ;;  %3826 = vadd.xlane.f32.xlu1 %v3825_v11  ;;  %v3828_v3 = vadd.f32 %v7401_v57, %v7399_v47 }
 0x8ed   : > { %v3693_v42 = vadd.f32 %v3692_v54, %v7382_v55  ;;  %v3694_v40 = vpop.f32.mrb[85].mxu0  ;;  %v3777_v54 = vld [vmem:[%s5864_s18 + $0x80] sm:$0xff] }
 0x8ee   : > { %v3695_v26 = vadd.f32 %v3694_v40, %v7385_v37  ;;  %v3696_v50 = vpop.f32.mrb[86].mxu0  ;;  %3829 = vadd.xlane.f32.xlu0 %v3828_v3 }
 0x8ef   : > { %v7412_v59 = vadd.f32 %v3765_v60, %v3693_v42  ;;  %v3697_v27 = vadd.f32 %v3696_v50, %v7382_v55  ;;  %v3698_v20 = vpop.f32.mrb[87].mxu0  ;;  %v3778_v42 = vld [vmem:[%s5864_s18 + $0x88] sm:$0xff] }
 0x8f0   : > { %v7416_v35 = vadd.f32 %v3766_v14, %v3695_v26  ;;  %v3699_v16 = vadd.f32 %v3698_v20, %v7385_v37  ;;  %v3779_v26 = vld [vmem:[%s5864_s18 + $0x90] sm:$0xff]  ;;  %v3780_v20 = vld [vmem:[%s5864_s18 + $0x98] sm:$0xff] }
 0x8f1   : > { %v7419_v34 = vadd.f32 %v3767_v7, %v3697_v27 }
 0x8f2   : > { %v7421_v30 = vadd.f32 %v3768_v18, %v3699_v16  ;;  %v3831_v23 = vadd.f32 %v7416_v35, %v7412_v59 }
 0x8f4   : > { %3832 = vadd.xlane.f32.xlu0 %v3831_v23  ;;  %v3702_v25 = vpop.f32.mrb[88].mxu0  ;;  %v3834_v43 = vadd.f32 %v7421_v30, %v7419_v34 }
 0x8f5   : > { %v3703_v1 = vadd.f32 %v3702_v25, %v7382_v55  ;;  %v3704_v31 = vpop.f32.mrb[89].mxu0 }
 0x8f6   : > { %v3705_v45 = vadd.f32 %v3704_v31, %v7385_v37  ;;  %3835 = vadd.xlane.f32.xlu1 %v3834_v43  ;;  %v3706_v12 = vpop.f32.mrb[90].mxu0 }
 0x8f7   : > { %v7432_v29 = vadd.f32 %v3769_v61, %v3703_v1  ;;  %v3707_v36 = vadd.f32 %v3706_v12, %v7382_v55  ;;  %v3708_v56 = vpop.f32.mrb[91].mxu0  ;;  %v3781_v1 = vld [vmem:[%s5864_s18 + $0xa0] sm:$0xff]  ;;  %v3782_v12 = vld [vmem:[%s5864_s18 + $0xa8] sm:$0xff] }
 0x8f8   : > { %v7436_v32 = vadd.f32 %v3770_v13, %v3705_v45  ;;  %v3709_v62 = vadd.f32 %v3708_v56, %v7385_v37  ;;  %v3783_v56 = vld [vmem:[%s5864_s18 + $0xb0] sm:$0xff] }
 0x8f9   : > { %v7439_v53 = vadd.f32 %v3771_v19, %v3707_v36 }
 0x8fa   : > { %v7441_v44 = vadd.f32 %v3772_v10, %v3709_v62  ;;  %v3837_v28 = vadd.f32 %v7436_v32, %v7432_v29 }
 0x8fc   : > { %v3712_v41 = vpop.f32.mrb[92].mxu0  ;;  %3838 = vadd.xlane.f32.xlu0 %v3837_v28  ;;  %v3840_v6 = vadd.f32 %v7441_v44, %v7439_v53 }
 0x8fd   : > { %v3713_v9 = vadd.f32 %v3712_v41, %v7382_v55  ;;  %v3714_v4 = vpop.f32.mrb[93].mxu0  ;;  %v3784_v41 = vld [vmem:[%s5864_s18 + $0xb8] sm:$0xff] }
 0x8fe   : > { %v3715_v15 = vadd.f32 %v3714_v4, %v7385_v37  ;;  %v3716_v33 = vpop.f32.mrb[94].mxu0  ;;  %3841 = vadd.xlane.f32.xlu1 %v3840_v6 }
 0x8ff   : > { %v7452_v58 = vadd.f32 %v3773_v52, %v3713_v9  ;;  %v3717_v48 = vadd.f32 %v3716_v33, %v7382_v55  ;;  %v3718_v8 = vpop.f32.mrb[95].mxu0  ;;  %v3785_v33 = vld [vmem:[%s5864_s18 + $0xc0] sm:$0xff] }
 0x900   : > { %v7456_v39 = vadd.f32 %v3774_v22, %v3715_v15  ;;  %v3719_v2 = vadd.f32 %v3718_v8, %v7385_v37 }
 0x901   : > { %v7459_v63 = vadd.f32 %v3775_v17, %v3717_v48 }
 0x902   : > { %v7461_v21 = vadd.f32 %v3776_v49, %v3719_v2  ;;  %v3843_v51 = vadd.f32 %v7456_v39, %v7452_v58  ;;  %v3786_v49 = vld [vmem:[%s5864_s18 + $0xc8] sm:$0xff] }
 0x904   : > { %3844 = vadd.xlane.f32.xlu0 %v3843_v51  ;;  %v3846_v24 = vadd.f32 %v7461_v21, %v7459_v63 }
 0x906   : > { %3847 = vadd.xlane.f32.xlu1 %v3846_v24  ;;  %v3787_v24 = vld [vmem:[%s5864_s18 + $0xd0] sm:$0xff] }
 0x92e   : > { %v3722_v11 = vpop.f32.mrb[96].mxu0 }
 0x92f   : > { %v3723_v60 = vadd.f32 %v3722_v11, %v7382_v55  ;;  %v3724_v3 = vpop.f32.mrb[97].mxu0 }
 0x930   : > { %v3725_v40 = vadd.f32 %v3724_v3, %v7385_v37  ;;  %v3726_v14 = vpop.f32.mrb[98].mxu0  ;;  %v3788_v3 = vld [vmem:[%s5864_s18 + $0xd8] sm:$0xff] }
 0x931   : > { %v7472_v50 = vadd.f32 %v3777_v54, %v3723_v60  ;;  %v3727_v7 = vadd.f32 %v3726_v14, %v7382_v55  ;;  %v3728_v27 = vpop.f32.mrb[99].mxu0 }
 0x932   : > { %v7476_v18 = vadd.f32 %v3778_v42, %v3725_v40  ;;  %v3729_v16 = vadd.f32 %v3728_v27, %v7385_v37 }
 0x933   : > { %v7479_v23 = vadd.f32 %v3779_v26, %v3727_v7 }
 0x934   : > { %v7481_v25 = vadd.f32 %v3780_v20, %v3729_v16  ;;  %v3849_v61 = vadd.f32 %v7476_v18, %v7472_v50  ;;  %v3789_v20 = vld [vmem:[%s5864_s18 + $0xe0] sm:$0xff] }
 0x936   : > { %3850 = vadd.xlane.f32.xlu0 %v3849_v61  ;;  %v3732_v43 = vpop.f32.mrb[100].mxu0  ;;  %v3852_v31 = vadd.f32 %v7481_v25, %v7479_v23 }
 0x937   : > { %v3733_v13 = vadd.f32 %v3732_v43, %v7382_v55  ;;  %v3734_v45 = vpop.f32.mrb[101].mxu0 }
 0x938   : > { %v3735_v19 = vadd.f32 %v3734_v45, %v7385_v37  ;;  %3853 = vadd.xlane.f32.xlu1 %v3852_v31  ;;  %v3736_v36 = vpop.f32.mrb[102].mxu0  ;;  %v3791_v45 = vld [vmem:[%s5864_s18 + $0xf0] sm:$0xff] }
 0x939   : > { %v7492_v10 = vadd.f32 %v3781_v1, %v3733_v13  ;;  %v3737_v62 = vadd.f32 %v3736_v36, %v7382_v55  ;;  %v3738_v28 = vpop.f32.mrb[103].mxu0  ;;  %v3790_v1 = vld [vmem:[%s5864_s18 + $0xe8] sm:$0xff] }
 0x93a   : > { %v7496_v52 = vadd.f32 %v3782_v12, %v3735_v19  ;;  %v3739_v6 = vadd.f32 %v3738_v28, %v7385_v37 }
 0x93b   : > { %v7499_v9 = vadd.f32 %v3783_v56, %v3737_v62  ;;  %v3792_v56 = vld [vmem:[%s5864_s18 + $0xf8] sm:$0xff]  ;;  %s5562_s18 = scalar_lea.vmem %s5561_s25, 8192 }
 0x93c   : > { %v7501_v4 = vadd.f32 %v3784_v41, %v3739_v6  ;;  %v3855_v22 = vadd.f32 %v7496_v52, %v7492_v10  ;;  %p5564_p12 = scmp.lt.s32.totalorder %s5562_s18, %s5556_s22 }
 0x93e   : > { %3856 = vadd.xlane.f32.xlu0 %v3855_v22  ;;  %v3742_v15 = vpop.f32.mrb[104].mxu0  ;;  %v3858_v17 = vadd.f32 %v7501_v4, %v7499_v9  ;;  %p5565_p2 = por %p5564_p12, %p5563_p9 }
 0x93f   : > { %v3743_v48 = vadd.f32 %v3742_v15, %v7382_v55  ;;  %v3744_v8 = vpop.f32.mrb[105].mxu0 }
 0x940   : > { %v3745_v2 = vadd.f32 %v3744_v8, %v7385_v37  ;;  %3859 = vadd.xlane.f32.xlu1 %v3858_v17  ;;  %v3746_v51 = vpop.f32.mrb[106].mxu0  ;;  %p5566_p13 = pnand %p5565_p2, %p5559_p5 }
 0x941   : > { %v7512_v11 = vadd.f32 %v3785_v33, %v3743_v48  ;;  %v3747_v54 = vadd.f32 %v3746_v51, %v7382_v55  ;;  %v3748_v60 = vpop.f32.mrb[107].mxu0 }
 0x942   : > { %v7516_v42 = vadd.f32 %v3786_v49, %v3745_v2  ;;  %v3749_v40 = vadd.f32 %v3748_v60, %v7385_v37 }
 0x943   : > { %v7519_v14 = vadd.f32 %v3787_v24, %v3747_v54 }
 0x944   : > { %v7521_v26 = vadd.f32 %v3788_v3, %v3749_v40  ;;  %v3861_v7 = vadd.f32 %v7516_v42, %v7512_v11 }
 0x946   : > { %3862 = vadd.xlane.f32.xlu0 %v3861_v7  ;;  %v3752_v27 = vpop.f32.mrb[108].mxu0  ;;  %v3864_v16 = vadd.f32 %v7521_v26, %v7519_v14 }
 0x947   : > { %v3753_v61 = vadd.f32 %v3752_v27, %v7382_v55  ;;  %v3754_v43 = vpop.f32.mrb[109].mxu0 }
 0x948   : > { %v3755_v31 = vadd.f32 %v3754_v43, %v7385_v37  ;;  %3865 = vadd.xlane.f32.xlu1 %v3864_v16  ;;  %v3756_v13 = vpop.f32.mrb[110].mxu0 }
 0x949   : > { %v7532_v12 = vadd.f32 %v3789_v20, %v3753_v61  ;;  %v3757_v19 = vadd.f32 %v3756_v13, %v7382_v55  ;;  %v3758_v36 = vpop.f32.mrb[111].mxu0 }
 0x94a   : > { %v7536_v62 = vadd.f32 %v3790_v1, %v3755_v31  ;;  %v3759_v28 = vadd.f32 %v3758_v36, %v7385_v37 }
 0x94b   : > { %v7539_v41 = vadd.f32 %v3791_v45, %v3757_v19 }
 0x94c   : > { %v7541_v6 = vadd.f32 %v3792_v56, %v3759_v28  ;;  %v3867_v22 = vadd.f32 %v7536_v62, %v7532_v12 }
 0x94e   : > { %3868 = vadd.xlane.f32.xlu0 %v3867_v22  ;;  %v3870_v15 = vadd.f32 %v7541_v6, %v7539_v41 }
 0x950   : > { %3871 = vadd.xlane.f32.xlu1 %v3870_v15 }
 0x979   : > { %v3827_v33 = vpop.xlane.xlu1 %3826 }
 0x97a   : > { %v3873_v55 = vmul.f32 0.00390625, %v3827_v33 }
 0x97b   : > { %v3830_v17 = vpop.xlane.xlu0 %3829 }
 0x97c   : > { %v7548_v48 = vsub.f32 %v7392_v5, %v3873_v55  ;;  %v7551_v37 = vsub.f32 %v7396_v38, %v3873_v55  ;;  %v3874_v8 = vmul.f32 0.00390625, %v3830_v17 }
 0x97e   : > { %v3921_v49 = vmul.f32 %v7548_v48, %v7548_v48  ;;  %v3922_v2 = vmul.f32 %v7551_v37, %v7551_v37  ;;  %v7558_v51 = vsub.f32 %v7399_v47, %v3874_v8  ;;  %v7561_v24 = vsub.f32 %v7401_v57, %v3874_v8 }
 0x980   : > { %v3923_v5 = vmul.f32 %v7558_v51, %v7558_v51  ;;  %v3924_v38 = vmul.f32 %v7561_v24, %v7561_v24  ;;  %v3953_v54 = vadd.f32 %v3922_v2, %v3921_v49 }
 0x981   : > { %v3833_v60 = vpop.xlane.xlu0 %3832 }
 0x982   : > { %v3875_v3 = vmul.f32 0.00390625, %v3833_v60  ;;  %3954 = vadd.xlane.f32.xlu0 %v3953_v54  ;;  %v3956_v40 = vadd.f32 %v3924_v38, %v3923_v5 }
 0x983   : > { %v3836_v7 = vpop.xlane.xlu1 %3835 }
 0x984   : > { %v7568_v27 = vsub.f32 %v7412_v59, %v3875_v3  ;;  %v7571_v47 = vsub.f32 %v7416_v35, %v3875_v3  ;;  %v3876_v57 = vmul.f32 0.00390625, %v3836_v7  ;;  %3957 = vadd.xlane.f32.xlu1 %v3956_v40 }
 0x986   : > { %v3925_v20 = vmul.f32 %v7568_v27, %v7568_v27  ;;  %v3926_v16 = vmul.f32 %v7571_v47, %v7571_v47  ;;  %v7578_v61 = vsub.f32 %v7419_v34, %v3876_v57  ;;  %v7581_v43 = vsub.f32 %v7421_v30, %v3876_v57 }
 0x988   : > { %v3927_v59 = vmul.f32 %v7578_v61, %v7578_v61  ;;  %v3928_v35 = vmul.f32 %v7581_v43, %v7581_v43  ;;  %v3959_v1 = vadd.f32 %v3926_v16, %v3925_v20 }
 0x989   : > { %v3839_v31 = vpop.xlane.xlu0 %3838 }
 0x98a   : > { %v3877_v13 = vmul.f32 0.00390625, %v3839_v31  ;;  %3960 = vadd.xlane.f32.xlu0 %v3959_v1  ;;  %v3962_v45 = vadd.f32 %v3928_v35, %v3927_v59 }
 0x98b   : > { %v3842_v19 = vpop.xlane.xlu1 %3841 }
 0x98c   : > { %v7588_v36 = vsub.f32 %v7432_v29, %v3877_v13  ;;  %v7591_v34 = vsub.f32 %v7436_v32, %v3877_v13  ;;  %v3878_v30 = vmul.f32 0.00390625, %v3842_v19  ;;  %3963 = vadd.xlane.f32.xlu1 %v3962_v45 }
 0x98e   : > { %v3929_v56 = vmul.f32 %v7588_v36, %v7588_v36  ;;  %v3930_v28 = vmul.f32 %v7591_v34, %v7591_v34  ;;  %v7598_v22 = vsub.f32 %v7439_v53, %v3878_v30  ;;  %v7601_v15 = vsub.f32 %v7441_v44, %v3878_v30 }
 0x990   : > { %v3931_v29 = vmul.f32 %v7598_v22, %v7598_v22  ;;  %v3932_v32 = vmul.f32 %v7601_v15, %v7601_v15  ;;  %v3965_v33 = vadd.f32 %v3930_v28, %v3929_v56 }
 0x991   : > { %v3845_v55 = vpop.xlane.xlu0 %3844 }
 0x992   : > { %v3879_v17 = vmul.f32 0.00390625, %v3845_v55  ;;  %3966 = vadd.xlane.f32.xlu0 %v3965_v33  ;;  %v3968_v8 = vadd.f32 %v3932_v32, %v3931_v29 }
 0x993   : > { %v3848_v49 = vpop.xlane.xlu1 %3847 }
 0x994   : > { %v7608_v2 = vsub.f32 %v7452_v58, %v3879_v17  ;;  %v7611_v53 = vsub.f32 %v7456_v39, %v3879_v17  ;;  %v3880_v44 = vmul.f32 0.00390625, %v3848_v49  ;;  %3969 = vadd.xlane.f32.xlu1 %v3968_v8 }
 0x996   : > { %v3933_v5 = vmul.f32 %v7608_v2, %v7608_v2  ;;  %v3934_v38 = vmul.f32 %v7611_v53, %v7611_v53  ;;  %v7618_v54 = vsub.f32 %v7459_v63, %v3880_v44  ;;  %v7621_v60 = vsub.f32 %v7461_v21, %v3880_v44 }
 0x998   : > { %v3935_v58 = vmul.f32 %v7618_v54, %v7618_v54  ;;  %v3936_v39 = vmul.f32 %v7621_v60, %v7621_v60  ;;  %v3971_v3 = vadd.f32 %v3934_v38, %v3933_v5 }
 0x99a   : > { %3972 = vadd.xlane.f32.xlu0 %v3971_v3  ;;  %v3974_v40 = vadd.f32 %v3936_v39, %v3935_v58 }
 0x99c   : > { %3975 = vadd.xlane.f32.xlu1 %v3974_v40 }
 0x9c3   : > { %v3851_v7 = vpop.xlane.xlu0 %3850 }
 0x9c4   : > { %v3881_v57 = vmul.f32 0.00390625, %v3851_v7 }
 0x9c5   : > { %v3854_v20 = vpop.xlane.xlu1 %3853 }
 0x9c6   : > { %v7628_v16 = vsub.f32 %v7472_v50, %v3881_v57  ;;  %v7631_v63 = vsub.f32 %v7476_v18, %v3881_v57  ;;  %v3882_v21 = vmul.f32 0.00390625, %v3854_v20 }
 0x9c8   : > { %v3937_v59 = vmul.f32 %v7628_v16, %v7628_v16  ;;  %v3938_v35 = vmul.f32 %v7631_v63, %v7631_v63  ;;  %v7638_v1 = vsub.f32 %v7479_v23, %v3882_v21  ;;  %v7641_v31 = vsub.f32 %v7481_v25, %v3882_v21 }
 0x9ca   : > { %v3939_v50 = vmul.f32 %v7638_v1, %v7638_v1  ;;  %v3940_v18 = vmul.f32 %v7641_v31, %v7641_v31  ;;  %v3977_v13 = vadd.f32 %v3938_v35, %v3937_v59 }
 0x9cb   : > { %v3857_v45 = vpop.xlane.xlu0 %3856 }
 0x9cc   : > { %v3883_v19 = vmul.f32 0.00390625, %v3857_v45  ;;  %3978 = vadd.xlane.f32.xlu0 %v3977_v13  ;;  %v3980_v30 = vadd.f32 %v3940_v18, %v3939_v50 }
 0x9cd   : > { %v3860_v56 = vpop.xlane.xlu1 %3859 }
 0x9ce   : > { %v7648_v28 = vsub.f32 %v7492_v10, %v3883_v19  ;;  %v7651_v23 = vsub.f32 %v7496_v52, %v3883_v19  ;;  %v3884_v25 = vmul.f32 0.00390625, %v3860_v56  ;;  %3981 = vadd.xlane.f32.xlu1 %v3980_v30 }
 0x9d0   : > { %v3941_v29 = vmul.f32 %v7648_v28, %v7648_v28  ;;  %v3942_v32 = vmul.f32 %v7651_v23, %v7651_v23  ;;  %v7658_v33 = vsub.f32 %v7499_v9, %v3884_v25  ;;  %v7661_v55 = vsub.f32 %v7501_v4, %v3884_v25 }
 0x9d2   : > { %v3943_v10 = vmul.f32 %v7658_v33, %v7658_v33  ;;  %v3944_v52 = vmul.f32 %v7661_v55, %v7661_v55  ;;  %v3983_v17 = vadd.f32 %v3942_v32, %v3941_v29 }
 0x9d3   : > { %v3863_v8 = vpop.xlane.xlu0 %3862 }
 0x9d4   : > { %v3885_v49 = vmul.f32 0.00390625, %v3863_v8  ;;  %3984 = vadd.xlane.f32.xlu0 %v3983_v17  ;;  %v3986_v44 = vadd.f32 %v3944_v52, %v3943_v10  ;;  %v4081_v8 = vld [vmem:[%s7914_s6] sm:$0x3] }
 0x9d5   : > { %v3866_v5 = vpop.xlane.xlu1 %3865 }
 0x9d6   : > { %v7668_v38 = vsub.f32 %v7512_v11, %v3885_v49  ;;  %v7671_v9 = vsub.f32 %v7516_v42, %v3885_v49  ;;  %v3886_v4 = vmul.f32 0.00390625, %v3866_v5  ;;  %3987 = vadd.xlane.f32.xlu1 %v3986_v44  ;;  %v4125_v5 = vld [vmem:[%s7915_s7] sm:$0x3] }
 0x9d8   : > { %v3945_v58 = vmul.f32 %v7668_v38, %v7668_v38  ;;  %v3946_v39 = vmul.f32 %v7671_v9, %v7671_v9  ;;  %v7678_v3 = vsub.f32 %v7519_v14, %v3886_v4  ;;  %v7681_v40 = vsub.f32 %v7521_v26, %v3886_v4 }
 0x9da   : > { %v3947_v11 = vmul.f32 %v7678_v3, %v7678_v3  ;;  %v3948_v42 = vmul.f32 %v7681_v40, %v7681_v40  ;;  %v3989_v7 = vadd.f32 %v3946_v39, %v3945_v58  ;;  %v7714_v58 = vrot.slane %v4081_v8, %v8094_v0 }
 0x9db   : > { %v3869_v57 = vpop.xlane.xlu0 %3868  ;;  %v7717_v39 = vrot.slane %v4081_v8, %v8095_v46 }
 0x9dc   : > { %v3887_v20 = vmul.f32 0.00390625, %v3869_v57  ;;  %3990 = vadd.xlane.f32.xlu0 %v3989_v7  ;;  %v3992_v21 = vadd.f32 %v3948_v42, %v3947_v11  ;;  %v7720_v42 = vrot.slane %v4125_v5, %v8094_v0  ;;  %v7723_v7 = vrot.slane %v4125_v5, %v8095_v46 }
 0x9dd   : > { %v3872_v59 = vpop.xlane.xlu1 %3871 }
 0x9de   : > { %v7688_v35 = vsub.f32 %v7532_v12, %v3887_v20  ;;  %v7691_v14 = vsub.f32 %v7536_v62, %v3887_v20  ;;  %v3888_v26 = vmul.f32 0.00390625, %v3872_v59  ;;  %3993 = vadd.xlane.f32.xlu1 %v3992_v21 }
 0x9e0   : > { %v3949_v50 = vmul.f32 %v7688_v35, %v7688_v35  ;;  %v3950_v18 = vmul.f32 %v7691_v14, %v7691_v14  ;;  %v7698_v13 = vsub.f32 %v7539_v41, %v3888_v26  ;;  %v7701_v45 = vsub.f32 %v7541_v6, %v3888_v26 }
 0x9e2   : > { %v3951_v12 = vmul.f32 %v7698_v13, %v7698_v13  ;;  %v3952_v62 = vmul.f32 %v7701_v45, %v7701_v45  ;;  %v3995_v19 = vadd.f32 %v3950_v18, %v3949_v50 }
 0x9e4   : > { %3996 = vadd.xlane.f32.xlu0 %v3995_v19  ;;  %v3998_v30 = vadd.f32 %v3952_v62, %v3951_v12 }
 0x9e6   : > { %3999 = vadd.xlane.f32.xlu1 %v3998_v30 }
 0xa0f   : > { %v3955_v56 = vpop.xlane.xlu0 %3954 }
 0xa10   : > { %v4001_v25 = vmul.f32 0.00390625, %v3955_v56 }
 0xa11   : > { %v3958_v29 = vpop.xlane.xlu1 %3957 }
 0xa12   : > { %v4017_v32 = vadd.f32 1e-12, %v4001_v25  ;;  %v4002_v10 = vmul.f32 0.00390625, %v3958_v29 }
 0xa14   : > { %5437 = vrsqrt.f32 %v4017_v32  ;;  %v4018_v41 = vadd.f32 1e-12, %v4002_v10 }
 0xa16   : > { %5439 = vrsqrt.f32 %v4018_v41 }
 0xa17   : > { %v3961_v6 = vpop.xlane.xlu0 %3960 }
 0xa18   : > { %v4003_v52 = vmul.f32 0.00390625, %v3961_v6 }
 0xa19   : > { %v3964_v17 = vpop.xlane.xlu1 %3963 }
 0xa1a   : > { %v4019_v49 = vadd.f32 1e-12, %v4003_v52  ;;  %v4004_v44 = vmul.f32 0.00390625, %v3964_v17 }
 0xa1c   : > { %5441 = vrsqrt.f32 %v4019_v49  ;;  %v4020_v4 = vadd.f32 1e-12, %v4004_v44 }
 0xa1e   : > { %v5438_v11 = vpop.eup %5437  ;;  %5443 = vrsqrt.f32 %v4020_v4 }
 0xa1f   : > { %v4049_v57 = vmul.f32 %v5438_v11, %v7548_v48  ;;  %v4050_v20 = vmul.f32 %v5438_v11, %v7551_v37  ;;  %v3967_v21 = vpop.xlane.xlu0 %3966 }
 0xa20   : > { %v5440_v59 = vpop.eup %5439  ;;  %v4005_v26 = vmul.f32 0.00390625, %v3967_v21 }
 0xa21   : > { %v4093_v50 = vmul.f32 %v7714_v58, %v4049_v57  ;;  %v4094_v18 = vmul.f32 %v7717_v39, %v4050_v20  ;;  %v4051_v12 = vmul.f32 %v5440_v59, %v7558_v51  ;;  %v4052_v0 = vmul.f32 %v5440_v59, %v7561_v24  ;;  %v3970_v62 = vpop.xlane.xlu1 %3969 }
 0xa22   : > { %v4021_v19 = vadd.f32 1e-12, %v4005_v26  ;;  %v4006_v46 = vmul.f32 0.00390625, %v3970_v62 }
 0xa23   : > { %v4137_v30 = vadd.f32 %v7720_v42, %v4093_v50  ;;  %v4138_v48 = vadd.f32 %v7723_v7, %v4094_v18  ;;  %v4095_v37 = vmul.f32 %v7714_v58, %v4051_v12  ;;  %v4096_v56 = vmul.f32 %v7717_v39, %v4052_v0 }
 0xa24   : > { %5445 = vrsqrt.f32 %v4021_v19  ;;  %v4022_v25 = vadd.f32 1e-12, %v4006_v46 }
 0xa25   : > { %4169 = vst [vmem:[%s7737_s10] sm:$0xff] %v4137_v30  ;;  %4170 = vst [vmem:[%s7737_s10 + $0x8] sm:$0xff] %v4138_v48  ;;  %v4139_v51 = vadd.f32 %v7720_v42, %v4095_v37  ;;  %v4140_v24 = vadd.f32 %v7723_v7, %v4096_v56 }
 0xa26   : > { %v5442_v29 = vpop.eup %5441  ;;  %5447 = vrsqrt.f32 %v4022_v25 }
 0xa27   : > { %4171 = vst [vmem:[%s7737_s10 + $0x10] sm:$0xff] %v4139_v51  ;;  %4172 = vst [vmem:[%s7737_s10 + $0x18] sm:$0xff] %v4140_v24  ;;  %v4053_v32 = vmul.f32 %v5442_v29, %v7568_v27  ;;  %v4054_v10 = vmul.f32 %v5442_v29, %v7571_v47  ;;  %v3973_v41 = vpop.xlane.xlu0 %3972 }
 0xa28   : > { %v5444_v6 = vpop.eup %5443  ;;  %v4007_v52 = vmul.f32 0.00390625, %v3973_v41 }
 0xa29   : > { %v4097_v17 = vmul.f32 %v7714_v58, %v4053_v32  ;;  %v4098_v8 = vmul.f32 %v7717_v39, %v4054_v10  ;;  %v4055_v49 = vmul.f32 %v5444_v6, %v7578_v61  ;;  %v4056_v44 = vmul.f32 %v5444_v6, %v7581_v43  ;;  %v3976_v5 = vpop.xlane.xlu1 %3975 }
 0xa2a   : > { %v4023_v4 = vadd.f32 1e-12, %v4007_v52  ;;  %v4008_v27 = vmul.f32 0.00390625, %v3976_v5 }
 0xa2b   : > { %v4141_v47 = vadd.f32 %v7720_v42, %v4097_v17  ;;  %v4142_v11 = vadd.f32 %v7723_v7, %v4098_v8  ;;  %v4099_v57 = vmul.f32 %v7714_v58, %v4055_v49  ;;  %v4100_v20 = vmul.f32 %v7717_v39, %v4056_v44 }
 0xa2c   : > { %5449 = vrsqrt.f32 %v4023_v4  ;;  %v4024_v21 = vadd.f32 1e-12, %v4008_v27 }
 0xa2d   : > { %4173 = vst [vmem:[%s7737_s10 + $0x20] sm:$0xff] %v4141_v47  ;;  %4174 = vst [vmem:[%s7737_s10 + $0x28] sm:$0xff] %v4142_v11  ;;  %v4143_v61 = vadd.f32 %v7720_v42, %v4099_v57  ;;  %v4144_v43 = vadd.f32 %v7723_v7, %v4100_v20 }
 0xa2e   : > { %v5446_v59 = vpop.eup %5445  ;;  %5451 = vrsqrt.f32 %v4024_v21 }
 0xa2f   : > { %4175 = vst [vmem:[%s7737_s10 + $0x30] sm:$0xff] %v4143_v61  ;;  %4176 = vst [vmem:[%s7737_s10 + $0x38] sm:$0xff] %v4144_v43  ;;  %v4057_v26 = vmul.f32 %v5446_v59, %v7588_v36  ;;  %v4058_v50 = vmul.f32 %v5446_v59, %v7591_v34 }
 0xa30   : > { %v5448_v18 = vpop.eup %5447 }
 0xa31   : > { %v4101_v12 = vmul.f32 %v7714_v58, %v4057_v26  ;;  %v4102_v0 = vmul.f32 %v7717_v39, %v4058_v50  ;;  %v4059_v62 = vmul.f32 %v5448_v18, %v7598_v22  ;;  %v4060_v19 = vmul.f32 %v5448_v18, %v7601_v15 }
 0xa33   : > { %v4145_v46 = vadd.f32 %v7720_v42, %v4101_v12  ;;  %v4146_v30 = vadd.f32 %v7723_v7, %v4102_v0  ;;  %v4103_v48 = vmul.f32 %v7714_v58, %v4059_v62  ;;  %v4104_v36 = vmul.f32 %v7717_v39, %v4060_v19 }
 0xa35   : > { %4177 = vst [vmem:[%s7737_s10 + $0x40] sm:$0xff] %v4145_v46  ;;  %4178 = vst [vmem:[%s7737_s10 + $0x48] sm:$0xff] %v4146_v30  ;;  %v4147_v34 = vadd.f32 %v7720_v42, %v4103_v48  ;;  %v4148_v37 = vadd.f32 %v7723_v7, %v4104_v36 }
 0xa36   : > { %v5450_v56 = vpop.eup %5449 }
 0xa37   : > { %4179 = vst [vmem:[%s7737_s10 + $0x50] sm:$0xff] %v4147_v34  ;;  %4180 = vst [vmem:[%s7737_s10 + $0x58] sm:$0xff] %v4148_v37  ;;  %v4061_v22 = vmul.f32 %v5450_v56, %v7608_v2  ;;  %v4062_v15 = vmul.f32 %v5450_v56, %v7611_v53 }
 0xa38   : > { %v5452_v25 = vpop.eup %5451 }
 0xa39   : > { %v4105_v51 = vmul.f32 %v7714_v58, %v4061_v22  ;;  %v4106_v24 = vmul.f32 %v7717_v39, %v4062_v15  ;;  %v4063_v29 = vmul.f32 %v5452_v25, %v7618_v54  ;;  %v4064_v32 = vmul.f32 %v5452_v25, %v7621_v60 }
 0xa3b   : > { %v4149_v10 = vadd.f32 %v7720_v42, %v4105_v51  ;;  %v4150_v41 = vadd.f32 %v7723_v7, %v4106_v24  ;;  %v4107_v6 = vmul.f32 %v7714_v58, %v4063_v29  ;;  %v4108_v2 = vmul.f32 %v7717_v39, %v4064_v32 }
 0xa3d   : > { %4181 = vst [vmem:[%s7737_s10 + $0x60] sm:$0xff] %v4149_v10  ;;  %4182 = vst [vmem:[%s7737_s10 + $0x68] sm:$0xff] %v4150_v41  ;;  %v4151_v53 = vadd.f32 %v7720_v42, %v4107_v6  ;;  %v4152_v52 = vadd.f32 %v7723_v7, %v4108_v2 }
 0xa3f   : > { %4183 = vst [vmem:[%s7737_s10 + $0x70] sm:$0xff] %v4151_v53  ;;  %4184 = vst [vmem:[%s7737_s10 + $0x78] sm:$0xff] %v4152_v52 }
 0xa59   : > { %v3979_v17 = vpop.xlane.xlu0 %3978 }
 0xa5a   : > { %v4009_v54 = vmul.f32 0.00390625, %v3979_v17 }
 0xa5b   : > { %v3982_v8 = vpop.xlane.xlu1 %3981 }
 0xa5c   : > { %v4025_v60 = vadd.f32 1e-12, %v4009_v54  ;;  %v4010_v49 = vmul.f32 0.00390625, %v3982_v8 }
 0xa5e   : > { %5453 = vrsqrt.f32 %v4025_v60  ;;  %v4026_v44 = vadd.f32 1e-12, %v4010_v49 }
 0xa60   : > { %5455 = vrsqrt.f32 %v4026_v44 }
 0xa61   : > { %v3985_v5 = vpop.xlane.xlu0 %3984 }
 0xa62   : > { %v4011_v4 = vmul.f32 0.00390625, %v3985_v5 }
 0xa63   : > { %v3988_v27 = vpop.xlane.xlu1 %3987 }
 0xa64   : > { %v4027_v47 = vadd.f32 1e-12, %v4011_v4  ;;  %v4012_v11 = vmul.f32 0.00390625, %v3988_v27 }
 0xa66   : > { %5457 = vrsqrt.f32 %v4027_v47  ;;  %v4028_v57 = vadd.f32 1e-12, %v4012_v11 }
 0xa68   : > { %v5454_v20 = vpop.eup %5453  ;;  %5459 = vrsqrt.f32 %v4028_v57 }
 0xa69   : > { %v4065_v21 = vmul.f32 %v5454_v20, %v7628_v16  ;;  %v4066_v61 = vmul.f32 %v5454_v20, %v7631_v63  ;;  %v3991_v43 = vpop.xlane.xlu0 %3990 }
 0xa6a   : > { %v5456_v59 = vpop.eup %5455  ;;  %v4013_v26 = vmul.f32 0.00390625, %v3991_v43 }
 0xa6b   : > { %v4109_v50 = vmul.f32 %v7714_v58, %v4065_v21  ;;  %v4110_v18 = vmul.f32 %v7717_v39, %v4066_v61  ;;  %v4067_v12 = vmul.f32 %v5456_v59, %v7638_v1  ;;  %v4068_v0 = vmul.f32 %v5456_v59, %v7641_v31  ;;  %v3994_v62 = vpop.xlane.xlu1 %3993 }
 0xa6c   : > { %v4029_v19 = vadd.f32 1e-12, %v4013_v26  ;;  %v4014_v16 = vmul.f32 0.00390625, %v3994_v62 }
 0xa6d   : > { %v4153_v63 = vadd.f32 %v7720_v42, %v4109_v50  ;;  %v4154_v46 = vadd.f32 %v7723_v7, %v4110_v18  ;;  %v4111_v30 = vmul.f32 %v7714_v58, %v4067_v12  ;;  %v4112_v48 = vmul.f32 %v7717_v39, %v4068_v0 }
 0xa6e   : > { %5461 = vrsqrt.f32 %v4029_v19  ;;  %v4030_v36 = vadd.f32 1e-12, %v4014_v16 }
 0xa6f   : > { %4185 = vst [vmem:[%s7737_s10 + $0x80] sm:$0xff] %v4153_v63  ;;  %4186 = vst [vmem:[%s7737_s10 + $0x88] sm:$0xff] %v4154_v46  ;;  %v4155_v1 = vadd.f32 %v7720_v42, %v4111_v30  ;;  %v4156_v31 = vadd.f32 %v7723_v7, %v4112_v48 }
 0xa70   : > { %v5458_v34 = vpop.eup %5457  ;;  %5463 = vrsqrt.f32 %v4030_v36 }
 0xa71   : > { %4187 = vst [vmem:[%s7737_s10 + $0x90] sm:$0xff] %v4155_v1  ;;  %4188 = vst [vmem:[%s7737_s10 + $0x98] sm:$0xff] %v4156_v31  ;;  %v4069_v37 = vmul.f32 %v5458_v34, %v7648_v28  ;;  %v4070_v56 = vmul.f32 %v5458_v34, %v7651_v23  ;;  %v3997_v22 = vpop.xlane.xlu0 %3996 }
 0xa72   : > { %v5460_v15 = vpop.eup %5459  ;;  %v4015_v25 = vmul.f32 0.00390625, %v3997_v22 }
 0xa73   : > { %v4113_v51 = vmul.f32 %v7714_v58, %v4069_v37  ;;  %v4114_v24 = vmul.f32 %v7717_v39, %v4070_v56  ;;  %v4071_v29 = vmul.f32 %v5460_v15, %v7658_v33  ;;  %v4072_v32 = vmul.f32 %v5460_v15, %v7661_v55  ;;  %v4000_v10 = vpop.xlane.xlu1 %3999 }
 0xa74   : > { %v4031_v41 = vadd.f32 1e-12, %v4015_v25  ;;  %v4016_v28 = vmul.f32 0.00390625, %v4000_v10 }
 0xa75   : > { %v4157_v23 = vadd.f32 %v7720_v42, %v4113_v51  ;;  %v4158_v6 = vadd.f32 %v7723_v7, %v4114_v24  ;;  %v4115_v2 = vmul.f32 %v7714_v58, %v4071_v29  ;;  %v4116_v53 = vmul.f32 %v7717_v39, %v4072_v32 }
 0xa76   : > { %5465 = vrsqrt.f32 %v4031_v41  ;;  %v4032_v52 = vadd.f32 1e-12, %v4016_v28 }
 0xa77   : > { %4189 = vst [vmem:[%s7737_s10 + $0xa0] sm:$0xff] %v4157_v23  ;;  %4190 = vst [vmem:[%s7737_s10 + $0xa8] sm:$0xff] %v4158_v6  ;;  %v4159_v33 = vadd.f32 %v7720_v42, %v4115_v2  ;;  %v4160_v55 = vadd.f32 %v7723_v7, %v4116_v53 }
 0xa78   : > { %v5462_v17 = vpop.eup %5461  ;;  %5467 = vrsqrt.f32 %v4032_v52 }
 0xa79   : > { %4191 = vst [vmem:[%s7737_s10 + $0xb0] sm:$0xff] %v4159_v33  ;;  %4192 = vst [vmem:[%s7737_s10 + $0xb8] sm:$0xff] %v4160_v55  ;;  %v4073_v54 = vmul.f32 %v5462_v17, %v7668_v38  ;;  %v4074_v8 = vmul.f32 %v5462_v17, %v7671_v9 }
 0xa7a   : > { %v5464_v60 = vpop.eup %5463 }
 0xa7b   : > { %v4117_v49 = vmul.f32 %v7714_v58, %v4073_v54  ;;  %v4118_v44 = vmul.f32 %v7717_v39, %v4074_v8  ;;  %v4075_v5 = vmul.f32 %v5464_v60, %v7678_v3  ;;  %v4076_v4 = vmul.f32 %v5464_v60, %v7681_v40 }
 0xa7d   : > { %v4161_v27 = vadd.f32 %v7720_v42, %v4117_v49  ;;  %v4162_v47 = vadd.f32 %v7723_v7, %v4118_v44  ;;  %v4119_v11 = vmul.f32 %v7714_v58, %v4075_v5  ;;  %v4120_v38 = vmul.f32 %v7717_v39, %v4076_v4 }
 0xa7f   : > { %4193 = vst [vmem:[%s7737_s10 + $0xc0] sm:$0xff] %v4161_v27  ;;  %4194 = vst [vmem:[%s7737_s10 + $0xc8] sm:$0xff] %v4162_v47  ;;  %v4163_v9 = vadd.f32 %v7720_v42, %v4119_v11  ;;  %v4164_v57 = vadd.f32 %v7723_v7, %v4120_v38 }
 0xa80   : > { %v5466_v20 = vpop.eup %5465 }
 0xa81   : > { %4195 = vst [vmem:[%s7737_s10 + $0xd0] sm:$0xff] %v4163_v9  ;;  %4196 = vst [vmem:[%s7737_s10 + $0xd8] sm:$0xff] %v4164_v57  ;;  %v4077_v3 = vmul.f32 %v5466_v20, %v7688_v35  ;;  %v4078_v40 = vmul.f32 %v5466_v20, %v7691_v14 }
 0xa82   : > { %v5468_v21 = vpop.eup %5467 }
 0xa83   : > { %v4121_v61 = vmul.f32 %v7714_v58, %v4077_v3  ;;  %v4122_v43 = vmul.f32 %v7717_v39, %v4078_v40  ;;  %v4079_v59 = vmul.f32 %v5468_v21, %v7698_v13  ;;  %v4080_v26 = vmul.f32 %v5468_v21, %v7701_v45 }
 0xa85   : > { %v4165_v35 = vadd.f32 %v7720_v42, %v4121_v61  ;;  %v4166_v50 = vadd.f32 %v7723_v7, %v4122_v43  ;;  %v4123_v14 = vmul.f32 %v7714_v58, %v4079_v59  ;;  %v4124_v18 = vmul.f32 %v7717_v39, %v4080_v26 }
 0xa87   : > { %4197 = vst [vmem:[%s7737_s10 + $0xe0] sm:$0xff] %v4165_v35  ;;  %4198 = vst [vmem:[%s7737_s10 + $0xe8] sm:$0xff] %v4166_v50  ;;  %v4167_v13 = vadd.f32 %v7720_v42, %v4123_v14  ;;  %v4168_v45 = vadd.f32 %v7723_v7, %v4124_v18 }
 0xa89   : > { %4199 = vst [vmem:[%s7737_s10 + $0xf0] sm:$0xff] %v4167_v13  ;;  %4200 = vst [vmem:[%s7737_s10 + $0xf8] sm:$0xff] %v4168_v45 }
 0xa8a   : > { %5569 = shalt.err (!%p5566_p13)
}
 0xa8b   : > { %s5570_s11 = scalar_lea.hbm %s7856_s15, 4096  ;;  %s5574_s16 = scalar_lea.hbm %s7916_s8, 8192 }
 0xa8c   : > { %p5571_p6 = scmp.ne.s32.totalorder %s7856_s15, %s5570_s11  ;;  %p5575_p7 = scmp.lt.u32.totalorder %s7856_s15, %s7916_s8 }
 0xa8d   : > { %p5576_p8 = scmp.lt.u32.totalorder %s5574_s16, %s5570_s11  ;;  %p5578_p0 = scmp.lt.u32.totalorder %s5570_s11, %s7856_s15 }
 0xa8e   : > { %p5572_p10 = pnand %p5571_p6, %p8096_p1 }
 0xa8f   : > { %p5577_p11 = por %p5576_p8, %p5575_p7 }
 0xa90   : > { %p5573_p4 = pneg %p5572_p10 }
 0xa91   : > { %p5579_p3 = por %p5578_p0, %p5577_p11 }
 0xa93   : > { %p5580_p5 = pnand %p5579_p3, %p5573_p4 }
 0xa95   : > { %5583 = shalt.err (!%p5580_p5)
}
 0xa96   : > { %s5639_s22 = smov 256   ;;  %s5640_s26 = smov 16  }
 0xa97   : > { %4923 = dma.vmem_to_hbm [thread:$0]  (%p8096_p1), %s7858_s17, 4096, %s7856_s15, %s4202_s9, %s5639_s22, %s5639_s22, %s5640_s26  }
 0xa98 PF: > { %s4230_s25 = sand.u32 1, %s5614_s27   ;;  %p8097_p9 = scmp.ne.s32.totalorder %s7949_s12, 0 }
 0xa99   : > { %p8098_p12 = scmp.ge.s32.totalorder %s5626_s30, 2  ;;  %s4231_s18 = scalar_lea.sflag [#allocation6], %s4230_s25 }
 0xa9b   : > { %p4937_p2 = pnand %p8098_p12, %p8097_p9 }
 0xa9d   : > { %5609 = dma.done.wait (!%p4937_p2), %s4231_s18, 4096  }
 0xa9e   : > { %5611 = vsyncadd (!%p4937_p2), %s4231_s18, 4294963200  ;;  %p22_p13 = scmp.ge.s32.totalorder %s5796_s20, 4   ;;  %s8099_s27 = smov %s5618_s28 }
 0xa9f   : > { %s8100_s28 = smov %s5622_s29  ;;  %s8101_s29 = smov %s5805_s23 }
 0xaa0   : > { %s8102_s30 = smov %s5796_s20  ;;  %24 = sbr.rel (!%p22_p13) target bundleno = 6 (0x6), region = 108 }
 0xaa7   :  { %4236 = vsyncpa [#allocation5], 1 }
 0xaa8   :  { %4238 = vsyncpa [#allocation5 + $0x1], 1 }
 0xaa9   :  { %4239 = vsyncpa [#allocation8], 1 }
 0xaaa   :  { %4240 = vsyncpa [#allocation6], 1 }
 0xaab   :  { %4242 = vsyncpa [#allocation6 + $0x1], 1 }

</bundles_post_ra>
